<compile_context>
chip_gen: v7x
topology: tpu7x:2x2x1
jax: 0.10.0
libtpu: 0.0.40
codegen_flags: <defaults>
</compile_context>

<pallas_src>
import functools

import jax
import jax.numpy as jnp
from jax.experimental import pallas as pl
from jax.experimental.pallas import tpu as pltpu

LANE = 128
SUBLANE = 8


# ---------------------------------------------------------------------------
# Kernel
# ---------------------------------------------------------------------------
def bottleneck_kernel(*refs, has_proj):
    if has_proj:
        (xc_ref, xt_ref, xb_ref,
         w1_ref, s1_ref, b1_ref,
         w2_ref, s2_ref, b2_ref,
         w3_ref, s3_ref, b3_ref,
         wsc_ref, ssc_ref, bsc_ref,
         o_ref, p1_ref) = refs
    else:
        (xc_ref, xt_ref, xb_ref,
         w1_ref, s1_ref, b1_ref,
         w2_ref, s2_ref, b2_ref,
         w3_ref, s3_ref, b3_ref,
         o_ref, p1_ref) = refs
        wsc_ref = ssc_ref = bsc_ref = None

    h_idx = pl.program_id(1)
    n_h = pl.num_programs(1)

    M, _ = xc_ref.shape          # tile_h * W rows (flattened spatial slab)
    W = xt_ref.shape[0]          # image width (one halo row per side)
    Pp = w1_ref.shape[1]         # padded bottleneck width

    s1 = s1_ref[...]
    b1 = b1_ref[...]

    # ---- conv1 (1x1) + bn1 + relu on the centre slab -----------------------
    o1 = jnp.dot(xc_ref[...], w1_ref[...], preferred_element_type=jnp.float32)
    o1 = jnp.maximum(o1 * s1 + b1, 0.0)

    # ---- stage the 3x3 input into the flat, sublane-aligned scratch --------
    # Layout: [8 zero rows | halo_top (W) | centre (M) | halo_bot (W) | 8 zero
    # rows].  All store offsets are multiples of 8 (W % 8 == 0), so staging is
    # unmasked sublane-dense; the zero blocks cover the single-row over-reads
    # of the corner taps (which are masked out anyway, so no NaN risk).
    def halo(row_ref, is_edge):
        o = jnp.dot(row_ref[...], w1_ref[...], preferred_element_type=jnp.float32)
        o = jnp.maximum(o * s1 + b1, 0.0)
        return (o * jnp.where(is_edge, 0.0, 1.0)).astype(p1_ref.dtype)

    zeros8 = jnp.zeros((SUBLANE, Pp), p1_ref.dtype)
    data_rows = 2 * W + M
    p1_ref[0:SUBLANE, :] = zeros8
    p1_ref[SUBLANE + data_rows:SUBLANE + data_rows + SUBLANE, :] = zeros8
    p1_ref[SUBLANE:SUBLANE + W, :] = halo(xt_ref, h_idx == 0)
    p1_ref[SUBLANE + W:SUBLANE + W + M, :] = o1.astype(p1_ref.dtype)
    p1_ref[SUBLANE + W + M:SUBLANE + data_rows, :] = halo(xb_ref, h_idx == n_h - 1)

    # ---- conv2 (3x3, stride=1, pad=1) + bn2 + relu --------------------------
    # 9 thin K=Pp matmuls on statically shifted flat slices.  Taps that read a
    # neighbouring image row's edge column are zeroed with one mask per kx.
    def tap(ky, kx):
        start = SUBLANE + ky * W + kx - 1
        return jnp.dot(p1_ref[start:start + M, :], w2_ref[ky * 3 + kx],
                       preferred_element_type=jnp.float32)

    acc_c = tap(0, 1) + tap(1, 1) + tap(2, 1)      # centre column: no mask
    acc_l = tap(0, 0) + tap(1, 0) + tap(2, 0)
    acc_r = tap(0, 2) + tap(1, 2) + tap(2, 2)

    col = jax.lax.broadcasted_iota(jnp.int32, (M, 1), 0) % W
    acc = (acc_c
           + jnp.where(col == 0, 0.0, acc_l)
           + jnp.where(col == W - 1, 0.0, acc_r))

    o2 = jnp.maximum(acc * s2_ref[...] + b2_ref[...], 0.0).astype(jnp.bfloat16)

    # ---- conv3 (1x1) + bn3 --------------------------------------------------
    o3 = jnp.dot(o2, w3_ref[...], preferred_element_type=jnp.float32)
    o3 = o3 * s3_ref[...] + b3_ref[...]

    # ---- shortcut (issued late -> short fp32 live range) + add + relu -------
    if has_proj:
        sc = jnp.dot(xc_ref[...], wsc_ref[...], preferred_element_type=jnp.float32)
        sc = sc * ssc_ref[...] + bsc_ref[...]
    else:
        sc = xc_ref[...].astype(jnp.float32)

    o_ref[...] = jnp.maximum(o3 + sc, 0.0).astype(o_ref.dtype)


# ---------------------------------------------------------------------------
# Wrapper
# ---------------------------------------------------------------------------
def _round_up(x, m):
    return (x + m - 1) // m * m


def _pad_axis(a, target, axis):
    pad = target - a.shape[axis]
    if pad == 0:
        return a
    widths = [(0, 0)] * a.ndim
    widths[axis] = (0, pad)
    return jnp.pad(a, widths)


def _vmem_budget_bytes():
    """Generation-gated scoped-VMEM budget (128 MiB-class vs 64 MiB-class)."""
    try:
        kind = jax.devices()[0].device_kind.lower()
    except Exception:
        kind = ""
    if ("v5" in kind) or ("v6" in kind):      # 128 MiB physical VMEM per core
        return 96 * 1024 * 1024
    return 48 * 1024 * 1024                   # v7x (64 MiB) / unknown chips


def _estimate_vmem_bytes(tile_h, W, Cin_p, P_p, Cout_p, weight_bytes):
    m = tile_h * W
    act_in = 2 * (m + 2 * W) * Cin_p * 2          # x slab + halos, 2x bf16
    act_out = 2 * m * Cout_p * 2                  # bf16 out, double-buffered
    scratch = (2 * SUBLANE + (tile_h + 2) * W) * P_p * 2
    temps = 4 * m * max(P_p, Cout_p) * 4          # fp32 accumulators / o3 / sc
    return act_in + act_out + scratch + temps + 2 * weight_bytes


def bottleneck_forward_nhwc(x_nhwc, p, *, tile_h=None):
    """x_nhwc: (N, H, W, Cin) -> (N, H, W, Cout) bf16.  Inference, stride=1."""
    N, H, W, Cin = x_nhwc.shape
    P = p["w1"].shape[1]
    Cout = p["w3"].shape[1]
    has_proj = "wsc" in p
    if not has_proj:
        assert Cin == Cout, "identity shortcut needs in_planes == expansion*planes"
    assert W % SUBLANE == 0, "flat staging needs W % 8 == 0"
    # TODO(synk): pad W up to a multiple of 8 for odd widths (e.g. 7x7 stages).

    Cin_p = _round_up(Cin, LANE)
    P_p = _round_up(P, LANE)
    Cout_p = _round_up(Cout, LANE)

    # Flat channels-last bf16 activations (fp32 accumulation happens in-kernel).
    x = _pad_axis(x_nhwc.reshape(N, H * W, Cin), Cin_p, 2).astype(jnp.bfloat16)

    w1 = _pad_axis(_pad_axis(p["w1"], Cin_p, 0), P_p, 1).astype(jnp.bfloat16)
    s1 = _pad_axis(p["s1"], P_p, 1)
    b1 = _pad_axis(p["b1"], P_p, 1)
    w2 = _pad_axis(_pad_axis(p["w2"], P_p, 1), P_p, 2).astype(jnp.bfloat16)  # (9,P_p,P_p)
    s2 = _pad_axis(p["s2"], P_p, 1)
    b2 = _pad_axis(p["b2"], P_p, 1)
    w3 = _pad_axis(_pad_axis(p["w3"], P_p, 0), Cout_p, 1).astype(jnp.bfloat16)
    s3 = _pad_axis(p["s3"], Cout_p, 1)
    b3 = _pad_axis(p["b3"], Cout_p, 1)

    args = [x, x, x, w1, s1, b1, w2, s2, b2, w3, s3, b3]
    if has_proj:
        wsc = _pad_axis(_pad_axis(p["wsc"], Cin_p, 0), Cout_p, 1).astype(jnp.bfloat16)
        ssc = _pad_axis(p["ssc"], Cout_p, 1)
        bsc = _pad_axis(p["bsc"], Cout_p, 1)
        args += [wsc, ssc, bsc]

    weight_bytes = sum(int(a.size) * a.dtype.itemsize for a in args[3:])
    budget = _vmem_budget_bytes()

    if tile_h is None:
        rows_cap = 1024 if budget <= 48 * 1024 * 1024 else 4096
        tile_h = 1
        for cand in range(H, 0, -1):
            if H % cand or cand * W > rows_cap:
                continue
            if _estimate_vmem_bytes(cand, W, Cin_p, P_p, Cout_p,
                                    weight_bytes) <= int(0.8 * budget):
                tile_h = cand
                break
    assert H % tile_h == 0

    M = tile_h * W
    grid = (N, H // tile_h)

    xc_spec = pl.BlockSpec((None, M, Cin_p), lambda n, h: (n, h, 0))
    xt_spec = pl.BlockSpec((None, W, Cin_p),
                           lambda n, h: (n, jnp.maximum(h * tile_h - 1, 0), 0))
    xb_spec = pl.BlockSpec((None, W, Cin_p),
                           lambda n, h: (n, jnp.minimum((h + 1) * tile_h, H - 1), 0))
    out_spec = pl.BlockSpec((None, M, Cout_p), lambda n, h: (n, h, 0))

    def build(single_buffer_weights):
        def full_spec(a):
            nd = a.ndim
            idx = lambda n, h, _nd=nd: (0,) * _nd
            if single_buffer_weights:
                return pl.BlockSpec(a.shape, idx, pipeline_mode=pl.Buffered(1))
            return pl.BlockSpec(a.shape, idx)

        in_specs = [xc_spec, xt_spec, xb_spec] + [full_spec(a) for a in args[3:]]
        return pl.pallas_call(
            functools.partial(bottleneck_kernel, has_proj=has_proj),
            out_shape=jax.ShapeDtypeStruct((N, H * W, Cout_p), jnp.bfloat16),
            grid=grid,
            in_specs=in_specs,
            out_specs=out_spec,
            scratch_shapes=[
                pltpu.VMEM((2 * SUBLANE + (tile_h + 2) * W, P_p), jnp.bfloat16),
            ],
            compiler_params=pltpu.CompilerParams(
                dimension_semantics=("parallel", "parallel"),
                vmem_limit_bytes=int(budget)),
        )

    try:
        out = build(True)(*args)     # single-buffered grid-invariant weights
    except Exception:
        out = build(False)(*args)    # fallback if Buffered(1) is unsupported

    return out[..., :Cout].reshape(N, H, W, Cout)


def bottleneck_forward(x_nchw, p, *, tile_h=None):
    """NCHW compatibility shim matching the PyTorch module interface.

    The NHWC entry point is the fast path; keep the surrounding network NHWC
    to avoid these extra HBM round trips (they are layout plumbing only).
    """
    out = bottleneck_forward_nhwc(jnp.transpose(x_nchw, (0, 2, 3, 1)), p,
                                  tile_h=tile_h)
    return jnp.transpose(out, (0, 3, 1, 2)).astype(jnp.float32)


# ---------------------------------------------------------------------------
# Parameter construction + pure-JAX reference for validation
# ---------------------------------------------------------------------------
def _bn_fold(gamma, beta, mean, var, eps=1e-5):
    scale = gamma / jnp.sqrt(var + eps)
    bias = beta - mean * scale
    return scale[None, :], bias[None, :]


def make_params(key, in_planes, planes, expansion=4, with_proj=True):
    ks = jax.random.split(key, 20)
    cout = expansion * planes

    def bn_params(k, c):
        k1, k2, k3, k4 = jax.random.split(k, 4)
        gamma = 1.0 + 0.1 * jax.random.normal(k1, (c,), jnp.float32)
        beta = 0.1 * jax.random.normal(k2, (c,), jnp.float32)
        mean = 0.1 * jax.random.normal(k3, (c,), jnp.float32)
        var = jnp.abs(jax.random.normal(k4, (c,), jnp.float32)) + 0.5
        return _bn_fold(gamma, beta, mean, var)

    p = {}
    p["w1"] = 0.2 * jax.random.normal(ks[0], (in_planes, planes), jnp.float32)
    p["s1"], p["b1"] = bn_params(ks[1], planes)
    p["w2"] = 0.2 * jax.random.normal(ks[2], (9, planes, planes), jnp.float32)
    p["s2"], p["b2"] = bn_params(ks[3], planes)
    p["w3"] = 0.2 * jax.random.normal(ks[4], (planes, cout), jnp.float32)
    p["s3"], p["b3"] = bn_params(ks[5], cout)
    if with_proj:
        p["wsc"] = 0.2 * jax.random.normal(ks[6], (in_planes, cout), jnp.float32)
        p["ssc"], p["bsc"] = bn_params(ks[7], cout)
    return p


def reference_forward(x, p):
    """Independent reference using lax.conv in NCHW (PyTorch semantics)."""
    def conv1x1(x, w_io):                                # w_io: (Cin, Cout)
        w = jnp.transpose(w_io)[:, :, None, None]        # OIHW
        return jax.lax.conv_general_dilated(
            x, w, (1, 1), "VALID", dimension_numbers=("NCHW", "OIHW", "NCHW"))

    def conv3x3(x, w9):                                  # w9: (9, Cin, Cout)
        w = w9.reshape(3, 3, w9.shape[1], w9.shape[2])
        w = jnp.transpose(w, (3, 2, 0, 1))               # OIHW
        return jax.lax.conv_general_dilated(
            x, w, (1, 1), ((1, 1), (1, 1)),
            dimension_numbers=("NCHW", "OIHW", "NCHW"))

    def bn(x, s, b):
        return x * s[0][None, :, None, None] + b[0][None, :, None, None]

    o = jax.nn.relu(bn(conv1x1(x, p["w1"]), p["s1"], p["b1"]))
    o = jax.nn.relu(bn(conv3x3(o, p["w2"]), p["s2"], p["b2"]))
    o = bn(conv1x1(o, p["w3"]), p["s3"], p["b3"])
    if "wsc" in p:
        sc = bn(conv1x1(x, p["wsc"]), p["ssc"], p["bsc"])
    else:
        sc = x
    return jax.nn.relu(o + sc)


def _check(out, ref):
    err = float(jnp.max(jnp.abs(out - ref)))
    tol = 2e-2 + 2e-2 * float(jnp.max(jnp.abs(ref)))     # bf16 tolerance
    assert err < tol, (err, tol)


if __name__ == "__main__":
    key = jax.random.PRNGKey(0)
    kx, kp, kx2, kp2 = jax.random.split(key, 4)

    # --- projection-shortcut case (in_planes != expansion*planes) ----------
    N, in_planes, H, W = 2, 4, 16, 16
    planes, expansion = 4, 4
    x = jax.random.normal(kx, (N, in_planes, H, W), jnp.float32)
    params = make_params(kp, in_planes, planes, expansion, with_proj=True)

    x_nhwc = jnp.transpose(x, (0, 2, 3, 1))
    out = jax.block_until_ready(bottleneck_forward_nhwc(x_nhwc, params, tile_h=8))
    ref = jax.block_until_ready(reference_forward(x, params))
    ref_nhwc = jnp.transpose(ref, (0, 2, 3, 1))
    assert out.shape == (N, H, W, expansion * planes)
    _check(out.astype(jnp.float32), ref_nhwc)

    # NCHW compatibility wrapper (PyTorch module interface parity).
    out_nchw = jax.block_until_ready(bottleneck_forward(x, params, tile_h=8))
    assert out_nchw.shape == (N, expansion * planes, H, W)
    _check(out_nchw, ref)

    # --- identity-shortcut case (in_planes == expansion*planes, stride=1) --
    in_planes2 = expansion * planes
    x2 = jax.random.normal(kx2, (N, in_planes2, H, W), jnp.float32)
    params2 = make_params(kp2, in_planes2, planes, expansion, with_proj=False)

    out2 = jax.block_until_ready(
        bottleneck_forward_nhwc(jnp.transpose(x2, (0, 2, 3, 1)), params2, tile_h=8))
    ref2 = jnp.transpose(jax.block_until_ready(reference_forward(x2, params2)),
                         (0, 2, 3, 1))
    assert out2.shape == (N, H, W, expansion * planes)
    _check(out2.astype(jnp.float32), ref2)

    print("KERNEL_OK")
</pallas_src>

<mosaic_0001>
module attributes {stable_mosaic.version = 11 : i64} {
  func.func @bottleneck_kernel(%arg0: i32, %arg1: i32, %arg2: memref<1x128x128xbf16, #tpu.memory_space<vmem>>, %arg3: memref<1x16x128xbf16, #tpu.memory_space<vmem>>, %arg4: memref<1x16x128xbf16, #tpu.memory_space<vmem>>, %arg5: memref<128x128xbf16, #tpu.memory_space<vmem>>, %arg6: memref<1x128xf32, #tpu.memory_space<vmem>>, %arg7: memref<1x128xf32, #tpu.memory_space<vmem>>, %arg8: memref<9x128x128xbf16, #tpu.memory_space<vmem>>, %arg9: memref<1x128xf32, #tpu.memory_space<vmem>>, %arg10: memref<1x128xf32, #tpu.memory_space<vmem>>, %arg11: memref<128x128xbf16, #tpu.memory_space<vmem>>, %arg12: memref<1x128xf32, #tpu.memory_space<vmem>>, %arg13: memref<1x128xf32, #tpu.memory_space<vmem>>, %arg14: memref<128x128xbf16, #tpu.memory_space<vmem>>, %arg15: memref<1x128xf32, #tpu.memory_space<vmem>>, %arg16: memref<1x128xf32, #tpu.memory_space<vmem>>, %arg17: memref<1x128x128xbf16, #tpu.memory_space<vmem>>, %arg18: memref<176x128xbf16, #tpu.memory_space<vmem>>) attributes {dimension_semantics = [#tpu.dimension_semantics<parallel>, #tpu.dimension_semantics<parallel>], iteration_bounds = array<i64: 2, 2>, scalar_prefetch = 0 : i64, scratch_operands = 1 : i64, tpu.core_type = #tpu.core_type<tc>, window_params = [{transform_indices = @transform_0, window_bounds = array<i64: 1, 128, 128>}, {transform_indices = @transform_1, window_bounds = array<i64: 1, 16, 128>}, {transform_indices = @transform_2, window_bounds = array<i64: 1, 16, 128>}, {pipeline_mode = #tpu.pipeline_mode<synchronous>, transform_indices = @transform_3, window_bounds = array<i64: 128, 128>}, {pipeline_mode = #tpu.pipeline_mode<synchronous>, transform_indices = @transform_4, window_bounds = array<i64: 1, 128>}, {pipeline_mode = #tpu.pipeline_mode<synchronous>, transform_indices = @transform_5, window_bounds = array<i64: 1, 128>}, {pipeline_mode = #tpu.pipeline_mode<synchronous>, transform_indices = @transform_6, window_bounds = array<i64: 9, 128, 128>}, {pipeline_mode = #tpu.pipeline_mode<synchronous>, transform_indices = @transform_7, window_bounds = array<i64: 1, 128>}, {pipeline_mode = #tpu.pipeline_mode<synchronous>, transform_indices = @transform_8, window_bounds = array<i64: 1, 128>}, {pipeline_mode = #tpu.pipeline_mode<synchronous>, transform_indices = @transform_9, window_bounds = array<i64: 128, 128>}, {pipeline_mode = #tpu.pipeline_mode<synchronous>, transform_indices = @transform_10, window_bounds = array<i64: 1, 128>}, {pipeline_mode = #tpu.pipeline_mode<synchronous>, transform_indices = @transform_11, window_bounds = array<i64: 1, 128>}, {pipeline_mode = #tpu.pipeline_mode<synchronous>, transform_indices = @transform_12, window_bounds = array<i64: 128, 128>}, {pipeline_mode = #tpu.pipeline_mode<synchronous>, transform_indices = @transform_13, window_bounds = array<i64: 1, 128>}, {pipeline_mode = #tpu.pipeline_mode<synchronous>, transform_indices = @transform_14, window_bounds = array<i64: 1, 128>}, {transform_indices = @transform_15, window_bounds = array<i64: 1, 128, 128>}]} {
    %c0 = arith.constant 0 : index
    %c0_0 = arith.constant 0 : index
    %0 = vector.load %arg6[%c0, %c0_0] : memref<1x128xf32, #tpu.memory_space<vmem>>, vector<1x128xf32>
    %c0_1 = arith.constant 0 : index
    %c0_2 = arith.constant 0 : index
    %1 = vector.load %arg7[%c0_1, %c0_2] : memref<1x128xf32, #tpu.memory_space<vmem>>, vector<1x128xf32>
    %c0_3 = arith.constant 0 : index
    %c0_4 = arith.constant 0 : index
    %c0_5 = arith.constant 0 : index
    %2 = vector.load %arg2[%c0_3, %c0_4, %c0_5] : memref<1x128x128xbf16, #tpu.memory_space<vmem>>, vector<1x128x128xbf16>
    %3 = vector.shape_cast %2 : vector<1x128x128xbf16> to vector<128x128xbf16>
    %c0_6 = arith.constant 0 : index
    %c0_7 = arith.constant 0 : index
    %4 = vector.load %arg5[%c0_6, %c0_7] : memref<128x128xbf16, #tpu.memory_space<vmem>>, vector<128x128xbf16>
    %cst = arith.constant dense<0.000000e+00> : vector<128x128xf32>
    %5 = tpu.matmul %3, %4, %cst {dimension_numbers = #tpu.dot_dimension_numbers<[1], [0], [0], [1], [0, 0, 1, 1], [], []>} : vector<128x128xbf16>, vector<128x128xbf16>, vector<128x128xf32> -> vector<128x128xf32>
    %6 = vector.broadcast %0 : vector<1x128xf32> to vector<128x128xf32>
    %7 = arith.mulf %5, %6 : vector<128x128xf32>
    %8 = vector.broadcast %1 : vector<1x128xf32> to vector<128x128xf32>
    %9 = arith.addf %7, %8 : vector<128x128xf32>
    %cst_8 = arith.constant 0.000000e+00 : f32
    %10 = vector.broadcast %cst_8 : f32 to vector<128x128xf32>
    %11 = arith.maximumf %9, %10 : vector<128x128xf32>
    %cst_9 = arith.constant 0.000000e+00 : bf16
    %12 = vector.broadcast %cst_9 : bf16 to vector<8x128xbf16>
    %c0_10 = arith.constant 0 : index
    %c0_11 = arith.constant 0 : index
    %13 = vector.load %arg18[%c0_10, %c0_11] : memref<176x128xbf16, #tpu.memory_space<vmem>>, vector<8x128xbf16>
    tpu.vector_store %arg18[%c0_10, %c0_11], %12 {strides = array<i32>} : memref<176x128xbf16, #tpu.memory_space<vmem>>, vector<8x128xbf16>,
    %c168 = arith.constant 168 : index
    %c0_12 = arith.constant 0 : index
    %14 = vector.load %arg18[%c168, %c0_12] : memref<176x128xbf16, #tpu.memory_space<vmem>>, vector<8x128xbf16>
    tpu.vector_store %arg18[%c168, %c0_12], %12 {strides = array<i32>} : memref<176x128xbf16, #tpu.memory_space<vmem>>, vector<8x128xbf16>,
    %c0_i32 = arith.constant 0 : i32
    %15 = arith.cmpi eq, %arg1, %c0_i32 : i32
    %c0_13 = arith.constant 0 : index
    %c0_14 = arith.constant 0 : index
    %c0_15 = arith.constant 0 : index
    %16 = vector.load %arg3[%c0_13, %c0_14, %c0_15] : memref<1x16x128xbf16, #tpu.memory_space<vmem>>, vector<1x16x128xbf16>
    %17 = vector.shape_cast %16 : vector<1x16x128xbf16> to vector<16x128xbf16>
    %c0_16 = arith.constant 0 : index
    %c0_17 = arith.constant 0 : index
    %18 = vector.load %arg5[%c0_16, %c0_17] : memref<128x128xbf16, #tpu.memory_space<vmem>>, vector<128x128xbf16>
    %cst_18 = arith.constant dense<0.000000e+00> : vector<16x128xf32>
    %19 = tpu.matmul %17, %18, %cst_18 {dimension_numbers = #tpu.dot_dimension_numbers<[1], [0], [0], [1], [0, 0, 1, 1], [], []>} : vector<16x128xbf16>, vector<128x128xbf16>, vector<16x128xf32> -> vector<16x128xf32>
    %20 = vector.broadcast %0 : vector<1x128xf32> to vector<16x128xf32>
    %21 = arith.mulf %19, %20 : vector<16x128xf32>
    %22 = vector.broadcast %1 : vector<1x128xf32> to vector<16x128xf32>
    %23 = arith.addf %21, %22 : vector<16x128xf32>
    %cst_19 = arith.constant 0.000000e+00 : f32
    %24 = vector.broadcast %cst_19 : f32 to vector<16x128xf32>
    %25 = arith.maximumf %23, %24 : vector<16x128xf32>
    %cst_20 = arith.constant 0.000000e+00 : f32
    %cst_21 = arith.constant 1.000000e+00 : f32
    %26 = arith.select %15, %cst_20, %cst_21 : f32
    %27 = vector.broadcast %26 : f32 to vector<16x128xf32>
    %28 = arith.mulf %25, %27 : vector<16x128xf32>
    %29 = arith.truncf %28 : vector<16x128xf32> to vector<16x128xbf16>
    %c8 = arith.constant 8 : index
    %c0_22 = arith.constant 0 : index
    %30 = vector.load %arg18[%c8, %c0_22] : memref<176x128xbf16, #tpu.memory_space<vmem>>, vector<16x128xbf16>
    tpu.vector_store %arg18[%c8, %c0_22], %29 {strides = array<i32>} : memref<176x128xbf16, #tpu.memory_space<vmem>>, vector<16x128xbf16>,
    %31 = arith.truncf %11 : vector<128x128xf32> to vector<128x128xbf16>
    %c24 = arith.constant 24 : index
    %c0_23 = arith.constant 0 : index
    %32 = vector.load %arg18[%c24, %c0_23] : memref<176x128xbf16, #tpu.memory_space<vmem>>, vector<128x128xbf16>
    tpu.vector_store %arg18[%c24, %c0_23], %31 {strides = array<i32>} : memref<176x128xbf16, #tpu.memory_space<vmem>>, vector<128x128xbf16>,
    %c1_i32 = arith.constant 1 : i32
    %33 = arith.cmpi eq, %arg1, %c1_i32 : i32
    %c0_24 = arith.constant 0 : index
    %c0_25 = arith.constant 0 : index
    %c0_26 = arith.constant 0 : index
    %34 = vector.load %arg4[%c0_24, %c0_25, %c0_26] : memref<1x16x128xbf16, #tpu.memory_space<vmem>>, vector<1x16x128xbf16>
    %35 = vector.shape_cast %34 : vector<1x16x128xbf16> to vector<16x128xbf16>
    %c0_27 = arith.constant 0 : index
    %c0_28 = arith.constant 0 : index
    %36 = vector.load %arg5[%c0_27, %c0_28] : memref<128x128xbf16, #tpu.memory_space<vmem>>, vector<128x128xbf16>
    %cst_29 = arith.constant dense<0.000000e+00> : vector<16x128xf32>
    %37 = tpu.matmul %35, %36, %cst_29 {dimension_numbers = #tpu.dot_dimension_numbers<[1], [0], [0], [1], [0, 0, 1, 1], [], []>} : vector<16x128xbf16>, vector<128x128xbf16>, vector<16x128xf32> -> vector<16x128xf32>
    %38 = vector.broadcast %0 : vector<1x128xf32> to vector<16x128xf32>
    %39 = arith.mulf %37, %38 : vector<16x128xf32>
    %40 = vector.broadcast %1 : vector<1x128xf32> to vector<16x128xf32>
    %41 = arith.addf %39, %40 : vector<16x128xf32>
    %cst_30 = arith.constant 0.000000e+00 : f32
    %42 = vector.broadcast %cst_30 : f32 to vector<16x128xf32>
    %43 = arith.maximumf %41, %42 : vector<16x128xf32>
    %cst_31 = arith.constant 0.000000e+00 : f32
    %cst_32 = arith.constant 1.000000e+00 : f32
    %44 = arith.select %33, %cst_31, %cst_32 : f32
    %45 = vector.broadcast %44 : f32 to vector<16x128xf32>
    %46 = arith.mulf %43, %45 : vector<16x128xf32>
    %47 = arith.truncf %46 : vector<16x128xf32> to vector<16x128xbf16>
    %c152 = arith.constant 152 : index
    %c0_33 = arith.constant 0 : index
    %48 = vector.load %arg18[%c152, %c0_33] : memref<176x128xbf16, #tpu.memory_space<vmem>>, vector<16x128xbf16>
    tpu.vector_store %arg18[%c152, %c0_33], %47 {strides = array<i32>} : memref<176x128xbf16, #tpu.memory_space<vmem>>, vector<16x128xbf16>,
    %c8_34 = arith.constant 8 : index
    %c0_35 = arith.constant 0 : index
    %49 = vector.load %arg18[%c8_34, %c0_35] : memref<176x128xbf16, #tpu.memory_space<vmem>>, vector<128x128xbf16>
    %c1 = arith.constant 1 : index
    %c0_36 = arith.constant 0 : index
    %c0_37 = arith.constant 0 : index
    %50 = vector.load %arg8[%c1, %c0_36, %c0_37] : memref<9x128x128xbf16, #tpu.memory_space<vmem>>, vector<1x128x128xbf16>
    %51 = vector.shape_cast %50 : vector<1x128x128xbf16> to vector<128x128xbf16>
    %cst_38 = arith.constant dense<0.000000e+00> : vector<128x128xf32>
    %52 = tpu.matmul %49, %51, %cst_38 {dimension_numbers = #tpu.dot_dimension_numbers<[1], [0], [0], [1], [0, 0, 1, 1], [], []>} : vector<128x128xbf16>, vector<128x128xbf16>, vector<128x128xf32> -> vector<128x128xf32>
    %c24_39 = arith.constant 24 : index
    %c0_40 = arith.constant 0 : index
    %53 = vector.load %arg18[%c24_39, %c0_40] : memref<176x128xbf16, #tpu.memory_space<vmem>>, vector<128x128xbf16>
    %c4 = arith.constant 4 : index
    %c0_41 = arith.constant 0 : index
    %c0_42 = arith.constant 0 : index
    %54 = vector.load %arg8[%c4, %c0_41, %c0_42] : memref<9x128x128xbf16, #tpu.memory_space<vmem>>, vector<1x128x128xbf16>
    %55 = vector.shape_cast %54 : vector<1x128x128xbf16> to vector<128x128xbf16>
    %cst_43 = arith.constant dense<0.000000e+00> : vector<128x128xf32>
    %56 = tpu.matmul %53, %55, %cst_43 {dimension_numbers = #tpu.dot_dimension_numbers<[1], [0], [0], [1], [0, 0, 1, 1], [], []>} : vector<128x128xbf16>, vector<128x128xbf16>, vector<128x128xf32> -> vector<128x128xf32>
    %57 = arith.addf %52, %56 : vector<128x128xf32>
    %c40 = arith.constant 40 : index
    %c0_44 = arith.constant 0 : index
    %58 = vector.load %arg18[%c40, %c0_44] : memref<176x128xbf16, #tpu.memory_space<vmem>>, vector<128x128xbf16>
    %c7 = arith.constant 7 : index
    %c0_45 = arith.constant 0 : index
    %c0_46 = arith.constant 0 : index
    %59 = vector.load %arg8[%c7, %c0_45, %c0_46] : memref<9x128x128xbf16, #tpu.memory_space<vmem>>, vector<1x128x128xbf16>
    %60 = vector.shape_cast %59 : vector<1x128x128xbf16> to vector<128x128xbf16>
    %cst_47 = arith.constant dense<0.000000e+00> : vector<128x128xf32>
    %61 = tpu.matmul %58, %60, %cst_47 {dimension_numbers = #tpu.dot_dimension_numbers<[1], [0], [0], [1], [0, 0, 1, 1], [], []>} : vector<128x128xbf16>, vector<128x128xbf16>, vector<128x128xf32> -> vector<128x128xf32>
    %62 = arith.addf %57, %61 : vector<128x128xf32>
    %c7_48 = arith.constant 7 : index
    %c0_49 = arith.constant 0 : index
    %63 = vector.load %arg18[%c7_48, %c0_49] : memref<176x128xbf16, #tpu.memory_space<vmem>>, vector<128x128xbf16>
    %c0_50 = arith.constant 0 : index
    %c0_51 = arith.constant 0 : index
    %c0_52 = arith.constant 0 : index
    %64 = vector.load %arg8[%c0_50, %c0_51, %c0_52] : memref<9x128x128xbf16, #tpu.memory_space<vmem>>, vector<1x128x128xbf16>
    %65 = vector.shape_cast %64 : vector<1x128x128xbf16> to vector<128x128xbf16>
    %cst_53 = arith.constant dense<0.000000e+00> : vector<128x128xf32>
    %66 = tpu.matmul %63, %65, %cst_53 {dimension_numbers = #tpu.dot_dimension_numbers<[1], [0], [0], [1], [0, 0, 1, 1], [], []>} : vector<128x128xbf16>, vector<128x128xbf16>, vector<128x128xf32> -> vector<128x128xf32>
    %c23 = arith.constant 23 : index
    %c0_54 = arith.constant 0 : index
    %67 = vector.load %arg18[%c23, %c0_54] : memref<176x128xbf16, #tpu.memory_space<vmem>>, vector<128x128xbf16>
    %c3 = arith.constant 3 : index
    %c0_55 = arith.constant 0 : index
    %c0_56 = arith.constant 0 : index
    %68 = vector.load %arg8[%c3, %c0_55, %c0_56] : memref<9x128x128xbf16, #tpu.memory_space<vmem>>, vector<1x128x128xbf16>
    %69 = vector.shape_cast %68 : vector<1x128x128xbf16> to vector<128x128xbf16>
    %cst_57 = arith.constant dense<0.000000e+00> : vector<128x128xf32>
    %70 = tpu.matmul %67, %69, %cst_57 {dimension_numbers = #tpu.dot_dimension_numbers<[1], [0], [0], [1], [0, 0, 1, 1], [], []>} : vector<128x128xbf16>, vector<128x128xbf16>, vector<128x128xf32> -> vector<128x128xf32>
    %71 = arith.addf %66, %70 : vector<128x128xf32>
    %c39 = arith.constant 39 : index
    %c0_58 = arith.constant 0 : index
    %72 = vector.load %arg18[%c39, %c0_58] : memref<176x128xbf16, #tpu.memory_space<vmem>>, vector<128x128xbf16>
    %c6 = arith.constant 6 : index
    %c0_59 = arith.constant 0 : index
    %c0_60 = arith.constant 0 : index
    %73 = vector.load %arg8[%c6, %c0_59, %c0_60] : memref<9x128x128xbf16, #tpu.memory_space<vmem>>, vector<1x128x128xbf16>
    %74 = vector.shape_cast %73 : vector<1x128x128xbf16> to vector<128x128xbf16>
    %cst_61 = arith.constant dense<0.000000e+00> : vector<128x128xf32>
    %75 = tpu.matmul %72, %74, %cst_61 {dimension_numbers = #tpu.dot_dimension_numbers<[1], [0], [0], [1], [0, 0, 1, 1], [], []>} : vector<128x128xbf16>, vector<128x128xbf16>, vector<128x128xf32> -> vector<128x128xf32>
    %76 = arith.addf %71, %75 : vector<128x128xf32>
    %c9 = arith.constant 9 : index
    %c0_62 = arith.constant 0 : index
    %77 = vector.load %arg18[%c9, %c0_62] : memref<176x128xbf16, #tpu.memory_space<vmem>>, vector<128x128xbf16>
    %c2 = arith.constant 2 : index
    %c0_63 = arith.constant 0 : index
    %c0_64 = arith.constant 0 : index
    %78 = vector.load %arg8[%c2, %c0_63, %c0_64] : memref<9x128x128xbf16, #tpu.memory_space<vmem>>, vector<1x128x128xbf16>
    %79 = vector.shape_cast %78 : vector<1x128x128xbf16> to vector<128x128xbf16>
    %cst_65 = arith.constant dense<0.000000e+00> : vector<128x128xf32>
    %80 = tpu.matmul %77, %79, %cst_65 {dimension_numbers = #tpu.dot_dimension_numbers<[1], [0], [0], [1], [0, 0, 1, 1], [], []>} : vector<128x128xbf16>, vector<128x128xbf16>, vector<128x128xf32> -> vector<128x128xf32>
    %c25 = arith.constant 25 : index
    %c0_66 = arith.constant 0 : index
    %81 = vector.load %arg18[%c25, %c0_66] : memref<176x128xbf16, #tpu.memory_space<vmem>>, vector<128x128xbf16>
    %c5 = arith.constant 5 : index
    %c0_67 = arith.constant 0 : index
    %c0_68 = arith.constant 0 : index
    %82 = vector.load %arg8[%c5, %c0_67, %c0_68] : memref<9x128x128xbf16, #tpu.memory_space<vmem>>, vector<1x128x128xbf16>
    %83 = vector.shape_cast %82 : vector<1x128x128xbf16> to vector<128x128xbf16>
    %cst_69 = arith.constant dense<0.000000e+00> : vector<128x128xf32>
    %84 = tpu.matmul %81, %83, %cst_69 {dimension_numbers = #tpu.dot_dimension_numbers<[1], [0], [0], [1], [0, 0, 1, 1], [], []>} : vector<128x128xbf16>, vector<128x128xbf16>, vector<128x128xf32> -> vector<128x128xf32>
    %85 = arith.addf %80, %84 : vector<128x128xf32>
    %c41 = arith.constant 41 : index
    %c0_70 = arith.constant 0 : index
    %86 = vector.load %arg18[%c41, %c0_70] : memref<176x128xbf16, #tpu.memory_space<vmem>>, vector<128x128xbf16>
    %c8_71 = arith.constant 8 : index
    %c0_72 = arith.constant 0 : index
    %c0_73 = arith.constant 0 : index
    %87 = vector.load %arg8[%c8_71, %c0_72, %c0_73] : memref<9x128x128xbf16, #tpu.memory_space<vmem>>, vector<1x128x128xbf16>
    %88 = vector.shape_cast %87 : vector<1x128x128xbf16> to vector<128x128xbf16>
    %cst_74 = arith.constant dense<0.000000e+00> : vector<128x128xf32>
    %89 = tpu.matmul %86, %88, %cst_74 {dimension_numbers = #tpu.dot_dimension_numbers<[1], [0], [0], [1], [0, 0, 1, 1], [], []>} : vector<128x128xbf16>, vector<128x128xbf16>, vector<128x128xf32> -> vector<128x128xf32>
    %90 = arith.addf %85, %89 : vector<128x128xf32>
    %91 = tpu.iota {dimensions = array<i32: 0>} : vector<128x1xi32>
    %c16_i32 = arith.constant 16 : i32
    %c0_i32_75 = arith.constant 0 : i32
    %92 = arith.cmpi eq, %c16_i32, %c0_i32_75 : i32
    %c1_i32_76 = arith.constant 1 : i32
    %93 = arith.select %92, %c1_i32_76, %c16_i32 : i32
    %94 = vector.broadcast %93 : i32 to vector<128x1xi32>
    %95 = arith.remsi %91, %94 : vector<128x1xi32>
    %c0_i32_77 = arith.constant 0 : i32
    %96 = vector.broadcast %c0_i32_77 : i32 to vector<128x1xi32>
    %97 = arith.cmpi ne, %95, %96 : vector<128x1xi32>
    %c0_i32_78 = arith.constant 0 : i32
    %98 = vector.broadcast %c0_i32_78 : i32 to vector<128x1xi32>
    %99 = arith.cmpi slt, %95, %98 : vector<128x1xi32>
    %c0_i32_79 = arith.constant 0 : i32
    %100 = arith.cmpi slt, %93, %c0_i32_79 : i32
    %101 = vector.broadcast %100 : i1 to vector<128x1xi1>
    %102 = vector.broadcast %101 : vector<128x1xi1> to vector<128x1xi1>
    %103 = arith.xori %99, %102 : vector<128x1xi1>
    %104 = arith.andi %103, %97 : vector<128x1xi1>
    %105 = vector.broadcast %93 : i32 to vector<128x1xi32>
    %106 = arith.addi %95, %105 : vector<128x1xi32>
    %107 = arith.select %104, %106, %95 : vector<128x1xi1>, vector<128x1xi32>
    %c0_i32_80 = arith.constant 0 : i32
    %108 = vector.broadcast %c0_i32_80 : i32 to vector<128x1xi32>
    %109 = arith.cmpi eq, %107, %108 : vector<128x1xi32>
    %cst_81 = arith.constant 0.000000e+00 : f32
    %110 = vector.shape_cast %109 : vector<128x1xi1> to vector<128x1xi1>
    %111 = vector.broadcast %110 : vector<128x1xi1> to vector<128x128xi1>
    %112 = vector.broadcast %cst_81 : f32 to vector<128x128xf32>
    %113 = arith.select %111, %112, %76 : vector<128x128xi1>, vector<128x128xf32>
    %114 = arith.addf %62, %113 : vector<128x128xf32>
    %c15_i32 = arith.constant 15 : i32
    %115 = vector.broadcast %c15_i32 : i32 to vector<128x1xi32>
    %116 = arith.cmpi eq, %107, %115 : vector<128x1xi32>
    %cst_82 = arith.constant 0.000000e+00 : f32
    %117 = vector.shape_cast %116 : vector<128x1xi1> to vector<128x1xi1>
    %118 = vector.broadcast %117 : vector<128x1xi1> to vector<128x128xi1>
    %119 = vector.broadcast %cst_82 : f32 to vector<128x128xf32>
    %120 = arith.select %118, %119, %90 : vector<128x128xi1>, vector<128x128xf32>
    %121 = arith.addf %114, %120 : vector<128x128xf32>
    %c0_83 = arith.constant 0 : index
    %c0_84 = arith.constant 0 : index
    %122 = vector.load %arg9[%c0_83, %c0_84] : memref<1x128xf32, #tpu.memory_space<vmem>>, vector<1x128xf32>
    %123 = vector.broadcast %122 : vector<1x128xf32> to vector<128x128xf32>
    %124 = arith.mulf %121, %123 : vector<128x128xf32>
    %c0_85 = arith.constant 0 : index
    %c0_86 = arith.constant 0 : index
    %125 = vector.load %arg10[%c0_85, %c0_86] : memref<1x128xf32, #tpu.memory_space<vmem>>, vector<1x128xf32>
    %126 = vector.broadcast %125 : vector<1x128xf32> to vector<128x128xf32>
    %127 = arith.addf %124, %126 : vector<128x128xf32>
    %cst_87 = arith.constant 0.000000e+00 : f32
    %128 = vector.broadcast %cst_87 : f32 to vector<128x128xf32>
    %129 = arith.maximumf %127, %128 : vector<128x128xf32>
    %130 = arith.truncf %129 : vector<128x128xf32> to vector<128x128xbf16>
    %c0_88 = arith.constant 0 : index
    %c0_89 = arith.constant 0 : index
    %131 = vector.load %arg11[%c0_88, %c0_89] : memref<128x128xbf16, #tpu.memory_space<vmem>>, vector<128x128xbf16>
    %cst_90 = arith.constant dense<0.000000e+00> : vector<128x128xf32>
    %132 = tpu.matmul %130, %131, %cst_90 {dimension_numbers = #tpu.dot_dimension_numbers<[1], [0], [0], [1], [0, 0, 1, 1], [], []>} : vector<128x128xbf16>, vector<128x128xbf16>, vector<128x128xf32> -> vector<128x128xf32>
    %c0_91 = arith.constant 0 : index
    %c0_92 = arith.constant 0 : index
    %133 = vector.load %arg12[%c0_91, %c0_92] : memref<1x128xf32, #tpu.memory_space<vmem>>, vector<1x128xf32>
    %134 = vector.broadcast %133 : vector<1x128xf32> to vector<128x128xf32>
    %135 = arith.mulf %132, %134 : vector<128x128xf32>
    %c0_93 = arith.constant 0 : index
    %c0_94 = arith.constant 0 : index
    %136 = vector.load %arg13[%c0_93, %c0_94] : memref<1x128xf32, #tpu.memory_space<vmem>>, vector<1x128xf32>
    %137 = vector.broadcast %136 : vector<1x128xf32> to vector<128x128xf32>
    %138 = arith.addf %135, %137 : vector<128x128xf32>
    %c0_95 = arith.constant 0 : index
    %c0_96 = arith.constant 0 : index
    %c0_97 = arith.constant 0 : index
    %139 = vector.load %arg2[%c0_95, %c0_96, %c0_97] : memref<1x128x128xbf16, #tpu.memory_space<vmem>>, vector<1x128x128xbf16>
    %140 = vector.shape_cast %139 : vector<1x128x128xbf16> to vector<128x128xbf16>
    %c0_98 = arith.constant 0 : index
    %c0_99 = arith.constant 0 : index
    %141 = vector.load %arg14[%c0_98, %c0_99] : memref<128x128xbf16, #tpu.memory_space<vmem>>, vector<128x128xbf16>
    %cst_100 = arith.constant dense<0.000000e+00> : vector<128x128xf32>
    %142 = tpu.matmul %140, %141, %cst_100 {dimension_numbers = #tpu.dot_dimension_numbers<[1], [0], [0], [1], [0, 0, 1, 1], [], []>} : vector<128x128xbf16>, vector<128x128xbf16>, vector<128x128xf32> -> vector<128x128xf32>
    %c0_101 = arith.constant 0 : index
    %c0_102 = arith.constant 0 : index
    %143 = vector.load %arg15[%c0_101, %c0_102] : memref<1x128xf32, #tpu.memory_space<vmem>>, vector<1x128xf32>
    %144 = vector.broadcast %143 : vector<1x128xf32> to vector<128x128xf32>
    %145 = arith.mulf %142, %144 : vector<128x128xf32>
    %c0_103 = arith.constant 0 : index
    %c0_104 = arith.constant 0 : index
    %146 = vector.load %arg16[%c0_103, %c0_104] : memref<1x128xf32, #tpu.memory_space<vmem>>, vector<1x128xf32>
    %147 = vector.broadcast %146 : vector<1x128xf32> to vector<128x128xf32>
    %148 = arith.addf %145, %147 : vector<128x128xf32>
    %149 = arith.addf %138, %148 : vector<128x128xf32>
    %cst_105 = arith.constant 0.000000e+00 : f32
    %150 = vector.broadcast %cst_105 : f32 to vector<128x128xf32>
    %151 = arith.maximumf %149, %150 : vector<128x128xf32>
    %152 = arith.truncf %151 : vector<128x128xf32> to vector<128x128xbf16>
    %c0_106 = arith.constant 0 : index
    %c0_107 = arith.constant 0 : index
    %c0_108 = arith.constant 0 : index
    %153 = vector.load %arg17[%c0_106, %c0_107, %c0_108] : memref<1x128x128xbf16, #tpu.memory_space<vmem>>, vector<1x128x128xbf16>
    %154 = vector.shape_cast %153 : vector<1x128x128xbf16> to vector<128x128xbf16>
    %155 = vector.shape_cast %152 : vector<128x128xbf16> to vector<1x128x128xbf16>
    tpu.vector_store %arg17[%c0_106, %c0_107, %c0_108], %155 {strides = array<i32>} : memref<1x128x128xbf16, #tpu.memory_space<vmem>>, vector<1x128x128xbf16>,
    return
  }
  func.func @transform_0(%arg0: i32, %arg1: i32) -> (i32, i32, i32) {
    %c0_i32 = arith.constant 0 : i32
    %c0_i32_0 = arith.constant 0 : i32
    return %arg0, %arg1, %c0_i32 : i32, i32, i32
  }
  func.func @transform_1(%arg0: i32, %arg1: i32) -> (i32, i32, i32) {
    %c8_i32 = arith.constant 8 : i32
    %0 = arith.muli %arg1, %c8_i32 : i32
    %c1_i32 = arith.constant 1 : i32
    %1 = arith.subi %0, %c1_i32 : i32
    %c0_i32 = arith.constant 0 : i32
    %2 = arith.maxsi %1, %c0_i32 : i32
    %c0_i32_0 = arith.constant 0 : i32
    %c0_i32_1 = arith.constant 0 : i32
    return %arg0, %2, %c0_i32_0 : i32, i32, i32
  }
  func.func @transform_2(%arg0: i32, %arg1: i32) -> (i32, i32, i32) {
    %c1_i32 = arith.constant 1 : i32
    %0 = arith.addi %arg1, %c1_i32 : i32
    %c8_i32 = arith.constant 8 : i32
    %1 = arith.muli %0, %c8_i32 : i32
    %c15_i32 = arith.constant 15 : i32
    %2 = arith.minsi %1, %c15_i32 : i32
    %c0_i32 = arith.constant 0 : i32
    %c0_i32_0 = arith.constant 0 : i32
    return %arg0, %2, %c0_i32 : i32, i32, i32
  }
  func.func @transform_3(%arg0: i32, %arg1: i32) -> (i32, i32) {
    %c0_i32 = arith.constant 0 : i32
    %c0_i32_0 = arith.constant 0 : i32
    %c0_i32_1 = arith.constant 0 : i32
    return %c0_i32, %c0_i32_0 : i32, i32
  }
  func.func @transform_4(%arg0: i32, %arg1: i32) -> (i32, i32) {
    %c0_i32 = arith.constant 0 : i32
    %c0_i32_0 = arith.constant 0 : i32
    %c0_i32_1 = arith.constant 0 : i32
    return %c0_i32, %c0_i32_0 : i32, i32
  }
  func.func @transform_5(%arg0: i32, %arg1: i32) -> (i32, i32) {
    %c0_i32 = arith.constant 0 : i32
    %c0_i32_0 = arith.constant 0 : i32
    %c0_i32_1 = arith.constant 0 : i32
    return %c0_i32, %c0_i32_0 : i32, i32
  }
  func.func @transform_6(%arg0: i32, %arg1: i32) -> (i32, i32, i32) {
    %c0_i32 = arith.constant 0 : i32
    %c0_i32_0 = arith.constant 0 : i32
    %c0_i32_1 = arith.constant 0 : i32
    %c0_i32_2 = arith.constant 0 : i32
    return %c0_i32, %c0_i32_0, %c0_i32_1 : i32, i32, i32
  }
  func.func @transform_7(%arg0: i32, %arg1: i32) -> (i32, i32) {
    %c0_i32 = arith.constant 0 : i32
    %c0_i32_0 = arith.constant 0 : i32
    %c0_i32_1 = arith.constant 0 : i32
    return %c0_i32, %c0_i32_0 : i32, i32
  }
  func.func @transform_8(%arg0: i32, %arg1: i32) -> (i32, i32) {
    %c0_i32 = arith.constant 0 : i32
    %c0_i32_0 = arith.constant 0 : i32
    %c0_i32_1 = arith.constant 0 : i32
    return %c0_i32, %c0_i32_0 : i32, i32
  }
  func.func @transform_9(%arg0: i32, %arg1: i32) -> (i32, i32) {
    %c0_i32 = arith.constant 0 : i32
    %c0_i32_0 = arith.constant 0 : i32
    %c0_i32_1 = arith.constant 0 : i32
    return %c0_i32, %c0_i32_0 : i32, i32
  }
  func.func @transform_10(%arg0: i32, %arg1: i32) -> (i32, i32) {
    %c0_i32 = arith.constant 0 : i32
    %c0_i32_0 = arith.constant 0 : i32
    %c0_i32_1 = arith.constant 0 : i32
    return %c0_i32, %c0_i32_0 : i32, i32
  }
  func.func @transform_11(%arg0: i32, %arg1: i32) -> (i32, i32) {
    %c0_i32 = arith.constant 0 : i32
    %c0_i32_0 = arith.constant 0 : i32
    %c0_i32_1 = arith.constant 0 : i32
    return %c0_i32, %c0_i32_0 : i32, i32
  }
  func.func @transform_12(%arg0: i32, %arg1: i32) -> (i32, i32) {
    %c0_i32 = arith.constant 0 : i32
    %c0_i32_0 = arith.constant 0 : i32
    %c0_i32_1 = arith.constant 0 : i32
    return %c0_i32, %c0_i32_0 : i32, i32
  }
  func.func @transform_13(%arg0: i32, %arg1: i32) -> (i32, i32) {
    %c0_i32 = arith.constant 0 : i32
    %c0_i32_0 = arith.constant 0 : i32
    %c0_i32_1 = arith.constant 0 : i32
    return %c0_i32, %c0_i32_0 : i32, i32
  }
  func.func @transform_14(%arg0: i32, %arg1: i32) -> (i32, i32) {
    %c0_i32 = arith.constant 0 : i32
    %c0_i32_0 = arith.constant 0 : i32
    %c0_i32_1 = arith.constant 0 : i32
    return %c0_i32, %c0_i32_0 : i32, i32
  }
  func.func @transform_15(%arg0: i32, %arg1: i32) -> (i32, i32, i32) {
    %c0_i32 = arith.constant 0 : i32
    %c0_i32_0 = arith.constant 0 : i32
    return %arg0, %arg1, %c0_i32 : i32, i32, i32
  }
}

module attributes {stable_mosaic.version = 11 : i64} {
  func.func @bottleneck_kernel(%arg0: i32, %arg1: i32, %arg2: memref<1x128x128xbf16, #tpu.memory_space<vmem>>, %arg3: memref<1x16x128xbf16, #tpu.memory_space<vmem>>, %arg4: memref<1x16x128xbf16, #tpu.memory_space<vmem>>, %arg5: memref<128x128xbf16, #tpu.memory_space<vmem>>, %arg6: memref<1x128xf32, #tpu.memory_space<vmem>>, %arg7: memref<1x128xf32, #tpu.memory_space<vmem>>, %arg8: memref<9x128x128xbf16, #tpu.memory_space<vmem>>, %arg9: memref<1x128xf32, #tpu.memory_space<vmem>>, %arg10: memref<1x128xf32, #tpu.memory_space<vmem>>, %arg11: memref<128x128xbf16, #tpu.memory_space<vmem>>, %arg12: memref<1x128xf32, #tpu.memory_space<vmem>>, %arg13: memref<1x128xf32, #tpu.memory_space<vmem>>, %arg14: memref<128x128xbf16, #tpu.memory_space<vmem>>, %arg15: memref<1x128xf32, #tpu.memory_space<vmem>>, %arg16: memref<1x128xf32, #tpu.memory_space<vmem>>, %arg17: memref<1x128x128xbf16, #tpu.memory_space<vmem>>, %arg18: memref<176x128xbf16, #tpu.memory_space<vmem>>) attributes {dimension_semantics = [#tpu.dimension_semantics<parallel>, #tpu.dimension_semantics<parallel>], iteration_bounds = array<i64: 2, 2>, scalar_prefetch = 0 : i64, scratch_operands = 1 : i64, tpu.core_type = #tpu.core_type<tc>, window_params = [{transform_indices = @transform_0, window_bounds = array<i64: 1, 128, 128>}, {transform_indices = @transform_1, window_bounds = array<i64: 1, 16, 128>}, {transform_indices = @transform_2, window_bounds = array<i64: 1, 16, 128>}, {pipeline_mode = #tpu.pipeline_mode<synchronous>, transform_indices = @transform_3, window_bounds = array<i64: 128, 128>}, {pipeline_mode = #tpu.pipeline_mode<synchronous>, transform_indices = @transform_4, window_bounds = array<i64: 1, 128>}, {pipeline_mode = #tpu.pipeline_mode<synchronous>, transform_indices = @transform_5, window_bounds = array<i64: 1, 128>}, {pipeline_mode = #tpu.pipeline_mode<synchronous>, transform_indices = @transform_6, window_bounds = array<i64: 9, 128, 128>}, {pipeline_mode = #tpu.pipeline_mode<synchronous>, transform_indices = @transform_7, window_bounds = array<i64: 1, 128>}, {pipeline_mode = #tpu.pipeline_mode<synchronous>, transform_indices = @transform_8, window_bounds = array<i64: 1, 128>}, {pipeline_mode = #tpu.pipeline_mode<synchronous>, transform_indices = @transform_9, window_bounds = array<i64: 128, 128>}, {pipeline_mode = #tpu.pipeline_mode<synchronous>, transform_indices = @transform_10, window_bounds = array<i64: 1, 128>}, {pipeline_mode = #tpu.pipeline_mode<synchronous>, transform_indices = @transform_11, window_bounds = array<i64: 1, 128>}, {pipeline_mode = #tpu.pipeline_mode<synchronous>, transform_indices = @transform_12, window_bounds = array<i64: 128, 128>}, {pipeline_mode = #tpu.pipeline_mode<synchronous>, transform_indices = @transform_13, window_bounds = array<i64: 1, 128>}, {pipeline_mode = #tpu.pipeline_mode<synchronous>, transform_indices = @transform_14, window_bounds = array<i64: 1, 128>}, {transform_indices = @transform_15, window_bounds = array<i64: 1, 128, 128>}]} {
    %c0 = arith.constant 0 : index
    %c0_0 = arith.constant 0 : index
    %0 = vector.load %arg6[%c0, %c0_0] : memref<1x128xf32, #tpu.memory_space<vmem>>, vector<1x128xf32>
    %c0_1 = arith.constant 0 : index
    %c0_2 = arith.constant 0 : index
    %1 = vector.load %arg7[%c0_1, %c0_2] : memref<1x128xf32, #tpu.memory_space<vmem>>, vector<1x128xf32>
    %c0_3 = arith.constant 0 : index
    %c0_4 = arith.constant 0 : index
    %c0_5 = arith.constant 0 : index
    %2 = vector.load %arg2[%c0_3, %c0_4, %c0_5] : memref<1x128x128xbf16, #tpu.memory_space<vmem>>, vector<1x128x128xbf16>
    %3 = vector.shape_cast %2 : vector<1x128x128xbf16> to vector<128x128xbf16>
    %c0_6 = arith.constant 0 : index
    %c0_7 = arith.constant 0 : index
    %4 = vector.load %arg5[%c0_6, %c0_7] : memref<128x128xbf16, #tpu.memory_space<vmem>>, vector<128x128xbf16>
    %cst = arith.constant dense<0.000000e+00> : vector<128x128xf32>
    %5 = tpu.matmul %3, %4, %cst {dimension_numbers = #tpu.dot_dimension_numbers<[1], [0], [0], [1], [0, 0, 1, 1], [], []>} : vector<128x128xbf16>, vector<128x128xbf16>, vector<128x128xf32> -> vector<128x128xf32>
    %6 = vector.broadcast %0 : vector<1x128xf32> to vector<128x128xf32>
    %7 = arith.mulf %5, %6 : vector<128x128xf32>
    %8 = vector.broadcast %1 : vector<1x128xf32> to vector<128x128xf32>
    %9 = arith.addf %7, %8 : vector<128x128xf32>
    %cst_8 = arith.constant 0.000000e+00 : f32
    %10 = vector.broadcast %cst_8 : f32 to vector<128x128xf32>
    %11 = arith.maximumf %9, %10 : vector<128x128xf32>
    %cst_9 = arith.constant 0.000000e+00 : bf16
    %12 = vector.broadcast %cst_9 : bf16 to vector<8x128xbf16>
    %c0_10 = arith.constant 0 : index
    %c0_11 = arith.constant 0 : index
    %13 = vector.load %arg18[%c0_10, %c0_11] : memref<176x128xbf16, #tpu.memory_space<vmem>>, vector<8x128xbf16>
    tpu.vector_store %arg18[%c0_10, %c0_11], %12 {strides = array<i32>} : memref<176x128xbf16, #tpu.memory_space<vmem>>, vector<8x128xbf16>,
    %c168 = arith.constant 168 : index
    %c0_12 = arith.constant 0 : index
    %14 = vector.load %arg18[%c168, %c0_12] : memref<176x128xbf16, #tpu.memory_space<vmem>>, vector<8x128xbf16>
    tpu.vector_store %arg18[%c168, %c0_12], %12 {strides = array<i32>} : memref<176x128xbf16, #tpu.memory_space<vmem>>, vector<8x128xbf16>,
    %c0_i32 = arith.constant 0 : i32
    %15 = arith.cmpi eq, %arg1, %c0_i32 : i32
    %c0_13 = arith.constant 0 : index
    %c0_14 = arith.constant 0 : index
    %c0_15 = arith.constant 0 : index
    %16 = vector.load %arg3[%c0_13, %c0_14, %c0_15] : memref<1x16x128xbf16, #tpu.memory_space<vmem>>, vector<1x16x128xbf16>
    %17 = vector.shape_cast %16 : vector<1x16x128xbf16> to vector<16x128xbf16>
    %c0_16 = arith.constant 0 : index
    %c0_17 = arith.constant 0 : index
    %18 = vector.load %arg5[%c0_16, %c0_17] : memref<128x128xbf16, #tpu.memory_space<vmem>>, vector<128x128xbf16>
    %cst_18 = arith.constant dense<0.000000e+00> : vector<16x128xf32>
    %19 = tpu.matmul %17, %18, %cst_18 {dimension_numbers = #tpu.dot_dimension_numbers<[1], [0], [0], [1], [0, 0, 1, 1], [], []>} : vector<16x128xbf16>, vector<128x128xbf16>, vector<16x128xf32> -> vector<16x128xf32>
    %20 = vector.broadcast %0 : vector<1x128xf32> to vector<16x128xf32>
    %21 = arith.mulf %19, %20 : vector<16x128xf32>
    %22 = vector.broadcast %1 : vector<1x128xf32> to vector<16x128xf32>
    %23 = arith.addf %21, %22 : vector<16x128xf32>
    %cst_19 = arith.constant 0.000000e+00 : f32
    %24 = vector.broadcast %cst_19 : f32 to vector<16x128xf32>
    %25 = arith.maximumf %23, %24 : vector<16x128xf32>
    %cst_20 = arith.constant 0.000000e+00 : f32
    %cst_21 = arith.constant 1.000000e+00 : f32
    %26 = arith.select %15, %cst_20, %cst_21 : f32
    %27 = vector.broadcast %26 : f32 to vector<16x128xf32>
    %28 = arith.mulf %25, %27 : vector<16x128xf32>
    %29 = arith.truncf %28 : vector<16x128xf32> to vector<16x128xbf16>
    %c8 = arith.constant 8 : index
    %c0_22 = arith.constant 0 : index
    %30 = vector.load %arg18[%c8, %c0_22] : memref<176x128xbf16, #tpu.memory_space<vmem>>, vector<16x128xbf16>
    tpu.vector_store %arg18[%c8, %c0_22], %29 {strides = array<i32>} : memref<176x128xbf16, #tpu.memory_space<vmem>>, vector<16x128xbf16>,
    %31 = arith.truncf %11 : vector<128x128xf32> to vector<128x128xbf16>
    %c24 = arith.constant 24 : index
    %c0_23 = arith.constant 0 : index
    %32 = vector.load %arg18[%c24, %c0_23] : memref<176x128xbf16, #tpu.memory_space<vmem>>, vector<128x128xbf16>
    tpu.vector_store %arg18[%c24, %c0_23], %31 {strides = array<i32>} : memref<176x128xbf16, #tpu.memory_space<vmem>>, vector<128x128xbf16>,
    %c1_i32 = arith.constant 1 : i32
    %33 = arith.cmpi eq, %arg1, %c1_i32 : i32
    %c0_24 = arith.constant 0 : index
    %c0_25 = arith.constant 0 : index
    %c0_26 = arith.constant 0 : index
    %34 = vector.load %arg4[%c0_24, %c0_25, %c0_26] : memref<1x16x128xbf16, #tpu.memory_space<vmem>>, vector<1x16x128xbf16>
    %35 = vector.shape_cast %34 : vector<1x16x128xbf16> to vector<16x128xbf16>
    %c0_27 = arith.constant 0 : index
    %c0_28 = arith.constant 0 : index
    %36 = vector.load %arg5[%c0_27, %c0_28] : memref<128x128xbf16, #tpu.memory_space<vmem>>, vector<128x128xbf16>
    %cst_29 = arith.constant dense<0.000000e+00> : vector<16x128xf32>
    %37 = tpu.matmul %35, %36, %cst_29 {dimension_numbers = #tpu.dot_dimension_numbers<[1], [0], [0], [1], [0, 0, 1, 1], [], []>} : vector<16x128xbf16>, vector<128x128xbf16>, vector<16x128xf32> -> vector<16x128xf32>
    %38 = vector.broadcast %0 : vector<1x128xf32> to vector<16x128xf32>
    %39 = arith.mulf %37, %38 : vector<16x128xf32>
    %40 = vector.broadcast %1 : vector<1x128xf32> to vector<16x128xf32>
    %41 = arith.addf %39, %40 : vector<16x128xf32>
    %cst_30 = arith.constant 0.000000e+00 : f32
    %42 = vector.broadcast %cst_30 : f32 to vector<16x128xf32>
    %43 = arith.maximumf %41, %42 : vector<16x128xf32>
    %cst_31 = arith.constant 0.000000e+00 : f32
    %cst_32 = arith.constant 1.000000e+00 : f32
    %44 = arith.select %33, %cst_31, %cst_32 : f32
    %45 = vector.broadcast %44 : f32 to vector<16x128xf32>
    %46 = arith.mulf %43, %45 : vector<16x128xf32>
    %47 = arith.truncf %46 : vector<16x128xf32> to vector<16x128xbf16>
    %c152 = arith.constant 152 : index
    %c0_33 = arith.constant 0 : index
    %48 = vector.load %arg18[%c152, %c0_33] : memref<176x128xbf16, #tpu.memory_space<vmem>>, vector<16x128xbf16>
    tpu.vector_store %arg18[%c152, %c0_33], %47 {strides = array<i32>} : memref<176x128xbf16, #tpu.memory_space<vmem>>, vector<16x128xbf16>,
    %c8_34 = arith.constant 8 : index
    %c0_35 = arith.constant 0 : index
    %49 = vector.load %arg18[%c8_34, %c0_35] : memref<176x128xbf16, #tpu.memory_space<vmem>>, vector<128x128xbf16>
    %c1 = arith.constant 1 : index
    %c0_36 = arith.constant 0 : index
    %c0_37 = arith.constant 0 : index
    %50 = vector.load %arg8[%c1, %c0_36, %c0_37] : memref<9x128x128xbf16, #tpu.memory_space<vmem>>, vector<1x128x128xbf16>
    %51 = vector.shape_cast %50 : vector<1x128x128xbf16> to vector<128x128xbf16>
    %cst_38 = arith.constant dense<0.000000e+00> : vector<128x128xf32>
    %52 = tpu.matmul %49, %51, %cst_38 {dimension_numbers = #tpu.dot_dimension_numbers<[1], [0], [0], [1], [0, 0, 1, 1], [], []>} : vector<128x128xbf16>, vector<128x128xbf16>, vector<128x128xf32> -> vector<128x128xf32>
    %c24_39 = arith.constant 24 : index
    %c0_40 = arith.constant 0 : index
    %53 = vector.load %arg18[%c24_39, %c0_40] : memref<176x128xbf16, #tpu.memory_space<vmem>>, vector<128x128xbf16>
    %c4 = arith.constant 4 : index
    %c0_41 = arith.constant 0 : index
    %c0_42 = arith.constant 0 : index
    %54 = vector.load %arg8[%c4, %c0_41, %c0_42] : memref<9x128x128xbf16, #tpu.memory_space<vmem>>, vector<1x128x128xbf16>
    %55 = vector.shape_cast %54 : vector<1x128x128xbf16> to vector<128x128xbf16>
    %cst_43 = arith.constant dense<0.000000e+00> : vector<128x128xf32>
    %56 = tpu.matmul %53, %55, %cst_43 {dimension_numbers = #tpu.dot_dimension_numbers<[1], [0], [0], [1], [0, 0, 1, 1], [], []>} : vector<128x128xbf16>, vector<128x128xbf16>, vector<128x128xf32> -> vector<128x128xf32>
    %57 = arith.addf %52, %56 : vector<128x128xf32>
    %c40 = arith.constant 40 : index
    %c0_44 = arith.constant 0 : index
    %58 = vector.load %arg18[%c40, %c0_44] : memref<176x128xbf16, #tpu.memory_space<vmem>>, vector<128x128xbf16>
    %c7 = arith.constant 7 : index
    %c0_45 = arith.constant 0 : index
    %c0_46 = arith.constant 0 : index
    %59 = vector.load %arg8[%c7, %c0_45, %c0_46] : memref<9x128x128xbf16, #tpu.memory_space<vmem>>, vector<1x128x128xbf16>
    %60 = vector.shape_cast %59 : vector<1x128x128xbf16> to vector<128x128xbf16>
    %cst_47 = arith.constant dense<0.000000e+00> : vector<128x128xf32>
    %61 = tpu.matmul %58, %60, %cst_47 {dimension_numbers = #tpu.dot_dimension_numbers<[1], [0], [0], [1], [0, 0, 1, 1], [], []>} : vector<128x128xbf16>, vector<128x128xbf16>, vector<128x128xf32> -> vector<128x128xf32>
    %62 = arith.addf %57, %61 : vector<128x128xf32>
    %c7_48 = arith.constant 7 : index
    %c0_49 = arith.constant 0 : index
    %63 = vector.load %arg18[%c7_48, %c0_49] : memref<176x128xbf16, #tpu.memory_space<vmem>>, vector<128x128xbf16>
    %c0_50 = arith.constant 0 : index
    %c0_51 = arith.constant 0 : index
    %c0_52 = arith.constant 0 : index
    %64 = vector.load %arg8[%c0_50, %c0_51, %c0_52] : memref<9x128x128xbf16, #tpu.memory_space<vmem>>, vector<1x128x128xbf16>
    %65 = vector.shape_cast %64 : vector<1x128x128xbf16> to vector<128x128xbf16>
    %cst_53 = arith.constant dense<0.000000e+00> : vector<128x128xf32>
    %66 = tpu.matmul %63, %65, %cst_53 {dimension_numbers = #tpu.dot_dimension_numbers<[1], [0], [0], [1], [0, 0, 1, 1], [], []>} : vector<128x128xbf16>, vector<128x128xbf16>, vector<128x128xf32> -> vector<128x128xf32>
    %c23 = arith.constant 23 : index
    %c0_54 = arith.constant 0 : index
    %67 = vector.load %arg18[%c23, %c0_54] : memref<176x128xbf16, #tpu.memory_space<vmem>>, vector<128x128xbf16>
    %c3 = arith.constant 3 : index
    %c0_55 = arith.constant 0 : index
    %c0_56 = arith.constant 0 : index
    %68 = vector.load %arg8[%c3, %c0_55, %c0_56] : memref<9x128x128xbf16, #tpu.memory_space<vmem>>, vector<1x128x128xbf16>
    %69 = vector.shape_cast %68 : vector<1x128x128xbf16> to vector<128x128xbf16>
    %cst_57 = arith.constant dense<0.000000e+00> : vector<128x128xf32>
    %70 = tpu.matmul %67, %69, %cst_57 {dimension_numbers = #tpu.dot_dimension_numbers<[1], [0], [0], [1], [0, 0, 1, 1], [], []>} : vector<128x128xbf16>, vector<128x128xbf16>, vector<128x128xf32> -> vector<128x128xf32>
    %71 = arith.addf %66, %70 : vector<128x128xf32>
    %c39 = arith.constant 39 : index
    %c0_58 = arith.constant 0 : index
    %72 = vector.load %arg18[%c39, %c0_58] : memref<176x128xbf16, #tpu.memory_space<vmem>>, vector<128x128xbf16>
    %c6 = arith.constant 6 : index
    %c0_59 = arith.constant 0 : index
    %c0_60 = arith.constant 0 : index
    %73 = vector.load %arg8[%c6, %c0_59, %c0_60] : memref<9x128x128xbf16, #tpu.memory_space<vmem>>, vector<1x128x128xbf16>
    %74 = vector.shape_cast %73 : vector<1x128x128xbf16> to vector<128x128xbf16>
    %cst_61 = arith.constant dense<0.000000e+00> : vector<128x128xf32>
    %75 = tpu.matmul %72, %74, %cst_61 {dimension_numbers = #tpu.dot_dimension_numbers<[1], [0], [0], [1], [0, 0, 1, 1], [], []>} : vector<128x128xbf16>, vector<128x128xbf16>, vector<128x128xf32> -> vector<128x128xf32>
    %76 = arith.addf %71, %75 : vector<128x128xf32>
    %c9 = arith.constant 9 : index
    %c0_62 = arith.constant 0 : index
    %77 = vector.load %arg18[%c9, %c0_62] : memref<176x128xbf16, #tpu.memory_space<vmem>>, vector<128x128xbf16>
    %c2 = arith.constant 2 : index
    %c0_63 = arith.constant 0 : index
    %c0_64 = arith.constant 0 : index
    %78 = vector.load %arg8[%c2, %c0_63, %c0_64] : memref<9x128x128xbf16, #tpu.memory_space<vmem>>, vector<1x128x128xbf16>
    %79 = vector.shape_cast %78 : vector<1x128x128xbf16> to vector<128x128xbf16>
    %cst_65 = arith.constant dense<0.000000e+00> : vector<128x128xf32>
    %80 = tpu.matmul %77, %79, %cst_65 {dimension_numbers = #tpu.dot_dimension_numbers<[1], [0], [0], [1], [0, 0, 1, 1], [], []>} : vector<128x128xbf16>, vector<128x128xbf16>, vector<128x128xf32> -> vector<128x128xf32>
    %c25 = arith.constant 25 : index
    %c0_66 = arith.constant 0 : index
    %81 = vector.load %arg18[%c25, %c0_66] : memref<176x128xbf16, #tpu.memory_space<vmem>>, vector<128x128xbf16>
    %c5 = arith.constant 5 : index
    %c0_67 = arith.constant 0 : index
    %c0_68 = arith.constant 0 : index
    %82 = vector.load %arg8[%c5, %c0_67, %c0_68] : memref<9x128x128xbf16, #tpu.memory_space<vmem>>, vector<1x128x128xbf16>
    %83 = vector.shape_cast %82 : vector<1x128x128xbf16> to vector<128x128xbf16>
    %cst_69 = arith.constant dense<0.000000e+00> : vector<128x128xf32>
    %84 = tpu.matmul %81, %83, %cst_69 {dimension_numbers = #tpu.dot_dimension_numbers<[1], [0], [0], [1], [0, 0, 1, 1], [], []>} : vector<128x128xbf16>, vector<128x128xbf16>, vector<128x128xf32> -> vector<128x128xf32>
    %85 = arith.addf %80, %84 : vector<128x128xf32>
    %c41 = arith.constant 41 : index
    %c0_70 = arith.constant 0 : index
    %86 = vector.load %arg18[%c41, %c0_70] : memref<176x128xbf16, #tpu.memory_space<vmem>>, vector<128x128xbf16>
    %c8_71 = arith.constant 8 : index
    %c0_72 = arith.constant 0 : index
    %c0_73 = arith.constant 0 : index
    %87 = vector.load %arg8[%c8_71, %c0_72, %c0_73] : memref<9x128x128xbf16, #tpu.memory_space<vmem>>, vector<1x128x128xbf16>
    %88 = vector.shape_cast %87 : vector<1x128x128xbf16> to vector<128x128xbf16>
    %cst_74 = arith.constant dense<0.000000e+00> : vector<128x128xf32>
    %89 = tpu.matmul %86, %88, %cst_74 {dimension_numbers = #tpu.dot_dimension_numbers<[1], [0], [0], [1], [0, 0, 1, 1], [], []>} : vector<128x128xbf16>, vector<128x128xbf16>, vector<128x128xf32> -> vector<128x128xf32>
    %90 = arith.addf %85, %89 : vector<128x128xf32>
    %91 = tpu.iota {dimensions = array<i32: 0>} : vector<128x1xi32>
    %c16_i32 = arith.constant 16 : i32
    %c0_i32_75 = arith.constant 0 : i32
    %92 = arith.cmpi eq, %c16_i32, %c0_i32_75 : i32
    %c1_i32_76 = arith.constant 1 : i32
    %93 = arith.select %92, %c1_i32_76, %c16_i32 : i32
    %94 = vector.broadcast %93 : i32 to vector<128x1xi32>
    %95 = arith.remsi %91, %94 : vector<128x1xi32>
    %c0_i32_77 = arith.constant 0 : i32
    %96 = vector.broadcast %c0_i32_77 : i32 to vector<128x1xi32>
    %97 = arith.cmpi ne, %95, %96 : vector<128x1xi32>
    %c0_i32_78 = arith.constant 0 : i32
    %98 = vector.broadcast %c0_i32_78 : i32 to vector<128x1xi32>
    %99 = arith.cmpi slt, %95, %98 : vector<128x1xi32>
    %c0_i32_79 = arith.constant 0 : i32
    %100 = arith.cmpi slt, %93, %c0_i32_79 : i32
    %101 = vector.broadcast %100 : i1 to vector<128x1xi1>
    %102 = vector.broadcast %101 : vector<128x1xi1> to vector<128x1xi1>
    %103 = arith.xori %99, %102 : vector<128x1xi1>
    %104 = arith.andi %103, %97 : vector<128x1xi1>
    %105 = vector.broadcast %93 : i32 to vector<128x1xi32>
    %106 = arith.addi %95, %105 : vector<128x1xi32>
    %107 = arith.select %104, %106, %95 : vector<128x1xi1>, vector<128x1xi32>
    %c0_i32_80 = arith.constant 0 : i32
    %108 = vector.broadcast %c0_i32_80 : i32 to vector<128x1xi32>
    %109 = arith.cmpi eq, %107, %108 : vector<128x1xi32>
    %cst_81 = arith.constant 0.000000e+00 : f32
    %110 = vector.shape_cast %109 : vector<128x1xi1> to vector<128x1xi1>
    %111 = vector.broadcast %110 : vector<128x1xi1> to vector<128x128xi1>
    %112 = vector.broadcast %cst_81 : f32 to vector<128x128xf32>
    %113 = arith.select %111, %112, %76 : vector<128x128xi1>, vector<128x128xf32>
    %114 = arith.addf %62, %113 : vector<128x128xf32>
    %c15_i32 = arith.constant 15 : i32
    %115 = vector.broadcast %c15_i32 : i32 to vector<128x1xi32>
    %116 = arith.cmpi eq, %107, %115 : vector<128x1xi32>
    %cst_82 = arith.constant 0.000000e+00 : f32
    %117 = vector.shape_cast %116 : vector<128x1xi1> to vector<128x1xi1>
    %118 = vector.broadcast %117 : vector<128x1xi1> to vector<128x128xi1>
    %119 = vector.broadcast %cst_82 : f32 to vector<128x128xf32>
    %120 = arith.select %118, %119, %90 : vector<128x128xi1>, vector<128x128xf32>
    %121 = arith.addf %114, %120 : vector<128x128xf32>
    %c0_83 = arith.constant 0 : index
    %c0_84 = arith.constant 0 : index
    %122 = vector.load %arg9[%c0_83, %c0_84] : memref<1x128xf32, #tpu.memory_space<vmem>>, vector<1x128xf32>
    %123 = vector.broadcast %122 : vector<1x128xf32> to vector<128x128xf32>
    %124 = arith.mulf %121, %123 : vector<128x128xf32>
    %c0_85 = arith.constant 0 : index
    %c0_86 = arith.constant 0 : index
    %125 = vector.load %arg10[%c0_85, %c0_86] : memref<1x128xf32, #tpu.memory_space<vmem>>, vector<1x128xf32>
    %126 = vector.broadcast %125 : vector<1x128xf32> to vector<128x128xf32>
    %127 = arith.addf %124, %126 : vector<128x128xf32>
    %cst_87 = arith.constant 0.000000e+00 : f32
    %128 = vector.broadcast %cst_87 : f32 to vector<128x128xf32>
    %129 = arith.maximumf %127, %128 : vector<128x128xf32>
    %130 = arith.truncf %129 : vector<128x128xf32> to vector<128x128xbf16>
    %c0_88 = arith.constant 0 : index
    %c0_89 = arith.constant 0 : index
    %131 = vector.load %arg11[%c0_88, %c0_89] : memref<128x128xbf16, #tpu.memory_space<vmem>>, vector<128x128xbf16>
    %cst_90 = arith.constant dense<0.000000e+00> : vector<128x128xf32>
    %132 = tpu.matmul %130, %131, %cst_90 {dimension_numbers = #tpu.dot_dimension_numbers<[1], [0], [0], [1], [0, 0, 1, 1], [], []>} : vector<128x128xbf16>, vector<128x128xbf16>, vector<128x128xf32> -> vector<128x128xf32>
    %c0_91 = arith.constant 0 : index
    %c0_92 = arith.constant 0 : index
    %133 = vector.load %arg12[%c0_91, %c0_92] : memref<1x128xf32, #tpu.memory_space<vmem>>, vector<1x128xf32>
    %134 = vector.broadcast %133 : vector<1x128xf32> to vector<128x128xf32>
    %135 = arith.mulf %132, %134 : vector<128x128xf32>
    %c0_93 = arith.constant 0 : index
    %c0_94 = arith.constant 0 : index
    %136 = vector.load %arg13[%c0_93, %c0_94] : memref<1x128xf32, #tpu.memory_space<vmem>>, vector<1x128xf32>
    %137 = vector.broadcast %136 : vector<1x128xf32> to vector<128x128xf32>
    %138 = arith.addf %135, %137 : vector<128x128xf32>
    %c0_95 = arith.constant 0 : index
    %c0_96 = arith.constant 0 : index
    %c0_97 = arith.constant 0 : index
    %139 = vector.load %arg2[%c0_95, %c0_96, %c0_97] : memref<1x128x128xbf16, #tpu.memory_space<vmem>>, vector<1x128x128xbf16>
    %140 = vector.shape_cast %139 : vector<1x128x128xbf16> to vector<128x128xbf16>
    %c0_98 = arith.constant 0 : index
    %c0_99 = arith.constant 0 : index
    %141 = vector.load %arg14[%c0_98, %c0_99] : memref<128x128xbf16, #tpu.memory_space<vmem>>, vector<128x128xbf16>
    %cst_100 = arith.constant dense<0.000000e+00> : vector<128x128xf32>
    %142 = tpu.matmul %140, %141, %cst_100 {dimension_numbers = #tpu.dot_dimension_numbers<[1], [0], [0], [1], [0, 0, 1, 1], [], []>} : vector<128x128xbf16>, vector<128x128xbf16>, vector<128x128xf32> -> vector<128x128xf32>
    %c0_101 = arith.constant 0 : index
    %c0_102 = arith.constant 0 : index
    %143 = vector.load %arg15[%c0_101, %c0_102] : memref<1x128xf32, #tpu.memory_space<vmem>>, vector<1x128xf32>
    %144 = vector.broadcast %143 : vector<1x128xf32> to vector<128x128xf32>
    %145 = arith.mulf %142, %144 : vector<128x128xf32>
    %c0_103 = arith.constant 0 : index
    %c0_104 = arith.constant 0 : index
    %146 = vector.load %arg16[%c0_103, %c0_104] : memref<1x128xf32, #tpu.memory_space<vmem>>, vector<1x128xf32>
    %147 = vector.broadcast %146 : vector<1x128xf32> to vector<128x128xf32>
    %148 = arith.addf %145, %147 : vector<128x128xf32>
    %149 = arith.addf %138, %148 : vector<128x128xf32>
    %cst_105 = arith.constant 0.000000e+00 : f32
    %150 = vector.broadcast %cst_105 : f32 to vector<128x128xf32>
    %151 = arith.maximumf %149, %150 : vector<128x128xf32>
    %152 = arith.truncf %151 : vector<128x128xf32> to vector<128x128xbf16>
    %c0_106 = arith.constant 0 : index
    %c0_107 = arith.constant 0 : index
    %c0_108 = arith.constant 0 : index
    %153 = vector.load %arg17[%c0_106, %c0_107, %c0_108] : memref<1x128x128xbf16, #tpu.memory_space<vmem>>, vector<1x128x128xbf16>
    %154 = vector.shape_cast %153 : vector<1x128x128xbf16> to vector<128x128xbf16>
    %155 = vector.shape_cast %152 : vector<128x128xbf16> to vector<1x128x128xbf16>
    tpu.vector_store %arg17[%c0_106, %c0_107, %c0_108], %155 {strides = array<i32>} : memref<1x128x128xbf16, #tpu.memory_space<vmem>>, vector<1x128x128xbf16>,
    return
  }
  func.func @transform_0(%arg0: i32, %arg1: i32) -> (i32, i32, i32) {
    %c0_i32 = arith.constant 0 : i32
    %c0_i32_0 = arith.constant 0 : i32
    return %arg0, %arg1, %c0_i32 : i32, i32, i32
  }
  func.func @transform_1(%arg0: i32, %arg1: i32) -> (i32, i32, i32) {
    %c8_i32 = arith.constant 8 : i32
    %0 = arith.muli %arg1, %c8_i32 : i32
    %c1_i32 = arith.constant 1 : i32
    %1 = arith.subi %0, %c1_i32 : i32
    %c0_i32 = arith.constant 0 : i32
    %2 = arith.maxsi %1, %c0_i32 : i32
    %c0_i32_0 = arith.constant 0 : i32
    %c0_i32_1 = arith.constant 0 : i32
    return %arg0, %2, %c0_i32_0 : i32, i32, i32
  }
  func.func @transform_2(%arg0: i32, %arg1: i32) -> (i32, i32, i32) {
    %c1_i32 = arith.constant 1 : i32
    %0 = arith.addi %arg1, %c1_i32 : i32
    %c8_i32 = arith.constant 8 : i32
    %1 = arith.muli %0, %c8_i32 : i32
    %c15_i32 = arith.constant 15 : i32
    %2 = arith.minsi %1, %c15_i32 : i32
    %c0_i32 = arith.constant 0 : i32
    %c0_i32_0 = arith.constant 0 : i32
    return %arg0, %2, %c0_i32 : i32, i32, i32
  }
  func.func @transform_3(%arg0: i32, %arg1: i32) -> (i32, i32) {
    %c0_i32 = arith.constant 0 : i32
    %c0_i32_0 = arith.constant 0 : i32
    %c0_i32_1 = arith.constant 0 : i32
    return %c0_i32, %c0_i32_0 : i32, i32
  }
  func.func @transform_4(%arg0: i32, %arg1: i32) -> (i32, i32) {
    %c0_i32 = arith.constant 0 : i32
    %c0_i32_0 = arith.constant 0 : i32
    %c0_i32_1 = arith.constant 0 : i32
    return %c0_i32, %c0_i32_0 : i32, i32
  }
  func.func @transform_5(%arg0: i32, %arg1: i32) -> (i32, i32) {
    %c0_i32 = arith.constant 0 : i32
    %c0_i32_0 = arith.constant 0 : i32
    %c0_i32_1 = arith.constant 0 : i32
    return %c0_i32, %c0_i32_0 : i32, i32
  }
  func.func @transform_6(%arg0: i32, %arg1: i32) -> (i32, i32, i32) {
    %c0_i32 = arith.constant 0 : i32
    %c0_i32_0 = arith.constant 0 : i32
    %c0_i32_1 = arith.constant 0 : i32
    %c0_i32_2 = arith.constant 0 : i32
    return %c0_i32, %c0_i32_0, %c0_i32_1 : i32, i32, i32
  }
  func.func @transform_7(%arg0: i32, %arg1: i32) -> (i32, i32) {
    %c0_i32 = arith.constant 0 : i32
    %c0_i32_0 = arith.constant 0 : i32
    %c0_i32_1 = arith.constant 0 : i32
    return %c0_i32, %c0_i32_0 : i32, i32
  }
  func.func @transform_8(%arg0: i32, %arg1: i32) -> (i32, i32) {
    %c0_i32 = arith.constant 0 : i32
    %c0_i32_0 = arith.constant 0 : i32
    %c0_i32_1 = arith.constant 0 : i32
    return %c0_i32, %c0_i32_0 : i32, i32
  }
  func.func @transform_9(%arg0: i32, %arg1: i32) -> (i32, i32) {
    %c0_i32 = arith.constant 0 : i32
    %c0_i32_0 = arith.constant 0 : i32
    %c0_i32_1 = arith.constant 0 : i32
    return %c0_i32, %c0_i32_0 : i32, i32
  }
  func.func @transform_10(%arg0: i32, %arg1: i32) -> (i32, i32) {
    %c0_i32 = arith.constant 0 : i32
    %c0_i32_0 = arith.constant 0 : i32
    %c0_i32_1 = arith.constant 0 : i32
    return %c0_i32, %c0_i32_0 : i32, i32
  }
  func.func @transform_11(%arg0: i32, %arg1: i32) -> (i32, i32) {
    %c0_i32 = arith.constant 0 : i32
    %c0_i32_0 = arith.constant 0 : i32
    %c0_i32_1 = arith.constant 0 : i32
    return %c0_i32, %c0_i32_0 : i32, i32
  }
  func.func @transform_12(%arg0: i32, %arg1: i32) -> (i32, i32) {
    %c0_i32 = arith.constant 0 : i32
    %c0_i32_0 = arith.constant 0 : i32
    %c0_i32_1 = arith.constant 0 : i32
    return %c0_i32, %c0_i32_0 : i32, i32
  }
  func.func @transform_13(%arg0: i32, %arg1: i32) -> (i32, i32) {
    %c0_i32 = arith.constant 0 : i32
    %c0_i32_0 = arith.constant 0 : i32
    %c0_i32_1 = arith.constant 0 : i32
    return %c0_i32, %c0_i32_0 : i32, i32
  }
  func.func @transform_14(%arg0: i32, %arg1: i32) -> (i32, i32) {
    %c0_i32 = arith.constant 0 : i32
    %c0_i32_0 = arith.constant 0 : i32
    %c0_i32_1 = arith.constant 0 : i32
    return %c0_i32, %c0_i32_0 : i32, i32
  }
  func.func @transform_15(%arg0: i32, %arg1: i32) -> (i32, i32, i32) {
    %c0_i32 = arith.constant 0 : i32
    %c0_i32_0 = arith.constant 0 : i32
    return %arg0, %arg1, %c0_i32 : i32, i32, i32
  }
}

</mosaic_0001>

<bundles_post_ra>
// kernel: tpu_custom_call.1
= control target key start
LH: loop header
LB: loop body
LE: loop exit
PB: predicated region body
PF: predicated region fallthrough
CT: control target
= control target key end

     0   :  { %s7570_s0 = inlined_call_operand.hbm [shape: bf16[2,256,128], index: 0, kind: input, shape index: {}]   ;;  %s7571_s1 = inlined_call_operand.hbm [shape: bf16[2,256,128], index: 1, kind: input, shape index: {}]   ;;  %s7572_s2 = inlined_call_operand.hbm [shape: bf16[2,256,128], index: 2, kind: input, shape index: {}]   ;;  %s7573_s3 = inlined_call_operand.hbm [shape: bf16[128,128], index: 3, kind: input, shape index: {}]   ;;  %s7574_s4 = inlined_call_operand.vmem [shape: f32[1,128], index: 4, kind: input, shape index: {}]   ;;  %s7575_s5 = inlined_call_operand.vmem [shape: f32[1,128], index: 5, kind: input, shape index: {}]   ;;  %s7576_s6 = inlined_call_operand.hbm [shape: bf16[9,128,128], index: 6, kind: input, shape index: {}]   ;;  %s7577_s7 = inlined_call_operand.vmem [shape: f32[1,128], index: 7, kind: input, shape index: {}]   ;;  %s7578_s8 = inlined_call_operand.vmem [shape: f32[1,128], index: 8, kind: input, shape index: {}]   ;;  %s7579_s9 = inlined_call_operand.hbm [shape: bf16[128,128], index: 9, kind: input, shape index: {}]   ;;  %s7580_s10 = inlined_call_operand.vmem [shape: f32[1,128], index: 10, kind: input, shape index: {}]   ;;  %s7581_s11 = inlined_call_operand.vmem [shape: f32[1,128], index: 11, kind: input, shape index: {}]   ;;  %s7582_s12 = inlined_call_operand.hbm [shape: bf16[128,128], index: 12, kind: input, shape index: {}]   ;;  %s7583_s13 = inlined_call_operand.vmem [shape: f32[1,128], index: 13, kind: input, shape index: {}]   ;;  %s7584_s14 = inlined_call_operand.vmem [shape: f32[1,128], index: 14, kind: input, shape index: {}]   ;;  %s7585_s15 = inlined_call_operand.hbm [shape: bf16[2,256,128], index: 15, kind: output, shape index: {}]  }
   0x1   :  { %7621 = sst [smem:[#allocation36_spill]] %s7570_s0 }
   0x2   :  { %7622 = sst [smem:[#allocation37_spill]] %s7571_s1 }
   0x3   :  { %7623 = sst [smem:[#allocation38_spill]] %s7572_s2 }
   0x4   :  { %7624 = sst [smem:[#allocation39_spill]] %s7573_s3 }
   0x5   :  { %7625 = sst [smem:[#allocation40_spill]] %s7574_s4 }
   0x6   :  { %7626 = sst [smem:[#allocation41_spill]] %s7575_s5 }
   0x7   :  { %7627 = sst [smem:[#allocation42_spill]] %s7576_s6 }
   0x8   :  { %7628 = sst [smem:[#allocation43_spill]] %s7577_s7 }
   0x9   :  { %7629 = sst [smem:[#allocation44_spill]] %s7578_s8 }
   0xa   :  { %7630 = sst [smem:[#allocation45_spill]] %s7579_s9 }
   0xb   :  { %7631 = sst [smem:[#allocation46_spill]] %s7580_s10 }
   0xc   :  { %7632 = sst [smem:[#allocation47_spill]] %s7581_s11 }
   0xd   :  { %7633 = sst [smem:[#allocation48_spill]] %s7582_s12 }
   0xe   :  { %7634 = sst [smem:[#allocation49_spill]] %s7583_s13 }
   0xf   :  { %7635 = sst [smem:[#allocation50_spill]] %s7584_s14 }
  0x10   :  { %7636 = sst [smem:[#allocation51_spill]] %s7585_s15 }
  0x11   :  { %20 = vsyncpa [#allocation4], 0 }
  0x12   :  { %22 = vsyncpa [#allocation4 + $0x1], 0 }
  0x13   :  { %23 = vsyncpa [#allocation7], 0 }
  0x14   :  { %25 = vsyncpa [#allocation7 + $0x1], 0 }
  0x15   :  { %26 = vsyncpa [#allocation10], 0 }
  0x16   :  { %27 = vsyncpa [#allocation13], 0 }
  0x17   :  { %28 = vsyncpa [#allocation5], 0 }
  0x18   :  { %30 = vsyncpa [#allocation5 + $0x1], 0  ;;  %s6255_s18 = smov 0   ;;  %s6257_s19 = smov 0  }
  0x19   :  { %s6259_s20 = smov 0   ;;  %s6261_s21 = smov 0  }
  0x1a   :  { %s6263_s22 = smov 0   ;;  %s6265_s23 = smov 0  }
  0x1b   :  { %s6267_s24 = smov 0   ;;  %s6269_s25 = smov 0  }
  0x1c   :  { %s6271_s26 = smov 0   ;;  %s6273_s27 = smov 0  }
  0x1d   :  { %s6275_s28 = smov 0   ;;  %s6277_s29 = smov 0  }
  0x1e   :  { %s6279_s30 = smov 0   ;;  %s6281_s16 = smov 0  }
  0x1f LB: > { %7637 = sst [smem:[#allocation22_spill]] %s6106_s18  ;;  %s6326_s17 = sadd.s32 4294967295, %s6158_s16   ;;  %s6158_s16 = sphi %s6281_s16, %s36_s16   ;;  %s6154_s30 = sphi %s6279_s30, %s7740_s30   ;;  %s6150_s29 = sphi %s6277_s29, %s7739_s29   ;;  %s6146_s28 = sphi %s6275_s28, %s7738_s28   ;;  %s6142_s27 = sphi %s6273_s27, %s7751_s27   ;;  %s6138_s26 = sphi %s6271_s26, %s7750_s26   ;;  %s6134_s25 = sphi %s6269_s25, %s7749_s25   ;;  %s6130_s24 = sphi %s6267_s24, %s7748_s24   ;;  %s6126_s23 = sphi %s6265_s23, %s7747_s23   ;;  %s6122_s22 = sphi %s6263_s22, %s7746_s22   ;;  %s6118_s21 = sphi %s6261_s21, %s7745_s21   ;;  %s6114_s20 = sphi %s6259_s20, %s7744_s20   ;;  %s6110_s19 = sphi %s6257_s19, %s7743_s19   ;;  %s6106_s18 = sphi %s6255_s18, %s7742_s18  }
  0x20   : > { %7638 = sst [smem:[#allocation23_spill]] %s6110_s19  ;;  %p4491_p0 = scmp.ge.s32.totalorder %s6158_s16, 1 }
  0x21   : > { %7639 = sst [smem:[#allocation24_spill]] %s6114_s20  ;;  %p7589_p1 = scmp.eq.s32.totalorder %s6326_s17, 0 }
  0x22   : > { %7640 = sst [smem:[#allocation25_spill]] %s6122_s22  ;;  %p433_p2 = scmp.lt.s32.totalorder %s6158_s16, 5 }
  0x23   : > { %7641 = sst [smem:[#allocation26_spill]] %s6142_s27  ;;  %s6161_s13 = smov [#allocation12]  }
  0x24   : > { %7642 = sst [smem:[#allocation27_spill]] %s6146_s28  ;;  %p6331_p3 = pnand %p4491_p0, %p433_p2 }
  0x25   : > { %7643 = sst [smem:[#allocation28_spill]] %s6150_s29  ;;  %s6160_s28 = smov [#allocation9]  }
  0x26   : > { %7644 = sst [smem:[#allocation29_spill]] %s6154_s30  ;;  %s445_s14 = sshll.u32 %s6160_s28, 4  ;;  %s446_s14 = int_to_ptr.vmem [resolvable:$true] %s445_s14 }
  0x27   : > { %s7645_s15 = scalar_select %p6331_p3, 1, 0 }
  0x28   : > { %p5504_p4 = pneg %p6331_p3  ;;  %s483_s10 = sshll.u32 %s6161_s13, 4  ;;  %s6343_s10 = int_to_ptr.vmem [resolvable:$true] %s483_s10 }
  0x29   : > { %7646 = sst [smem:[#allocation30_spill]] %s7645_s15  ;;  %s7648_s3 = sld [smem:[#allocation39_spill]] }
  0x2a   : > { %p6339_p5 = pnand %p5504_p4, %p7589_p1 }
  0x2c   : > { %s7647_s11 = scalar_select %p6339_p5, 1, 0 }
  0x2d   : > { %p6353_p7 = pneg %p6339_p5 }
  0x2f   : > { %s5794_s5 = scalar_lea.hbm %s7648_s3, 1024 }
  0x30   : > { %p5795_p6 = scmp.ne.s32.totalorder %s7648_s3, %s5794_s5  ;;  %p5801_p10 = scmp.lt.u32.totalorder %s5794_s5, %s7648_s3 }
  0x32   : > { %p5797_p8 = pnand %p6353_p7, %p5795_p6 }
  0x34   : > { %p5798_p9 = pneg %p5797_p8 }
  0x36   : > { %p5803_p11 = pnand %p5801_p10, %p5798_p9 }
  0x38   : > { %5806 = shalt.err (!%p5803_p11)
}
  0x39   : > { %s5807_s7 = scalar_lea.vmem %s446_s14, 1024  ;;  %p5815_p2 = scmp.lt.s32.totalorder %s446_s14, %s446_s14 }
  0x3a   : > { %p5808_p12 = scmp.ne.s32.totalorder %s446_s14, %s5807_s7  ;;  %p5816_p4 = scmp.lt.s32.totalorder %s5807_s7, %s5807_s7 }
  0x3c   : > { %p5810_p13 = pnand %p5808_p12, %p6353_p7  ;;  %p5817_p1 = por %p5816_p4, %p5815_p2 }
  0x3e   : > { %p5811_p0 = pneg %p5810_p13 }
  0x40   : > { %p5818_p3 = pnand %p5817_p1, %p5811_p0 }
  0x42   : > { %5821 = shalt.err (!%p5818_p3)
}
  0x43   : > { %s7594_s4 = smov 64   ;;  %s7596_s8 = smov 4  }
  0x44   : > { %5507 = dma.hbm_to_vmem [thread:$0]  (!%p6339_p5), %s7648_s3, 1024, %s446_s14, [#allocation10], %s7594_s4, %s7594_s4, %s7596_s8  }
  0x45   : > { %s7650_s9 = sld [smem:[#allocation45_spill]] }
  0x4b   : > { %s5822_s2 = scalar_lea.hbm %s7650_s9, 1024 }
  0x4c   : > { %p5823_p1 = scmp.ne.s32.totalorder %s7650_s9, %s5822_s2  ;;  %p5829_p8 = scmp.lt.u32.totalorder %s5822_s2, %s7650_s9 }
  0x4e   : > { %p5825_p3 = pnand %p5823_p1, %p6353_p7 }
  0x50   : > { %p5826_p6 = pneg %p5825_p3 }
  0x52   : > { %p5831_p9 = pnand %p5829_p8, %p5826_p6 }
  0x54   : > { %5834 = shalt.err (!%p5831_p9)
}
  0x55   : > { %s5835_s14 = scalar_lea.vmem %s6343_s10, 1024  ;;  %p5843_p13 = scmp.lt.s32.totalorder %s6343_s10, %s6343_s10 }
  0x56   : > { %p5836_p10 = scmp.ne.s32.totalorder %s6343_s10, %s5835_s14  ;;  %p5844_p0 = scmp.lt.s32.totalorder %s5835_s14, %s5835_s14 }
  0x58   : > { %p5838_p11 = pnand %p5836_p10, %p6353_p7  ;;  %p5845_p2 = por %p5844_p0, %p5843_p13 }
  0x5a   : > { %p5839_p12 = pneg %p5838_p11 }
  0x5c   : > { %p5846_p4 = pnand %p5845_p2, %p5839_p12 }
  0x5e   : > { %5849 = shalt.err (!%p5846_p4)
}
  0x5f   : > { %5513 = dma.hbm_to_vmem [thread:$0]  (!%p6339_p5), %s7650_s9, 1024, %s6343_s10, [#allocation13], %s7594_s4, %s7594_s4, %s7596_s8  }
  0x60   : > { %s45_s19 = sadd.s32 1, %s6150_s29  ;;  %s48_s20 = sadd.s32 1, %s6154_s30 }
  0x61   : > { %p46_p1 = scmp.ge.s32.totalorder %s45_s19, 2  ;;  %p7608_p3 = scmp.eq.s32.totalorder %s6158_s16, 0 }
  0x62   : > { %s4485_s5 = sshll.u32 %s6150_s29, 3  ;;  %s93_s15 = sadd.s32 1, %s6126_s23 }
  0x63   : > { %s7753_s19 = smov (%p46_p1, %s45_s19), 0  ;;  %s7755_s20 = smov (!%p46_p1, %s48_s20), %s6154_s30 }
  0x64   : > { %7651 = sst [smem:[#allocation31_spill]] %s7753_s19  ;;  %s53_s27 = ssub.s32 %s6150_s29, %s7753_s19 }
  0x65   : > { %s4486_s13 = sadd.s32 4294967295, %s4485_s5  ;;  %p50_p6 = scmp.ge.s32.totalorder %s7755_s20, 2 }
  0x66   : > { %p82_p8 = scmp.gt.s32.totalorder %s4486_s13, 0  ;;  %s4487_s10 = sshll.u32 %s7753_s19, 3 }
  0x67   : > { %p100_p9 = scmp.ne.s32.totalorder %s6126_s23, %s6122_s22  ;;  %s7757_s20 = smov (%p50_p6, %s7755_s20), 0 }
  0x68   : > { %7652 = sst [smem:[#allocation32_spill]] %s7757_s20  ;;  %s7759_s13 = smov (!%p82_p8, %s4486_s13), 0 }
  0x69   : > { %s6415_s7 = ssub.s32 %s6154_s30, %s7757_s20  ;;  %s4488_s14 = sadd.s32 4294967295, %s4487_s10 }
  0x6a   : > { %7653 = sst [smem:[#allocation33_spill]] %s6415_s7  ;;  %s6418_s2 = sor.u32 %s53_s27, %s6415_s7 }
  0x6b   : > { %p86_p10 = scmp.gt.s32.totalorder %s4488_s14, 0  ;;  %p6423_p12 = por %p100_p9, %p7608_p3 }
  0x6c   : > { %p106_p13 = scmp.ne.s32.totalorder %s6122_s22, %s6118_s21  ;;  %s6429_s4 = sadd.s32 8, %s4485_s5 }
  0x6d   : > { %s7761_s14 = smov (!%p86_p10, %s4488_s14), 0  ;;  %7655 = sst [smem:[#allocation34_spill]] %s6429_s4 }
  0x6e   : > { %s89_s8 = ssub.s32 %s7759_s13, %s7761_s14  ;;  %p7656_p2 = scmp.eq.s32.totalorder %s6326_s17, 0 }
  0x6f   : > { %s90_s27 = sor.u32 %s89_s8, %s6415_s7  ;;  %s6439_s9 = sadd.s32 8, %s4487_s10 }
  0x70   : > { %p6435_p4 = por %p106_p13, %p7656_p2  ;;  %p91_p1 = scmp.eq.s32.totalorder %s90_s27, 0 }
  0x71   : > { %p7607_p8 = scmp.lt.s32.totalorder %s6158_s16, 4  ;;  %s6447_s5 = sshll.u32 %s6154_s30, 5 }
  0x72   : > { %s7657_s3 = scalar_select %p6435_p4, 1, 0 }
  0x73   : > { %s6444_s21 = scalar_select %p91_p1, %s6126_s23, %s93_s15  }
  0x74   : > { %7658 = sst [smem:[#allocation35_spill]] %s7657_s3  ;;  %s545_s14 = sand.u32 1, %s6158_s16  }
  0x75   : > { %s547_s8 = sand.u32 1, %s6126_s23   ;;  %s4504_s19 = sshll.u32 %s7759_s13, 1 }
  0x76   : > { %s4501_s20 = sshll.u32 %s547_s8, 3  ;;  %s559_s22 = sadd.s32 %s4504_s19, %s6447_s5 }
  0x77   : > { %s4506_s7 = sshll.u32 %s559_s22, 6  ;;  %s549_s3 = scalar_lea.vmem [#allocation6], %s4501_s20 }
  0x78   : > { %s562_s27 = sshll.u32 %s549_s3, 4  ;;  %s7659_s1 = sld [smem:[#allocation37_spill]]  ;;  %s6457_s27 = int_to_ptr.vmem [resolvable:$true] %s562_s27 }
  0x79   : > { %p6463_p9 = pnand %p7607_p8, %p6423_p12  ;;  %s6164_s3 = smov [#allocation11]  }
  0x7a   : > { %s464_s22 = sshll.u32 %s6164_s3, 4  ;;  %s6469_s0 = scalar_lea.sflag [#allocation7], %s545_s14  ;;  %s6467_s22 = int_to_ptr.vmem [resolvable:$true] %s464_s22 }
  0x7b   : > { %p5852_p13 = pneg %p6463_p9 }
  0x7e   : > { %s6455_s10 = scalar_lea.hbm %s7659_s1, %s4506_s7  ;;  %s5855_s13 = scalar_lea.hbm %s7659_s1, 4096 }
  0x7f   : > { %s5850_s4 = scalar_lea.hbm %s6455_s10, 128  ;;  %p5856_p12 = scmp.lt.u32.totalorder %s6455_s10, %s7659_s1 }
  0x80   : > { %p5851_p10 = scmp.ne.s32.totalorder %s6455_s10, %s5850_s4  ;;  %p5857_p6 = scmp.lt.u32.totalorder %s5855_s13, %s5850_s4 }
  0x81   : > { %p5859_p8 = scmp.lt.u32.totalorder %s5850_s4, %s6455_s10 }
  0x82   : > { %p5853_p2 = pnand %p5852_p13, %p5851_p10  ;;  %p5858_p0 = por %p5857_p6, %p5856_p12 }
  0x84   : > { %p5854_p1 = pneg %p5853_p2  ;;  %p5860_p3 = por %p5859_p8, %p5858_p0 }
  0x86   : > { %p5861_p11 = pnand %p5860_p3, %p5854_p1 }
  0x88   : > { %5864 = shalt.err (!%p5861_p11)
}
  0x89   : > { %s5865_s14 = scalar_lea.vmem %s6457_s27, 128  ;;  %s6165_s8 = smov [#allocation6]  }
  0x8a   : > { %p5866_p10 = scmp.ne.s32.totalorder %s6457_s27, %s5865_s14  ;;  %s5870_s3 = sshll.u32 %s6165_s8, 4  ;;  %s5871_s3 = int_to_ptr.vmem [resolvable:$false] %s5870_s3 }
  0x8b   : > { %s5872_s19 = scalar_lea.vmem %s5871_s3, 256  ;;  %p5873_p5 = scmp.lt.s32.totalorder %s6457_s27, %s5871_s3 }
  0x8c   : > { %p5868_p2 = pnand %p5866_p10, %p5852_p13  ;;  %p5874_p6 = scmp.lt.s32.totalorder %s5872_s19, %s5865_s14 }
  0x8e   : > { %p5869_p4 = pneg %p5868_p2  ;;  %p5875_p12 = por %p5874_p6, %p5873_p5 }
  0x90   : > { %p5876_p0 = pnand %p5875_p12, %p5869_p4 }
  0x92   : > { %5879 = shalt.err (!%p5876_p0)
}
  0x93   : > { %s7661_s4 = smov 4   ;;  %s7662_s20 = smov 64  }
  0x94   : > { %5523 = dma.hbm_to_vmem [thread:$0]  (!%p6463_p9), %s6455_s10, 128, %s6457_s27, %s6469_s0, %s7662_s20, %s7662_s20, %s7661_s4  }
  0x95   : > { %s7663_s6 = sld [smem:[#allocation42_spill]] }
  0x9b   : > { %s5880_s18 = scalar_lea.hbm %s7663_s6, 9216 }
  0x9c   : > { %p5881_p5 = scmp.ne.s32.totalorder %s7663_s6, %s5880_s18  ;;  %p5887_p4 = scmp.lt.u32.totalorder %s5880_s18, %s7663_s6 }
  0x9e   : > { %p5883_p3 = pnand %p5881_p5, %p6353_p7 }
  0xa0   : > { %p5884_p11 = pneg %p5883_p3 }
  0xa2   : > { %p5889_p8 = pnand %p5887_p4, %p5884_p11 }
  0xa4   : > { %5892 = shalt.err (!%p5889_p8)
}
  0xa5   : > { %s5893_s27 = scalar_lea.vmem %s6467_s22, 9216  ;;  %p5901_p10 = scmp.lt.s32.totalorder %s6467_s22, %s6467_s22 }
  0xa6   : > { %p5894_p9 = scmp.ne.s32.totalorder %s6467_s22, %s5893_s27  ;;  %p5902_p2 = scmp.lt.s32.totalorder %s5893_s27, %s5893_s27 }
  0xa8   : > { %p5896_p13 = pnand %p5894_p9, %p6353_p7  ;;  %p5903_p6 = por %p5902_p2, %p5901_p10 }
  0xaa   : > { %p5897_p1 = pneg %p5896_p13 }
  0xac   : > { %p5904_p12 = pnand %p5903_p6, %p5897_p1 }
  0xae   : > { %5907 = shalt.err (!%p5904_p12)
}
  0xaf   : > { %p7664_p0 = scmp.ne.s32.totalorder %s7647_s11, 0  ;;  %s6166_s13 = smov [#allocation14]  }
  0xb0   : > { %s502_s7 = sshll.u32 %s6166_s13, 4  ;;  %s7665_s12 = sld [smem:[#allocation48_spill]]  ;;  %s503_s7 = int_to_ptr.vmem [resolvable:$true] %s502_s7 }
  0xb1   : > { %5510 = dma.hbm_to_vmem [thread:$0]  (!%p7664_p0), %s7663_s6, 9216, %s6467_s22, [#allocation10], %s7662_s20, %s7662_s20, %s7661_s4  }
  0xb6   : > { %s5908_s3 = scalar_lea.hbm %s7665_s12, 1024 }
  0xb7   : > { %p5909_p5 = scmp.ne.s32.totalorder %s7665_s12, %s5908_s3  ;;  %p5915_p4 = scmp.lt.u32.totalorder %s5908_s3, %s7665_s12 }
  0xb9   : > { %p5911_p3 = pnand %p5909_p5, %p6353_p7 }
  0xbb   : > { %p5912_p11 = pneg %p5911_p3 }
  0xbd   : > { %p5917_p8 = pnand %p5915_p4, %p5912_p11 }
  0xbf   : > { %5920 = shalt.err (!%p5917_p8)
}
  0xc0   : > { %s5921_s22 = scalar_lea.vmem %s503_s7, 1024  ;;  %p5929_p10 = scmp.lt.s32.totalorder %s503_s7, %s503_s7 }
  0xc1   : > { %p5922_p9 = scmp.ne.s32.totalorder %s503_s7, %s5921_s22  ;;  %p5930_p2 = scmp.lt.s32.totalorder %s5921_s22, %s5921_s22 }
  0xc3   : > { %p5924_p13 = pnand %p5922_p9, %p6353_p7  ;;  %p5931_p6 = por %p5930_p2, %p5929_p10 }
  0xc5   : > { %p5925_p1 = pneg %p5924_p13 }
  0xc7   : > { %p5932_p12 = pnand %p5931_p6, %p5925_p1 }
  0xc9   : > { %5935 = shalt.err (!%p5932_p12)
}
  0xca   : > { %5516 = dma.hbm_to_vmem [thread:$0]  (!%p7664_p0), %s7665_s12, 1024, %s503_s7, [#allocation13], %s7662_s20, %s7662_s20, %s7661_s4  }
  0xcb   : > { %s4484_s11 = sadd.s32 4294967294, %s6158_s16   ;;  %s57_s28 = sadd.s32 1, %s6138_s26 }
  0xcc   : > { %p7666_p7 = scmp.eq.s32.totalorder %s6418_s2, 0  ;;  %p64_p5 = scmp.ne.s32.totalorder %s6138_s26, %s6134_s25 }
  0xcd   : > { %p70_p3 = scmp.ne.s32.totalorder %s6134_s25, %s6130_s24  ;;  %p420_p11 = scmp.eq.s32.totalorder %s6326_s17, 3 }
  0xce   : > { %s6552_s19 = scalar_select %p7666_p7, %s6138_s26, %s57_s28  }
  0xcf   : > { %p426_p4 = scmp.eq.s32.totalorder %s4484_s11, 3  ;;  %p7667_p8 = scmp.eq.s32.totalorder %s6158_s16, 0 }
  0xd0   : > { %p7669_p13 = scmp.eq.s32.totalorder %s6326_s17, 0  ;;  %p6571_p0 = por %p420_p11, %p64_p5 }
  0xd1   : > { %p6561_p9 = por %p7667_p8, %p64_p5  ;;  %p6575_p10 = por %p426_p4, %p70_p3 }
  0xd2   : > { %p6567_p1 = por %p7669_p13, %p70_p3  ;;  %s522_s8 = sand.u32 1, %s6138_s26  }
  0xd3   : > { %s7671_s2 = scalar_select %p6571_p0, 1, 0 }
  0xd4   : > { %s7672_s7 = scalar_select %p6575_p10, 1, 0 }
  0xd5   : > { %s4498_s3 = sshll.u32 %s6150_s29, 4  ;;  %s4497_s15 = sshll.u32 %s522_s8, 6 }
  0xd6   : > { %s532_s14 = sadd.s32 %s6447_s5, %s4498_s3  ;;  %s526_s22 = scalar_lea.vmem [#allocation3], %s4497_s15 }
  0xd7   : > { %s4500_s27 = sshll.u32 %s532_s14, 6  ;;  %s535_s1 = sshll.u32 %s526_s22, 4  ;;  %s6587_s1 = int_to_ptr.vmem [resolvable:$true] %s535_s1 }
  0xd8   : > { %s7673_s28 = sld [smem:[#allocation36_spill]]  ;;  %p7675_p2 = scmp.lt.s32.totalorder %s6158_s16, 4 }
  0xd9   : > { %s6597_s3 = scalar_lea.sflag [#allocation4], %s522_s8 }
  0xda   : > { %p6593_p6 = pnand %p7675_p2, %p6561_p9 }
  0xdc   : > { %p5938_p7 = pneg %p6593_p6 }
  0xde   : > { %s7674_s6 = smov %s7673_s28  ;;  %s6585_s12 = scalar_lea.hbm %s7673_s28, %s4500_s27 }
  0xdf   : > { %s5936_s15 = scalar_lea.hbm %s6585_s12, 1024  ;;  %s5941_s13 = scalar_lea.hbm %s7674_s6, 4096 }
  0xe0   : > { %p5937_p12 = scmp.ne.s32.totalorder %s6585_s12, %s5936_s15  ;;  %p5942_p11 = scmp.lt.u32.totalorder %s6585_s12, %s7674_s6 }
  0xe1   : > { %p5943_p4 = scmp.lt.u32.totalorder %s5941_s13, %s5936_s15  ;;  %p5945_p9 = scmp.lt.u32.totalorder %s5936_s15, %s6585_s12 }
  0xe2   : > { %p5939_p5 = pnand %p5938_p7, %p5937_p12 }
  0xe3   : > { %p5944_p8 = por %p5943_p4, %p5942_p11 }
  0xe4   : > { %p5940_p3 = pneg %p5939_p5 }
  0xe5   : > { %p5946_p13 = por %p5945_p9, %p5944_p8 }
  0xe7   : > { %p5947_p2 = pnand %p5946_p13, %p5940_p3 }
  0xe9   : > { %5950 = shalt.err (!%p5947_p2)
}
  0xea   : > { %s5951_s8 = scalar_lea.vmem %s6587_s1, 1024  ;;  %s6167_s11 = smov [#allocation3]  }
  0xeb   : > { %p5952_p12 = scmp.ne.s32.totalorder %s6587_s1, %s5951_s8  ;;  %s5956_s28 = sshll.u32 %s6167_s11, 4  ;;  %s5957_s28 = int_to_ptr.vmem [resolvable:$false] %s5956_s28 }
  0xec   : > { %s5958_s14 = scalar_lea.vmem %s5957_s28, 2048  ;;  %p5959_p0 = scmp.lt.s32.totalorder %s6587_s1, %s5957_s28 }
  0xed   : > { %p5954_p5 = pnand %p5952_p12, %p5938_p7  ;;  %p5960_p11 = scmp.lt.s32.totalorder %s5958_s14, %s5951_s8 }
  0xef   : > { %p5955_p10 = pneg %p5954_p5  ;;  %p5961_p4 = por %p5960_p11, %p5959_p0 }
  0xf1   : > { %p5962_p8 = pnand %p5961_p4, %p5955_p10 }
  0xf3   : > { %5965 = shalt.err (!%p5962_p8)
}
  0xf4   : > { %s7677_s15 = sld [smem:[#allocation34_spill]]  ;;  %s7678_s27 = sld [smem:[#allocation24_spill]] }
  0xf5   : > { %s7679_s13 = sld [smem:[#allocation23_spill]]  ;;  %s7680_s22 = sld [smem:[#allocation22_spill]] }
  0xf6   : > { %s7681_s10 = sld [smem:[#allocation33_spill]]  ;;  %p7683_p10 = scmp.lt.s32.totalorder %s6439_s9, 15 }
  0xf7   : > { %5520 = dma.hbm_to_vmem [thread:$0]  (!%p6593_p6), %s6585_s12, 1024, %s6587_s1, %s6597_s3, %s7662_s20, %s7662_s20, %s7661_s4  }
  0xf8   : > { %s7765_s9 = smov (!%p7683_p10, %s6439_s9), 15  ;;  %p7684_p9 = scmp.eq.s32.totalorder %s6158_s16, 0 }
  0xf9   : > { %p7686_p12 = scmp.eq.s32.totalorder %s6326_s17, 0  ;;  %p7689_p6 = scmp.lt.s32.totalorder %s6158_s16, 4 }
  0xfa   : > { %p7682_p0 = scmp.lt.s32.totalorder %s7677_s15, 15  ;;  %s129_s30 = sadd.s32 1, %s7678_s27 }
  0xfb   : > { %p136_p7 = scmp.ne.s32.totalorder %s7678_s27, %s7679_s13  ;;  %p142_p3 = scmp.ne.s32.totalorder %s7679_s13, %s7680_s22 }
  0xfc   : > { %s7763_s15 = smov (!%p7682_p0, %s7677_s15), 15  ;;  %s574_s1 = sand.u32 1, %s7678_s27  }
  0xfd   : > { %s125_s8 = ssub.s32 %s7763_s15, %s7765_s9  ;;  %p6642_p13 = por %p136_p7, %p7684_p9 }
  0xfe   : > { %s126_s11 = sor.u32 %s125_s8, %s7681_s10  ;;  %p6648_p5 = por %p142_p3, %p7686_p12 }
  0xff   : > { %p127_p2 = scmp.eq.s32.totalorder %s126_s11, 0  ;;  %s4509_s3 = sshll.u32 %s7763_s15, 1 }
 0x100   : > { %s7687_s12 = scalar_select %p6648_p5, 1, 0 }
 0x101   : > { %s7767_s27 = smov (!%p127_p2, %s7678_s27), %s129_s30  ;;  %s4507_s9 = sshll.u32 %s574_s1, 3 }
 0x102   : > { %s586_s14 = sadd.s32 %s4509_s3, %s6447_s5  ;;  %s7688_s8 = sld [smem:[#allocation38_spill]] }
 0x103   : > { %s4511_s13 = sshll.u32 %s586_s14, 6  ;;  %s576_s11 = scalar_lea.vmem [#allocation8], %s4507_s9 }
 0x104   : > { %s589_s29 = sshll.u32 %s576_s11, 4  ;;  %p6668_p11 = pnand %p7689_p6, %p6642_p13  ;;  %s6662_s29 = int_to_ptr.vmem [resolvable:$true] %s589_s29 }
 0x106   : > { %p5968_p8 = pneg %p6668_p11 }
 0x108   : > { %s6660_s6 = scalar_lea.hbm %s7688_s8, %s4511_s13  ;;  %s5971_s3 = scalar_lea.hbm %s7688_s8, 4096 }
 0x109   : > { %s5966_s5 = scalar_lea.hbm %s6660_s6, 128  ;;  %p5972_p7 = scmp.lt.u32.totalorder %s6660_s6, %s7688_s8 }
 0x10a   : > { %p5967_p4 = scmp.ne.s32.totalorder %s6660_s6, %s5966_s5  ;;  %p5973_p3 = scmp.lt.u32.totalorder %s5971_s3, %s5966_s5 }
 0x10b   : > { %p5975_p13 = scmp.lt.u32.totalorder %s5966_s5, %s6660_s6 }
 0x10c   : > { %p5969_p0 = pnand %p5968_p8, %p5967_p4  ;;  %p5974_p9 = por %p5973_p3, %p5972_p7 }
 0x10e   : > { %p5970_p10 = pneg %p5969_p0  ;;  %p5976_p2 = por %p5975_p13, %p5974_p9 }
 0x110   : > { %p5977_p12 = pnand %p5976_p2, %p5970_p10 }
 0x112   : > { %5980 = shalt.err (!%p5977_p12)
}
 0x113   : > { %s5981_s14 = scalar_lea.vmem %s6662_s29, 128  ;;  %s6168_s13 = smov [#allocation8]  }
 0x114   : > { %p5982_p6 = scmp.ne.s32.totalorder %s6662_s29, %s5981_s14  ;;  %s5986_s22 = sshll.u32 %s6168_s13, 4  ;;  %s5987_s22 = int_to_ptr.vmem [resolvable:$false] %s5986_s22 }
 0x115   : > { %s5988_s10 = scalar_lea.vmem %s5987_s22, 256  ;;  %p5989_p5 = scmp.lt.s32.totalorder %s6662_s29, %s5987_s22 }
 0x116   : > { %p5984_p4 = pnand %p5982_p6, %p5968_p8  ;;  %p5990_p7 = scmp.lt.s32.totalorder %s5988_s10, %s5981_s14 }
 0x118   : > { %p5985_p0 = pneg %p5984_p4  ;;  %p5991_p3 = por %p5990_p7, %p5989_p5 }
 0x11a   : > { %p5992_p9 = pnand %p5991_p3, %p5985_p0 }
 0x11c   : > { %5995 = shalt.err (!%p5992_p9)
}
 0x11d   : > { %5526 = dma.hbm_to_vmem [thread:$0]  (!%p6668_p11), %s6660_s6, 128, %s6662_s29, %s6469_s0, %s7662_s20, %s7662_s20, %s7661_s4  }
 0x11e   : > { %s7691_s11 = sld [smem:[#allocation30_spill]] }
 0x124   : > { %p7692_p8 = scmp.ne.s32.totalorder %s7691_s11, 0 }
 0x125   : > { %s6704_s5 = sand.u32 (!%p7692_p8), 1, %s6134_s25  }
 0x126   : > { %601 = sbr.rel (%p7692_p8) target bundleno = 1284 (0x504), region = 80  ;;  %s4513_s30 = sshll.u32 (!%p7692_p8), %s6704_s5, 6 }
 0x127   : > { %s604_s1 = scalar_lea.sflag (!%p7692_p8), [#allocation4], %s6704_s5  ;;  %s6710_s15 = scalar_lea.vmem (!%p7692_p8), [#allocation3], %s4513_s30 }
 0x12d   : > { %6081 = dma.done.wait (%p6567_p1), %s604_s1, 1024  }
 0x12e   : > { %6083 = vsyncadd (%p6567_p1), %s604_s1, 4294966272  ;;  %s7693_s6 = sld [smem:[#allocation25_spill]]  ;;  %s7694_s29 = sld [smem:[#allocation35_spill]] }
 0x12f   : > { %s612_s0 = sand.u32 1, %s6326_s17  }
 0x130   : > { %s613_s3 = scalar_lea.sflag [#allocation7], %s612_s0 }
 0x134   : > { %s614_s4 = sand.u32 1, %s7693_s6   ;;  %p7695_p5 = scmp.ne.s32.totalorder %s7694_s29, 0 }
 0x135   : > { %s6718_s20 = sshll.u32 %s614_s4, 3 }
 0x136   : > { %s616_s28 = scalar_lea.vmem [#allocation6], %s6718_s20 }
 0x137   : > { %6085 = dma.done.wait (%p7695_p5), %s613_s3, 128  }
 0x138   : > { %6087 = vsyncadd (%p7695_p5), %s613_s3, 4294967168  ;;  %s7696_s9 = sld [smem:[#allocation23_spill]]  ;;  %p7697_p1 = scmp.ne.s32.totalorder %s7687_s12, 0 }
 0x13e   : > { %s623_s14 = sand.u32 1, %s7696_s9  }
 0x13f   : > { %s6726_s18 = sshll.u32 %s623_s14, 3 }
 0x140   : > { %s625_s13 = scalar_lea.vmem [#allocation8], %s6726_s18 }
 0x141   : > { %6089 = dma.done.wait (%p7697_p1), %s613_s3, 128  }
 0x142   : > { %6091 = vsyncadd (%p7697_p1), %s613_s3, 4294967168  ;;  %p7698_p11 = scmp.eq.s32.totalorder %s6326_s17, 0 }
 0x144   : > { %6093 = dma.done.wait (%p7698_p11), [#allocation10], 10240   ;;  %p7699_p10 = pmov %p7698_p11 }
 0x146   : > { %6095 = vsyncadd (%p7699_p10), [#allocation10], 4294957056  ;;  %p7700_p13 = pmov %p7699_p10 }
 0x147   : > { %p7701_p2 = pmov %p7699_p10 }
 0x148   : > { %6097 = dma.done.wait (%p7700_p13), [#allocation13], 2048  }
 0x149   : > { %6099 = vsyncadd (%p7701_p2), [#allocation13], 4294965248  ;;  %v6169_v0 = vmov 0.0   ;;  %vm6170_vm0 = vmmov 0   ;;  %v5664_v1 = vld [vmem:[#allocation9] sm:$0xff]   ;;  %v5666_v3 = vld [vmem:[#allocation9 + $0x8] sm:$0xff]  }
 0x14a   : > { %4992 = vmatprep.subr.bf16.mxu1 %v6169_v0  ;;  %5008 = vmatprep.mubr.msk.bf16.mxu1 %vm6170_vm0, %v6169_v0  ;;  %v5665_v2 = vld [vmem:[#allocation9] sm:$0xff]   ;;  %v5667_v4 = vld [vmem:[#allocation9 + $0x8] sm:$0xff]   ;;  %v5668_v5 = vld [vmem:[#allocation9 + $0x10] sm:$0xff]   ;;  %s7702_s17 = sld [smem:[#allocation26_spill]]  ;;  %v6171_v53 = vmov 0   ;;  %s7703_s10 = sld [smem:[#allocation40_spill]] }
 0x14b   : > { %4960 = vmatprep.subr.bf16.mxu0 %v5664_v1  ;;  %4993 = vmatpush3.bf16.msra.mxu1 %v5665_v2  ;;  %v5669_v6 = vld [vmem:[#allocation9 + $0x10] sm:$0xff]   ;;  %v5670_v7 = vld [vmem:[#allocation9 + $0x18] sm:$0xff]   ;;  %v5672_v9 = vld [vmem:[#allocation9 + $0x20] sm:$0xff]   ;;  %998 = vst [vmem:[#allocation2] sm:$0xf] %v6171_v53  ;;  %s7704_s6 = sld [smem:[#allocation41_spill]] }
 0x14c   : > { %4961 = vmatpush3.bf16.msra.mxu0 %v5664_v1  ;;  %4994 = vmatprep.subr.bf16.mxu1 %v6169_v0  ;;  %v5671_v8 = vld [vmem:[#allocation9 + $0x18] sm:$0xff]   ;;  %v5673_v10 = vld [vmem:[#allocation9 + $0x20] sm:$0xff]   ;;  %v5674_v11 = vld [vmem:[#allocation9 + $0x28] sm:$0xff]   ;;  %999 = vst [vmem:[#allocation2 + $0x50] sm:$0xf0] %v6171_v53  ;;  %vm1146_vm1 = vcmask 1043456  }
 0x14d   : > { %4962 = vmatprep.subr.bf16.mxu0 %v5666_v3  ;;  %v5680_v12 = vld [vmem:[%s6710_s15] sm:$0xff]   ;;  %v5675_v13 = vld [vmem:[#allocation9 + $0x28] sm:$0xff]   ;;  %v5676_v14 = vld [vmem:[#allocation9 + $0x30] sm:$0xff]   ;;  %vm1948_vm2 = vsmask.f32 4352  ;;  %s7709_s3 = sld [smem:[#allocation43_spill]] }
 0x14e   : > { %4976 = vmatprep.mubr.bf16.mxu0 %v5680_v12  ;;  %v5677_v15 = vld [vmem:[#allocation9 + $0x30] sm:$0xff]   ;;  %v5678_v16 = vld [vmem:[#allocation9 + $0x38] sm:$0xff]   ;;  %v5681_v18 = vld [vmem:[%s616_s28] sm:$0xff]   ;;  %vm2660_vm3 = vsmask.f32 3328  ;;  %s7710_s14 = sld [smem:[#allocation44_spill]] }
 0x14f   : > { %4995 = vmatpush3.bf16.msra.mxu1 %v5667_v4  ;;  %v5679_v17 = vld [vmem:[#allocation9 + $0x38] sm:$0xff]   ;;  %v5682_v19 = vld [vmem:[%s6710_s15 + $0x8] sm:$0xff]   ;;  %v5683_v20 = vld [vmem:[#allocation9] sm:$0xff]   ;;  %s7726_s4 = sld [smem:[#allocation50_spill]]  ;;  %s7431_s20 = scalar_lea.vmem [#allocation15], %s4513_s30 }
 0x150   : > { %4963 = vmatpush3.bf16.msra.mxu0 %v5666_v3  ;;  %4996 = vmatprep.subr.bf16.mxu1 %v6169_v0  ;;  %v5685_v21 = vld [vmem:[%s6710_s15 + $0x10] sm:$0xff]   ;;  %v5684_v22 = vld [vmem:[#allocation9 + $0x8] sm:$0xff]   ;;  %v5686_v23 = vld [vmem:[%s6710_s15 + $0x18] sm:$0xff]   ;;  %p1000_p12 = scmp.eq.s32.totalorder %s7702_s17, 0  ;;  %p1180_p6 = scmp.eq.s32.totalorder %s7702_s17, 1 }
 0x151   : > { %4964 = vmatprep.subr.bf16.mxu0 %v5668_v5  ;;  %v5687_v24 = vld [vmem:[#allocation9 + $0x10] sm:$0xff]   ;;  %v5689_v25 = vld [vmem:[%s6710_s15 + $0x20] sm:$0xff]   ;;  %v5688_v26 = vld [vmem:[#allocation9 + $0x18] sm:$0xff]   ;;  %s7727_s30 = sld [smem:[#allocation27_spill]]  ;;  %s4306_s9 = sshll.u32 %s7431_s20, 4  ;;  %s7485_s9 = int_to_ptr.vmem [resolvable:$true] %s4306_s9 }
 0x152   : > { %v5690_v27 = vld [vmem:[%s6710_s15 + $0x28] sm:$0xff]   ;;  %v5691_v28 = vld [vmem:[#allocation9 + $0x20] sm:$0xff]   ;;  %v5693_v29 = vld [vmem:[%s6710_s15 + $0x30] sm:$0xff]   ;;  %s1120_s29 = scalar_select %p1000_p12, 0.0, 1.0 }
 0x153   : > { %4997 = vmatpush3.bf16.msra.mxu1 %v5669_v6  ;;  %v5692_v30 = vld [vmem:[#allocation9 + $0x28] sm:$0xff]   ;;  %v5694_v31 = vld [vmem:[%s6710_s15 + $0x38] sm:$0xff]   ;;  %v5695_v32 = vld [vmem:[#allocation9 + $0x30] sm:$0xff]   ;;  %s6814_s0 = scalar_select %p1180_p6, 0.0, 1.0 }
 0x154   : > { %4965 = vmatpush3.bf16.msra.mxu0 %v5668_v5  ;;  %4998 = vmatprep.subr.bf16.mxu1 %v6169_v0  ;;  %v5696_v33 = vld [vmem:[#allocation9 + $0x38] sm:$0xff]   ;;  %v5698_v35 = vld [vmem:[#allocation11 + $0x100] sm:$0xff]   ;;  %v5699_v36 = vld [vmem:[#allocation11 + $0x108] sm:$0xff]   ;;  %s4291_s22 = scalar_lea.sflag [#allocation5], %s6704_s5  ;;  %p7729_p0 = scmp.ne.s32.totalorder %s7671_s2, 0 }
 0x155   : > { %4966 = vmatprep.subr.bf16.mxu0 %v5670_v7  ;;  %v5697_v34 = vld [vmem:[%s625_s13] sm:$0xff]   ;;  %v5700_v37 = vld [vmem:[#allocation11 + $0xc0] sm:$0xff]   ;;  %v5702_v39 = vld [vmem:[#allocation11 + $0xc8] sm:$0xff]   ;;  %s7723_s13 = sld [smem:[#allocation46_spill]]  ;;  %s6172_s11 = smov [#allocation15]  }
 0x156   : > { %v5701_v38 = vld [vmem:[#allocation11 + $0x110] sm:$0xff]   ;;  %v5703_v40 = vld [vmem:[#allocation11 + $0x118] sm:$0xff]   ;;  %v5705_v42 = vld [vmem:[#allocation11 + $0x120] sm:$0xff]   ;;  %s6000_s1 = sshll.u32 %s6172_s11, 4  ;;  %s6001_s1 = int_to_ptr.vmem [resolvable:$false] %s6000_s1 }
 0x157   : > { %4999 = vmatpush3.bf16.msra.mxu1 %v5671_v8  ;;  %v5704_v41 = vld [vmem:[#allocation11 + $0xd0] sm:$0xff]   ;;  %v5706_v43 = vld [vmem:[#allocation11 + $0xd8] sm:$0xff]   ;;  %v5707_v44 = vld [vmem:[#allocation11 + $0x128] sm:$0xff]   ;;  %s4677_s28 = sshll.u32 %s7727_s30, 5  ;;  %p6003_p9 = scmp.lt.s32.totalorder %s7485_s9, %s6001_s1 }
 0x158   : > { %4967 = vmatpush3.bf16.msra.mxu0 %v5670_v7  ;;  %5000 = vmatprep.subr.bf16.mxu1 %v6169_v0  ;;  %v5708_v45 = vld [vmem:[#allocation11 + $0xe0] sm:$0xff]   ;;  %v5709_v46 = vld [vmem:[#allocation11 + $0x130] sm:$0xff]   ;;  %v5710_v47 = vld [vmem:[#allocation11 + $0xe8] sm:$0xff]   ;;  %v1121_v7 = vstv %s1120_s29 }
 0x159   : > { %4968 = vmatprep.subr.bf16.mxu0 %v5672_v9  ;;  %v5711_v48 = vld [vmem:[#allocation11 + $0x138] sm:$0xff]   ;;  %v5712_v49 = vld [vmem:[#allocation11 + $0xf0] sm:$0xff]   ;;  %v6773_v50 = vld [vmem:[#allocation11 + $0x40] sm:$0xff]  }
 0x15a   : > { %v5714_v51 = vld [vmem:[#allocation11 + $0xf8] sm:$0xff]   ;;  %v6776_v52 = vld [vmem:[#allocation11] sm:$0xff]   ;;  %v6783_v54 = vld [vmem:[%s7703_s10] ss:$0 sm:$0xff]  ;;  %s7724_s10 = sld [smem:[#allocation49_spill]] }
 0x15b   : > { %5001 = vmatpush3.bf16.msra.mxu1 %v5673_v10  ;;  %v6788_v55 = vld [vmem:[%s7704_s6] ss:$0 sm:$0xff]  ;;  %s7725_s6 = sld [smem:[#allocation47_spill]] }
 0x15c   : > { %4969 = vmatpush3.bf16.msra.mxu0 %v5672_v9  ;;  %5002 = vmatprep.subr.bf16.mxu1 %v6169_v0 }
 0x15d   : > { %4970 = vmatprep.subr.bf16.mxu0 %v5674_v11 }
 0x15f   : > { %5003 = vmatpush3.bf16.msra.mxu1 %v5675_v13 }
 0x160   : > { %4971 = vmatpush3.bf16.msra.mxu0 %v5674_v11  ;;  %5004 = vmatprep.subr.bf16.mxu1 %v6169_v0 }
 0x161   : > { %4972 = vmatprep.subr.bf16.mxu0 %v5676_v14 }
 0x163   : > { %5005 = vmatpush3.bf16.msra.mxu1 %v5677_v15 }
 0x164   : > { %4973 = vmatpush3.bf16.msra.mxu0 %v5676_v14  ;;  %5006 = vmatprep.subr.bf16.mxu1 %v6169_v0 }
 0x165   : > { %4974 = vmatprep.subr.bf16.mxu0 %v5678_v16 }
 0x167   : > { %5007 = vmatpush3.bf16.msra.mxu1 %v5679_v17 }
 0x168   : > { %4975 = vmatpush3.bf16.msra.mxu0 %v5678_v16  ;;  %5032 = vmatprep.subr.bf16.mxu1 %v5698_v35 }
 0x169   : > { %5012 = vmatprep.subr.bf16.mxu0 %v6169_v0 }
 0x16a   : > { %5009 = vmatmul.mubr.bf16.vlgmr.msra.gmra.mrb[0].mxu1 %v5681_v18 }
 0x16b   : > { %4977 = vmatmul.mubr.bf16.vlgmr.msra.gmra.mrb[0].mxu0 %v5682_v19  ;;  %5033 = vmatpush3.bf16.msra.mxu1 %v5698_v35 }
 0x16c   : > { %5013 = vmatpush3.bf16.msra.mxu0 %v5683_v20  ;;  %4980 = vmatprep.mubr.bf16.mxu0 %v5685_v21 }
 0x16d   : > { %5014 = vmatprep.subr.bf16.mxu0 %v6169_v0  ;;  %5034 = vmatprep.subr.bf16.mxu1 %v5699_v36 }
 0x16f   : > { %5035 = vmatpush3.bf16.msra.mxu1 %v5699_v36 }
 0x170   : > { %5015 = vmatpush3.bf16.msra.mxu0 %v5684_v22  ;;  %5036 = vmatprep.subr.bf16.mxu1 %v5701_v38 }
 0x171   : > { %5016 = vmatprep.subr.bf16.mxu0 %v6169_v0 }
 0x173   : > { %4981 = vmatmul.mubr.bf16.gmra.mrb[4].mxu0 %v5686_v23  ;;  %5037 = vmatpush3.bf16.msra.mxu1 %v5701_v38 }
 0x174   : > { %5017 = vmatpush3.bf16.msra.mxu0 %v5687_v24  ;;  %4984 = vmatprep.mubr.bf16.mxu0 %v5689_v25 }
 0x175   : > { %5018 = vmatprep.subr.bf16.mxu0 %v6169_v0  ;;  %5038 = vmatprep.subr.bf16.mxu1 %v5703_v40 }
 0x177   : > { %5039 = vmatpush3.bf16.msra.mxu1 %v5703_v40 }
 0x178   : > { %5019 = vmatpush3.bf16.msra.mxu0 %v5688_v26  ;;  %5040 = vmatprep.subr.bf16.mxu1 %v5705_v42 }
 0x179   : > { %5020 = vmatprep.subr.bf16.mxu0 %v6169_v0 }
 0x17b   : > { %4985 = vmatmul.mubr.bf16.gmra.mrb[8].mxu0 %v5690_v27  ;;  %5041 = vmatpush3.bf16.msra.mxu1 %v5705_v42 }
 0x17c   : > { %5021 = vmatpush3.bf16.msra.mxu0 %v5691_v28  ;;  %4988 = vmatprep.mubr.bf16.mxu0 %v5693_v29 }
 0x17d   : > { %5022 = vmatprep.subr.bf16.mxu0 %v6169_v0  ;;  %5042 = vmatprep.subr.bf16.mxu1 %v5707_v44 }
 0x17f   : > { %5043 = vmatpush3.bf16.msra.mxu1 %v5707_v44 }
 0x180   : > { %5023 = vmatpush3.bf16.msra.mxu0 %v5692_v30  ;;  %5044 = vmatprep.subr.bf16.mxu1 %v5709_v46 }
 0x181   : > { %5024 = vmatprep.subr.bf16.mxu0 %v6169_v0 }
 0x183   : > { %4989 = vmatmul.mubr.bf16.gmra.mrb[12].mxu0 %v5694_v31  ;;  %5045 = vmatpush3.bf16.msra.mxu1 %v5709_v46 }
 0x184   : > { %5025 = vmatpush3.bf16.msra.mxu0 %v5695_v32  ;;  %5028 = vmatprep.mubr.msk.bf16.mxu0 %vm6170_vm0, %v6169_v0 }
 0x185   : > { %5026 = vmatprep.subr.bf16.mxu0 %v6169_v0  ;;  %5046 = vmatprep.subr.bf16.mxu1 %v5711_v48 }
 0x187   : > { %5047 = vmatpush3.bf16.msra.mxu1 %v5711_v48 }
 0x188   : > { %5027 = vmatpush3.bf16.msra.mxu0 %v5696_v33  ;;  %5064 = vmatprep.subr.bf16.mxu1 %v6773_v50 }
 0x189   : > { %5128 = vmatprep.subr.bf16.mxu0 %v5700_v37 }
 0x18b   : > { %5029 = vmatmul.mubr.bf16.vlgmr.msra.gmra.mrb[16].mxu0 %v5697_v34 }
 0x18c   : > { %5129 = vmatpush3.bf16.msra.mxu0 %v5700_v37 }
 0x18d   : > { %5130 = vmatprep.subr.bf16.mxu0 %v5702_v39 }
 0x190   : > { %5131 = vmatpush3.bf16.msra.mxu0 %v5702_v39 }
 0x191   : > { %5132 = vmatprep.subr.bf16.mxu0 %v5704_v41 }
 0x194   : > { %5133 = vmatpush3.bf16.msra.mxu0 %v5704_v41 }
 0x195   : > { %5134 = vmatprep.subr.bf16.mxu0 %v5706_v43 }
 0x198   : > { %5135 = vmatpush3.bf16.msra.mxu0 %v5706_v43 }
 0x199   : > { %5136 = vmatprep.subr.bf16.mxu0 %v5708_v45 }
 0x19c   : > { %5137 = vmatpush3.bf16.msra.mxu0 %v5708_v45 }
 0x19d   : > { %5138 = vmatprep.subr.bf16.mxu0 %v5710_v47 }
 0x1a0   : > { %5139 = vmatpush3.bf16.msra.mxu0 %v5710_v47 }
 0x1a1   : > { %5140 = vmatprep.subr.bf16.mxu0 %v5712_v49 }
 0x1a4   : > { %5141 = vmatpush3.bf16.msra.mxu0 %v5712_v49 }
 0x1a5   : > { %5142 = vmatprep.subr.bf16.mxu0 %v5714_v51 }
 0x1a8   : > { %5143 = vmatpush3.bf16.msra.mxu0 %v5714_v51 }
 0x1a9   : > { %5160 = vmatprep.subr.bf16.mxu0 %v6776_v52 }
 0x23d   : > { %v1107_v56 = vpop.f32.mrb[0].mxu1 }
 0x23e   : > { %v4978_v57 = vpop.f32.mrb[0].mxu0  ;;  %v1114_v58 = vmul.f32 %v6783_v54, %v1107_v56  ;;  %v5010_v60 = vpop.f32.mrb[1].mxu1 }
 0x23f   : > { %v946_v59 = vmul.f32 %v4978_v57, %v6783_v54  ;;  %v875_v61 = vpop.f32.mrb[1].mxu0  ;;  %v1110_v63 = vpop.f32.mrb[2].mxu1 }
 0x240   : > { %v944_v62 = vmul.f32 %v6783_v54, %v875_v61  ;;  %v4979_v0 = vpop.f32.mrb[2].mxu0  ;;  %v1116_v1 = vadd.f32 %v6788_v55, %v1114_v58  ;;  %v1115_v3 = vmul.f32 %v6783_v54, %v1110_v63  ;;  %v5011_v6 = vpop.f32.mrb[3].mxu1 }
 0x241   : > { %v968_v2 = vadd.f32 %v6788_v55, %v946_v59  ;;  %v947_v4 = vmul.f32 %v4979_v0, %v6783_v54  ;;  %v878_v5 = vpop.f32.mrb[3].mxu0 }
 0x242   : > { %v966_v8 = vadd.f32 %v6788_v55, %v944_v62  ;;  %v945_v9 = vmul.f32 %v6783_v54, %v878_v5  ;;  %v1118_v10 = vmax.f32 %v1116_v1, 0.0  ;;  %v1117_v11 = vadd.f32 %v6788_v55, %v1115_v3 }
 0x243   : > { %v969_v12 = vadd.f32 %v6788_v55, %v947_v4  ;;  %v984_v15 = vmax.f32 %v968_v2, 0.0  ;;  %v1301_v1 = vstv %s6814_s0 }
 0x244   : > { %v967_v13 = vadd.f32 %v6788_v55, %v945_v9  ;;  %v1122_v14 = vmul.f32 %v1121_v7, %v1118_v10  ;;  %v1119_v16 = vmax.f32 %v1117_v11, 0.0  ;;  %v982_v18 = vmax.f32 %v966_v8, 0.0 }
 0x245   : > { %v985_v17 = vmax.f32 %v969_v12, 0.0 }
 0x246   : > { %v983_v19 = vmax.f32 %v967_v13, 0.0  ;;  %v4982_v20 = vpop.f32.mrb[4].mxu0  ;;  %v1123_v21 = vmul.f32 %v1121_v7, %v1119_v16 }
 0x247   : > { %v1131_v22 = vpack.c.bf16 %v985_v17, %v984_v15  ;;  %v950_v23 = vmul.f32 %v4982_v20, %v6783_v54  ;;  %v891_v24 = vpop.f32.mrb[5].mxu0 }
 0x248   : > { %v1130_v25 = vpack.c.bf16 %v983_v19, %v982_v18  ;;  %v948_v26 = vmul.f32 %v6783_v54, %v891_v24  ;;  %v4983_v27 = vpop.f32.mrb[6].mxu0  ;;  %v1124_v28 = vpack.c.bf16 %v1123_v21, %v1122_v14 }
 0x249   : > { %v1148_v29 = vrot.slane %v1131_v22, 4  ;;  %v972_v30 = vadd.f32 %v6788_v55, %v950_v23  ;;  %v951_v31 = vmul.f32 %v4983_v27, %v6783_v54  ;;  %v894_v32 = vpop.f32.mrb[7].mxu0 }
 0x24a   : > { %v1147_v33 = vrot.slane %v1130_v25, 4  ;;  %v970_v34 = vadd.f32 %v6788_v55, %v948_v26  ;;  %v949_v35 = vmul.f32 %v6783_v54, %v894_v32  ;;  %v1126_v36 = vrot.slane %v1124_v28, 4 }
 0x24b   : > { %v973_v37 = vadd.f32 %v6788_v55, %v951_v31  ;;  %v988_v40 = vmax.f32 %v972_v30, 0.0  ;;  %v5715_v30 = vld [vmem:[#allocation11 + $0x48] sm:$0xff]  }
 0x24c   : > { %v1149_v38 = vsel %vm1146_vm1, %v1147_v33, %v1148_v29  ;;  %1171 = vst [vmem:[#allocation2 + $0x8] sm:$0xf0] %v1147_v33  ;;  %v971_v39 = vadd.f32 %v6788_v55, %v949_v35  ;;  %1128 = vst [vmem:[#allocation2 + $0x8] ss:$-4 sps:$4 sm:$0xff] %v1126_v36   ;;  %v986_v44 = vmax.f32 %v970_v34, 0.0 }
 0x24d   : > { %1172 = vst [vmem:[#allocation2 + $0x10] sm:$0xff] %v1149_v38  ;;  %v989_v41 = vmax.f32 %v973_v37, 0.0  ;;  %v1958_v42 = vshrl.u32 %v1149_v38, 16  ;;  %v1961_v43 = vshll.u32 %v1149_v38, 16  ;;  %v6831_v9 = vrot.slane %v1149_v38, 4 }
 0x24e   : > { %v987_v45 = vmax.f32 %v971_v39, 0.0  ;;  %v4986_v46 = vpop.f32.mrb[8].mxu0 }
 0x24f   : > { %v6816_v47 = vpack.c.bf16 %v989_v41, %v988_v40  ;;  %v954_v48 = vmul.f32 %v4986_v46, %v6783_v54  ;;  %v907_v49 = vpop.f32.mrb[9].mxu0  ;;  %v1960_v51 = vrot.slane %v1958_v42, 3  ;;  %v1963_v53 = vrot.slane %v1961_v43, 4 }
 0x250   : > { %v1132_v56 = vpack.c.bf16 %v987_v45, %v986_v44  ;;  %v952_v57 = vmul.f32 %v6783_v54, %v907_v49  ;;  %v4987_v58 = vpop.f32.mrb[10].mxu0  ;;  %v2669_v59 = vrot.slane %v1958_v42, 4  ;;  %v2670_v60 = vrot.slane %v1961_v43, 5  ;;  %v5717_v49 = vld [vmem:[#allocation11 + $0x50] sm:$0xff]  }
 0x251   : > { %v1152_v61 = vrot.slane %v6816_v47, 4  ;;  %v976_v62 = vadd.f32 %v6788_v55, %v954_v48  ;;  %v955_v63 = vmul.f32 %v4987_v58, %v6783_v54  ;;  %v910_v0 = vpop.f32.mrb[11].mxu0  ;;  %v6833_v10 = vor.u32 %v1963_v53, %v1960_v51 }
 0x252   : > { %v1150_v2 = vrot.slane %v1132_v56, 4  ;;  %v974_v3 = vadd.f32 %v6788_v55, %v952_v57  ;;  %v953_v4 = vmul.f32 %v6783_v54, %v910_v0  ;;  %v6826_v5 = vor.u32 %v2670_v60, %v2669_v59 }
 0x253   : > { %v992_v6 = vmax.f32 %v976_v62, 0.0  ;;  %v977_v7 = vadd.f32 %v6788_v55, %v955_v63  ;;  %v6829_v8 = vld [vmem:[#allocation2 + $0x8] sm:$0xf0] }
 0x254   : > { %v6836_v11 = vsel %vm1146_vm1, %v1148_v29, %v1150_v2  ;;  %v6839_v12 = vsel %vm1146_vm1, %v1150_v2, %v1152_v61  ;;  %v990_v13 = vmax.f32 %v974_v3, 0.0  ;;  %v975_v14 = vadd.f32 %v6788_v55, %v953_v4  ;;  %v1930_v15 = vld [vmem:[#allocation2 + $0x8] sm:$0xf8] }
 0x255   : > { %v993_v16 = vmax.f32 %v977_v7, 0.0  ;;  %v1365_v17 = vrot.slane %v6829_v8, 4  ;;  %v1950_v18 = vshrl.u32 %v1930_v15, 16  ;;  %v1953_v19 = vshll.u32 %v1930_v15, 16 }
 0x256   : > { %v991_v20 = vmax.f32 %v975_v14, 0.0  ;;  %v4990_v21 = vpop.f32.mrb[12].mxu0  ;;  %v6844_v22 = vrot.slane %v6836_v11, 4  ;;  %v1370_v23 = vrot.slane %v6839_v12, 4  ;;  %v1967_v24 = vshrl.u32 %v6836_v11, 16 }
 0x257   : > { %v6848_v25 = vpack.c.bf16 %v993_v16, %v992_v6  ;;  %v958_v26 = vmul.f32 %v4990_v21, %v6783_v54  ;;  %v923_v27 = vpop.f32.mrb[13].mxu0  ;;  %v1367_v28 = vsel %vm1146_vm1, %v1365_v17, %v6831_v9  ;;  %v1952_v29 = vrot.slane %v1950_v18, 3  ;;  %v5718_v18 = vld [vmem:[#allocation11 + $0x8] sm:$0xff]  }
 0x258   : > { %v1134_v31 = vpack.c.bf16 %v991_v20, %v990_v13  ;;  %v956_v32 = vmul.f32 %v6783_v54, %v923_v27  ;;  %v4991_v33 = vpop.f32.mrb[14].mxu0  ;;  %5048 = vmatprep.mubr.bf16.mxu1 %v1367_v28  ;;  %v1955_v34 = vrot.slane %v1953_v19, 4  ;;  %v6857_v35 = vsel %vm1146_vm1, %v6831_v9, %v6844_v22  ;;  %v5719_v20 = vld [vmem:[#allocation11 + $0x58] sm:$0xff]  }
 0x259   : > { %v1156_v36 = vrot.slane %v6848_v25, 4  ;;  %v980_v37 = vadd.f32 %v6788_v55, %v958_v26  ;;  %v959_v38 = vmul.f32 %v4991_v33, %v6783_v54  ;;  %v926_v39 = vpop.f32.mrb[15].mxu0  ;;  %5049 = vmatmul.mubr.bf16.vlgmr.msra.gmra.mrb[4].mxu1 %v6857_v35  ;;  %v6865_v40 = vsel %vm1146_vm1, %v6844_v22, %v1370_v23 }
 0x25a   : > { %v1154_v41 = vrot.slane %v1134_v31, 4  ;;  %v978_v42 = vadd.f32 %v6788_v55, %v956_v32  ;;  %v957_v43 = vmul.f32 %v6783_v54, %v926_v39  ;;  %v1956_v44 = vor.u32 %v1955_v34, %v1952_v29  ;;  %5065 = vmatpush3.bf16.msra.mxu1 %v6773_v50  ;;  %5052 = vmatprep.mubr.bf16.mxu1 %v6865_v40 }
 0x25b   : > { %v996_v45 = vmax.f32 %v980_v37, 0.0  ;;  %v981_v46 = vadd.f32 %v6788_v55, %v959_v38  ;;  %5066 = vmatprep.subr.bf16.mxu1 %v5715_v30  ;;  %v1969_v47 = vrot.slane %v1967_v24, 3  ;;  %v1970_v48 = vshll.u32 %v6836_v11, 16  ;;  %v5721_v38 = vld [vmem:[#allocation11 + $0x60] sm:$0xff]  }
 0x25c   : > { %v6876_v51 = vsel %vm1146_vm1, %v1152_v61, %v1154_v41  ;;  %v6881_v53 = vsel %vm1146_vm1, %v1154_v41, %v1156_v36  ;;  %v994_v50 = vmax.f32 %v978_v42, 0.0  ;;  %v979_v56 = vadd.f32 %v6788_v55, %v957_v43  ;;  %v5720_v42 = vld [vmem:[#allocation11 + $0x10] sm:$0xff]  }
 0x25d   : > { %v997_v57 = vmax.f32 %v981_v46, 0.0  ;;  %v1965_v58 = vsel %vm1948_vm2, %v1956_v44, %v6833_v10  ;;  %v1972_v59 = vrot.slane %v1970_v48, 4  ;;  %v1976_v60 = vshrl.u32 %v6839_v12, 16 }
 0x25e   : > { %v995_v62 = vmax.f32 %v979_v56, 0.0  ;;  %5144 = vmatprep.mubr.bf16.mxu0 %v1965_v58  ;;  %v1287_v61 = vpop.f32.mrb[16].mxu0  ;;  %5067 = vmatpush3.bf16.msra.mxu1 %v5715_v30  ;;  %v1979_v63 = vshll.u32 %v6839_v12, 16  ;;  %v1372_v0 = vrot.slane %v6876_v51, 4  ;;  %v1374_v2 = vrot.slane %v6881_v53, 4 }
 0x25f   : > { %v1137_v3 = vpack.c.bf16 %v997_v57, %v996_v45  ;;  %v1294_v4 = vmul.f32 %v6783_v54, %v1287_v61  ;;  %v5030_v6 = vpop.f32.mrb[17].mxu0  ;;  %v6893_v7 = vor.u32 %v1972_v59, %v1969_v47  ;;  %v1978_v13 = vrot.slane %v1976_v60, 3  ;;  %5068 = vmatprep.subr.bf16.mxu1 %v5717_v49  ;;  %v5722_v61 = vld [vmem:[#allocation11 + $0x18] sm:$0xff]  }
 0x260   : > { %v1136_v14 = vpack.c.bf16 %v995_v62, %v994_v50  ;;  %v1290_v15 = vpop.f32.mrb[18].mxu0  ;;  %v1981_v16 = vrot.slane %v1979_v63, 4  ;;  %v6900_v17 = vsel %vm1146_vm1, %v1370_v23, %v1372_v0  ;;  %v6903_v19 = vsel %vm1146_vm1, %v1372_v0, %v1374_v2  ;;  %v5723_v6 = vld [vmem:[#allocation11 + $0x68] sm:$0xff]  }
 0x261   : > { %v1160_v21 = vrot.slane %v1137_v3, 4  ;;  %v1296_v26 = vadd.f32 %v6788_v55, %v1294_v4  ;;  %v1295_v27 = vmul.f32 %v6783_v54, %v1290_v15  ;;  %v6910_v28 = vsel %vm1948_vm2, %v6833_v10, %v6893_v7  ;;  %5053 = vmatmul.mubr.bf16.gmra.mrb[8].mxu1 %v6900_v17  ;;  %v5031_v29 = vpop.f32.mrb[19].mxu0 }
 0x262   : > { %v1158_v23 = vrot.slane %v1136_v14, 4  ;;  %5145 = vmatmul.mubr.bf16.vlgmr.msra.gmra.mrb[20].mxu0 %v6910_v28  ;;  %v1982_v30 = vor.u32 %v1981_v16, %v1978_v13  ;;  %5069 = vmatpush3.bf16.msra.mxu1 %v5717_v49  ;;  %v1985_v31 = vshrl.u32 %v6876_v51, 16  ;;  %v1988_v32 = vshll.u32 %v6876_v51, 16  ;;  %v1913_v13 = vld [vmem:[#allocation2] sm:$0xf8] }
 0x263   : > { %1179 = vst [vmem:[#allocation2 + $0x48] sm:$0xf] %v1160_v21  ;;  %v1298_v54 = vmax.f32 %v1296_v26, 0.0  ;;  %v1297_v33 = vadd.f32 %v6788_v55, %v1295_v27  ;;  %5161 = vmatpush3.bf16.msra.mxu0 %v6776_v52  ;;  %5056 = vmatprep.mubr.bf16.mxu1 %v6903_v19  ;;  %v1994_v34 = vshrl.u32 %v6881_v53, 16  ;;  %v1997_v37 = vshll.u32 %v6881_v53, 16 }
 0x264   : > { %v6924_v39 = vsel %vm1146_vm1, %v1156_v36, %v1158_v23  ;;  %v6927_v41 = vsel %vm1146_vm1, %v1158_v23, %v1160_v21  ;;  %v6931_v55 = vsel %vm1948_vm2, %v6893_v7, %v1982_v30  ;;  %5162 = vmatprep.subr.bf16.mxu0 %v5718_v18  ;;  %5070 = vmatprep.subr.bf16.mxu1 %v5719_v20  ;;  %v1987_v52 = vrot.slane %v1985_v31, 3  ;;  %v6983_v29 = vld [vmem:[#allocation2] sm:$0xf0]  ;;  %v6985_v23 = vld [vmem:[#allocation2 + $0x8] sm:$0xff] }
 0x265   : > { %1178 = vst [vmem:[#allocation2 + $0x40] sm:$0xff] %v6927_v41  ;;  %v1302_v25 = vmul.f32 %v1301_v1, %v1298_v54  ;;  %v1299_v36 = vmax.f32 %v1297_v33, 0.0  ;;  %5148 = vmatprep.mubr.bf16.mxu0 %v6931_v55  ;;  %v1990_v43 = vrot.slane %v1988_v32, 4  ;;  %v1996_v44 = vrot.slane %v1994_v34, 3  ;;  %v5724_v54 = vld [vmem:[#allocation11 + $0x20] sm:$0xff]  }
 0x266   : > { %5071 = vmatpush3.bf16.msra.mxu1 %v5719_v20  ;;  %v1999_v45 = vrot.slane %v1997_v37, 4  ;;  %v6946_v46 = vrot.slane %v6924_v39, 4  ;;  %v6949_v47 = vrot.slane %v6927_v41, 4  ;;  %v2003_v49 = vshrl.u32 %v6924_v39, 16 }
 0x267   : > { %v1303_v50 = vmul.f32 %v1301_v1, %v1299_v36  ;;  %5163 = vmatpush3.bf16.msra.mxu0 %v5718_v18  ;;  %v1991_v56 = vor.u32 %v1990_v43, %v1987_v52  ;;  %5072 = vmatprep.subr.bf16.mxu1 %v5721_v38  ;;  %v2006_v57 = vshll.u32 %v6924_v39, 16  ;;  %v7620_v58 = vshrl.u32 %v6927_v41, 16  ;;  %v5725_v18 = vld [vmem:[#allocation11 + $0x70] sm:$0xff]   ;;  %v6996_v43 = vld [vmem:[#allocation2 + $0x10] sm:$0xf0] }
 0x268   : > { %5164 = vmatprep.subr.bf16.mxu0 %v5720_v42  ;;  %v2000_v59 = vor.u32 %v1999_v45, %v1996_v44  ;;  %v6958_v62 = vsel %vm1146_vm1, %v1374_v2, %v6946_v46  ;;  %v6963_v0 = vsel %vm1146_vm1, %v6946_v46, %v6949_v47  ;;  %v2005_v1 = vrot.slane %v2003_v49, 3 }
 0x269   : > { %v1304_v3 = vpack.c.bf16 %v1303_v50, %v1302_v25  ;;  %v6968_v4 = vsel %vm1948_vm2, %v1982_v30, %v1991_v56  ;;  %5057 = vmatmul.mubr.bf16.gmra.mrb[12].mxu1 %v6958_v62  ;;  %v2008_v2 = vrot.slane %v2006_v57, 4  ;;  %v2014_v15 = vrot.slane %v7620_v58, 3 }
 0x26a   : > { %5149 = vmatmul.mubr.bf16.gmra.mrb[24].mxu0 %v6968_v4  ;;  %v6975_v14 = vsel %vm1948_vm2, %v1991_v56, %v2000_v59  ;;  %5073 = vmatpush3.bf16.msra.mxu1 %v5721_v38  ;;  %v7617_v16 = vshll.u32 %v6927_v41, 16  ;;  %v1338_v20 = vld [vmem:[#allocation2 + $0x48] sm:$0xf]  ;;  %v2183_v52 = vshrl.u32 %v1913_v13, 16  ;;  %v2186_v36 = vshll.u32 %v1913_v13, 16  ;;  %v5726_v13 = vld [vmem:[#allocation11 + $0x28] sm:$0xff]  }
 0x26b   : > { %v1306_v21 = vrot.slane %v1304_v3, 4  ;;  %5152 = vmatprep.mubr.bf16.mxu0 %v6975_v14  ;;  %5165 = vmatpush3.bf16.msra.mxu0 %v5720_v42  ;;  %v6981_v26 = vor.u32 %v2008_v2, %v2005_v1  ;;  %v1380_v27 = vrot.slane %v1338_v20, 4  ;;  %v2021_v30 = vshrl.u32 %v1338_v20, 16 }
 0x26c   : > { %5166 = vmatprep.subr.bf16.mxu0 %v5722_v61  ;;  %5060 = vmatprep.mubr.bf16.mxu1 %v6963_v0  ;;  %v2017_v33 = vrot.slane %v7617_v16, 4  ;;  %v2024_v38 = vshll.u32 %v1338_v20, 16  ;;  %v6990_v25 = vld [vmem:[#allocation2 + $0x40] sm:$0xf]  ;;  %v1538_v45 = vrot.slane %v6983_v29, 4  ;;  %v1539_v50 = vrot.slane %v6985_v23, 4 }
 0x26d   : > { %1308 = vst [vmem:[#allocation2 + $0x50] ss:$-4 sps:$4 sm:$0xff] %v1306_v21   ;;  %5074 = vmatprep.subr.bf16.mxu1 %v5723_v6  ;;  %v6994_v42 = vsel %vm1948_vm2, %v2000_v59, %v6981_v26  ;;  %v7619_v56 = vshrl.u32 %v6985_v23, 16  ;;  %v1381_v1 = vsel %vm1146_vm1, %v6949_v47, %v1380_v27  ;;  %v2023_v3 = vrot.slane %v2021_v30, 3  ;;  %v5727_v21 = vld [vmem:[#allocation11 + $0x78] sm:$0xff]  }
 0x26e   : > { %5075 = vmatpush3.bf16.msra.mxu1 %v5723_v6  ;;  %v6998_v44 = vor.u32 %v2017_v33, %v2014_v15  ;;  %v7618_v59 = vshll.u32 %v6985_v23, 16  ;;  %v1542_v2 = vrot.slane %v6990_v25, 4  ;;  %v2026_v15 = vrot.slane %v2024_v38, 4 }
 0x26f   : > { %5167 = vmatpush3.bf16.msra.mxu0 %v5722_v61  ;;  %5076 = vmatprep.subr.bf16.mxu1 %v5725_v18  ;;  %v2185_v20 = vrot.slane %v2183_v52, 3  ;;  %v1727_v61 = vrot.slane %v6996_v43, 4  ;;  %v2188_v33 = vrot.slane %v2186_v36, 4  ;;  %v2193_v27 = vrot.slane %v7619_v56, 3  ;;  %v5729_v36 = vld [vmem:[#allocation11 + $0x1c0] sm:$0xff]  }
 0x270   : > { %5168 = vmatprep.subr.bf16.mxu0 %v5724_v54  ;;  %v7010_v6 = vsel %vm1948_vm2, %v6981_v26, %v6998_v44  ;;  %v2196_v30 = vrot.slane %v7618_v59, 4  ;;  %v7019_v16 = vsel %vm1146_vm1, %v6946_v46, %v1542_v2  ;;  %v1540_v52 = vsel %vm1146_vm1, %v1538_v45, %v1539_v50  ;;  %v5728_v59 = vld [vmem:[#allocation11 + $0x30] sm:$0xff]  }
 0x271   : > { %5061 = vmatmul.mubr.bf16.gmra.mrb[16].mxu1 %v1381_v1  ;;  %v7024_v38 = vsel %vm1146_vm1, %v1727_v61, %v6844_v22  ;;  %v2662_v1 = vshrl.u32 %v6829_v8, 16  ;;  %v2665_v2 = vshll.u32 %v6829_v8, 16  ;;  %v2189_v56 = vor.u32 %v2188_v33, %v2185_v20  ;;  %v5731_v33 = vld [vmem:[#allocation11 + $0x1c8] sm:$0xff]  }
 0x272   : > { %5153 = vmatmul.mubr.bf16.gmra.mrb[28].mxu0 %v6994_v42  ;;  %5077 = vmatpush3.bf16.msra.mxu1 %v5725_v18  ;;  %v2027_v18 = vor.u32 %v2026_v15, %v2023_v3  ;;  %v2197_v22 = vor.u32 %v2196_v30, %v2193_v27  ;;  %v1541_v3 = vsel %vm1146_vm1, %v1539_v50, %v6831_v9  ;;  %v5730_v15 = vld [vmem:[#allocation11 + $0x38] sm:$0xff]   ;;  %v2673_v9 = vrot.slane %v1967_v24, 4  ;;  %v5732_v24 = vld [vmem:[#allocation11 + $0x180] sm:$0xff]  }
 0x273   : > { %5156 = vmatprep.mubr.bf16.mxu0 %v7010_v6  ;;  %5169 = vmatpush3.bf16.msra.mxu0 %v5724_v54  ;;  %v2664_v8 = vrot.slane %v2662_v1, 4  ;;  %v2667_v58 = vrot.slane %v2665_v2, 5  ;;  %v2674_v50 = vrot.slane %v1970_v48, 5  ;;  %v2677_v1 = vrot.slane %v1976_v60, 4  ;;  %v5733_v2 = vld [vmem:[#allocation11 + $0x1d0] sm:$0xff]  }
 0x274   : > { %5170 = vmatprep.subr.bf16.mxu0 %v5726_v13  ;;  %5080 = vmatprep.mubr.bf16.mxu1 %v1540_v52  ;;  %v7029_v46 = vld [vmem:[#allocation2 + $0x48] sm:$0xff]  ;;  %v2681_v60 = vrot.slane %v1985_v31, 4  ;;  %v2689_v31 = vrot.slane %v2003_v49, 4  ;;  %v2690_v51 = vrot.slane %v2006_v57, 5  ;;  %v7706_v39 = vshll.u32 %v6927_v41, 16 }
 0x275   : > { %5078 = vmatprep.subr.bf16.mxu1 %v5727_v21  ;;  %v1740_v61 = vrot.slane %v7029_v46, 4  ;;  %v2438_v54 = vshrl.u32 %v7029_v46, 16  ;;  %v2441_v45 = vshll.u32 %v7029_v46, 16  ;;  %v2668_v27 = vor.u32 %v2667_v58, %v2664_v8 }
 0x276   : > { %5079 = vmatpush3.bf16.msra.mxu1 %v5727_v21  ;;  %v2028_v21 = vsel %vm1948_vm2, %v6998_v44, %v2027_v18  ;;  %v2678_v58 = vrot.slane %v1979_v63, 5  ;;  %v7070_v48 = vor.u32 %v2674_v50, %v2673_v9  ;;  %v2685_v63 = vrot.slane %v1994_v34, 4  ;;  %v5734_v18 = vld [vmem:[#allocation11 + $0x188] sm:$0xff]  }
 0x277   : > { %5171 = vmatpush3.bf16.msra.mxu0 %v5726_v13  ;;  %5096 = vmatprep.subr.bf16.mxu1 %v5729_v36  ;;  %v7039_v52 = vsel %vm1146_vm1, %v6949_v47, %v1740_v61  ;;  %v2440_v20 = vrot.slane %v2438_v54, 3  ;;  %v2443_v13 = vrot.slane %v2441_v45, 4  ;;  %v2198_v47 = vsel %vm1948_vm2, %v2189_v56, %v2197_v22 }
 0x278   : > { %5172 = vmatprep.subr.bf16.mxu0 %v5728_v59  ;;  %v7060_v56 = vsel %vm2660_vm3, %v2668_v27, %v6826_v5  ;;  %v2679_v12 = vor.u32 %v2678_v58, %v2677_v1  ;;  %v7705_v34 = vshrl.u32 %v6927_v41, 16  ;;  %v2694_v49 = vrot.slane %v7706_v39, 5  ;;  %v5736_v1 = vld [vmem:[#allocation11 + $0x190] sm:$0xff]  }
 0x279   : > { %5081 = vmatmul.mubr.bf16.vlgmr.msra.gmra.mrb[4].mxu1 %v1541_v3  ;;  %v7050_v30 = vor.u32 %v2443_v13, %v2440_v20  ;;  %v7098_v3 = vor.u32 %v2690_v51, %v2689_v31  ;;  %v2199_v57 = vsel %vm1948_vm2, %v2197_v22, %v6833_v10  ;;  %v2860_v13 = vshrl.u32 %v6983_v29, 16  ;;  %v5738_v31 = vld [vmem:[#allocation11 + $0x198] sm:$0xff]  }
 0x27a   : > { %5157 = vmatmul.mubr.bf16.gmra.mrb[32].mxu0 %v2028_v21  ;;  %5097 = vmatpush3.bf16.msra.mxu1 %v5729_v36  ;;  %v2863_v21 = vshll.u32 %v6983_v29, 16  ;;  %v7707_v10 = vshrl.u32 %v6985_v23, 16  ;;  %v7708_v50 = vshll.u32 %v6985_v23, 16  ;;  %v3048_v58 = vshrl.u32 %v6996_v43, 16 }
 0x27b   : > { %5173 = vmatpush3.bf16.msra.mxu0 %v5728_v59  ;;  %5176 = vmatprep.mubr.bf16.mxu0 %v2198_v47  ;;  %v7068_v11 = vsel %vm1948_vm2, %v6998_v44, %v7050_v30  ;;  %v2682_v59 = vrot.slane %v1988_v32, 5  ;;  %v7083_v44 = vsel %vm2660_vm3, %v6826_v5, %v7070_v48  ;;  %v7091_v32 = vsel %vm2660_vm3, %v7070_v48, %v2679_v12 }
 0x27c   : > { %5174 = vmatprep.subr.bf16.mxu0 %v5730_v15  ;;  %5084 = vmatprep.mubr.bf16.mxu1 %v6857_v35  ;;  %v2686_v35 = vrot.slane %v1997_v37, 5  ;;  %v2693_v37 = vrot.slane %v7705_v34, 4  ;;  %v2867_v22 = vrot.slane %v7707_v10, 4  ;;  %v2862_v27 = vrot.slane %v2860_v13, 4 }
 0x27d   : > { %5098 = vmatprep.subr.bf16.mxu1 %v5731_v33  ;;  %v2683_v36 = vor.u32 %v2682_v59, %v2681_v60  ;;  %v2865_v9 = vrot.slane %v2863_v21, 5  ;;  %v2868_v29 = vrot.slane %v7708_v50, 5  ;;  %v3051_v60 = vshll.u32 %v6996_v43, 16  ;;  %v3029_v59 = vld [vmem:[#allocation2 + $0x50] sm:$0x1f] }
 0x27e   : > { %5099 = vmatpush3.bf16.msra.mxu1 %v5731_v33  ;;  %v2687_v53 = vor.u32 %v2686_v35, %v2685_v63  ;;  %v7114_v41 = vor.u32 %v2694_v49, %v2693_v37  ;;  %v5737_v33 = vld [vmem:[#allocation11 + $0x1e0] sm:$0xff]   ;;  %v3050_v23 = vrot.slane %v3048_v58, 4  ;;  %v3080_v43 = vrot.slane %v2441_v45, 5  ;;  %v2357_v49 = vld [vmem:[#allocation2 + $0x10] sm:$0xf8] }
 0x27f   : > { %5175 = vmatpush3.bf16.msra.mxu0 %v5730_v15  ;;  %5100 = vmatprep.subr.bf16.mxu1 %v5733_v2  ;;  %v7096_v8 = vsel %vm2660_vm3, %v2679_v12, %v2683_v36  ;;  %v5735_v15 = vld [vmem:[#allocation11 + $0x1d8] sm:$0xff]   ;;  %v3079_v12 = vrot.slane %v2438_v54, 4  ;;  %v3084_v51 = vshrl.u32 %v3029_v59, 16  ;;  %v5739_v54 = vld [vmem:[#allocation11 + $0x1e8] sm:$0xff]   ;;  %v2201_v21 = vshrl.u32 %v6990_v25, 16  ;;  %v5745_v58 = vld [vmem:[#allocation11 + $0x140] sm:$0xff]  }
 0x280   : > { %5192 = vmatprep.subr.bf16.mxu0 %v5732_v24  ;;  %v7106_v20 = vsel %vm2660_vm3, %v2683_v36, %v2687_v53  ;;  %v7112_v47 = vsel %vm2660_vm3, %v2687_v53, %v7098_v3  ;;  %v3053_v36 = vrot.slane %v3051_v60, 5  ;;  %v3087_v53 = vshll.u32 %v3029_v59, 16  ;;  %v5746_v60 = vld [vmem:[#allocation11 + $0x1b8] sm:$0xff]  }
 0x281   : > { %5085 = vmatmul.mubr.bf16.gmra.mrb[8].mxu1 %v6865_v40  ;;  %v3081_v37 = vor.u32 %v3080_v43, %v3079_v12  ;;  %v2204_v10 = vshll.u32 %v6990_v25, 16  ;;  %v2203_v50 = vrot.slane %v2201_v21, 3  ;;  %v5755_v43 = vld [vmem:[#allocation11 + $0x88] sm:$0xff]   ;;  %v5765_v21 = vld [vmem:[#allocation11 + $0x218] sm:$0xff]  }
 0x282   : > { %5177 = vmatmul.mubr.bf16.vlgmr.msra.gmra.mrb[20].mxu0 %v2199_v57  ;;  %5101 = vmatpush3.bf16.msra.mxu1 %v5733_v2  ;;  %v7125_v2 = vsel %vm2660_vm3, %v7098_v3, %v7114_v41  ;;  %v3054_v34 = vor.u32 %v3053_v36, %v3050_v23  ;;  %v3089_v39 = vrot.slane %v3087_v53, 5  ;;  %v5740_v57 = vld [vmem:[#allocation11 + $0x1a0] sm:$0xff]   ;;  %v5747_v23 = vld [vmem:[#allocation11 + $0x148] sm:$0xff]   ;;  %v5749_v36 = vld [vmem:[#allocation11 + $0x158] sm:$0xff]  }
 0x283   : > { %5180 = vmatprep.mubr.bf16.mxu0 %v6910_v28  ;;  %5193 = vmatpush3.bf16.msra.mxu0 %v5732_v24  ;;  %v2866_v28 = vor.u32 %v2865_v9, %v2862_v27  ;;  %v2869_v24 = vor.u32 %v2868_v29, %v2867_v22  ;;  %v2376_v22 = vshrl.u32 %v2357_v49, 16  ;;  %v5742_v27 = vld [vmem:[#allocation11 + $0x1a8] sm:$0xff]   ;;  %v5743_v9 = vld [vmem:[#allocation11 + $0x1f8] sm:$0xff]   ;;  %v2206_v29 = vrot.slane %v2204_v10, 4 }
 0x284   : > { %5194 = vmatprep.subr.bf16.mxu0 %v5734_v18  ;;  %5088 = vmatprep.mubr.bf16.mxu1 %v6900_v17  ;;  %v7145_v45 = vsel %vm2660_vm3, %v3054_v34, %v7070_v48  ;;  %v5759_v53 = vld [vmem:[#allocation11 + $0xa8] sm:$0xff]  }
 0x285   : > { %5102 = vmatprep.subr.bf16.mxu1 %v5735_v15  ;;  %v7132_v63 = vsel %vm2660_vm3, %v2866_v28, %v2869_v24  ;;  %v7136_v35 = vsel %vm2660_vm3, %v2869_v24, %v6826_v5  ;;  %v5741_v5 = vld [vmem:[#allocation11 + $0x1f0] sm:$0xff]   ;;  %v2207_v24 = vor.u32 %v2206_v29, %v2203_v50  ;;  %v5769_v50 = vld [vmem:[#allocation11 + $0x238] sm:$0xff]  }
 0x286   : > { %5103 = vmatpush3.bf16.msra.mxu1 %v5735_v15  ;;  %v7150_v15 = vsel %vm2660_vm3, %v7114_v41, %v3081_v37  ;;  %v5744_v28 = vld [vmem:[#allocation11 + $0x1b0] sm:$0xff]  }
 0x287   : > { %5195 = vmatpush3.bf16.msra.mxu0 %v5734_v18  ;;  %5104 = vmatprep.subr.bf16.mxu1 %v5737_v33  ;;  %v3086_v18 = vrot.slane %v3084_v51, 4  ;;  %v2208_v59 = vsel %vm1948_vm2, %v6981_v26, %v2207_v24 }
 0x288   : > { %5196 = vmatprep.subr.bf16.mxu0 %v5736_v1 }
 0x289   : > { %5089 = vmatmul.mubr.bf16.gmra.mrb[12].mxu1 %v6903_v19  ;;  %v3090_v13 = vor.u32 %v3089_v39, %v3086_v18  ;;  %v5761_v39 = vld [vmem:[#allocation11 + $0xb8] sm:$0xff]  }
 0x28a   : > { %5181 = vmatmul.mubr.bf16.gmra.mrb[24].mxu0 %v6931_v55  ;;  %5105 = vmatpush3.bf16.msra.mxu1 %v5737_v33  ;;  %v2379_v33 = vshll.u32 %v2357_v49, 16  ;;  %v5762_v49 = vld [vmem:[#allocation11 + $0x200] sm:$0xff]  }
 0x28b   : > { %5184 = vmatprep.mubr.bf16.mxu0 %v6968_v4  ;;  %5197 = vmatpush3.bf16.msra.mxu0 %v5736_v1  ;;  %v7155_v48 = vsel %vm2660_vm3, %v3081_v37, %v3090_v13  ;;  %v2378_v1 = vrot.slane %v2376_v22, 3  ;;  %v5760_v37 = vld [vmem:[#allocation11 + $0xb0] sm:$0xff]  }
 0x28c   : > { %5198 = vmatprep.subr.bf16.mxu0 %v5738_v31  ;;  %5092 = vmatprep.mubr.bf16.mxu1 %v6958_v62  ;;  %v2381_v25 = vrot.slane %v2379_v33, 4  ;;  %v5764_v13 = vld [vmem:[#allocation11 + $0x210] sm:$0xff]  }
 0x28d   : > { %5106 = vmatprep.subr.bf16.mxu1 %v5739_v54 }
 0x28e   : > { %5107 = vmatpush3.bf16.msra.mxu1 %v5739_v54 }
 0x28f   : > { %5199 = vmatpush3.bf16.msra.mxu0 %v5738_v31  ;;  %5108 = vmatprep.subr.bf16.mxu1 %v5741_v5 }
 0x290   : > { %5200 = vmatprep.subr.bf16.mxu0 %v5740_v57 }
 0x291   : > { %5093 = vmatmul.mubr.bf16.gmra.mrb[16].mxu1 %v7019_v16  ;;  %v2382_v16 = vor.u32 %v2381_v25, %v2378_v1  ;;  %v5771_v1 = vld [vmem:[#allocation12 + $0x8] sm:$0xff]  }
 0x292   : > { %5185 = vmatmul.mubr.bf16.gmra.mrb[28].mxu0 %v6975_v14  ;;  %5109 = vmatpush3.bf16.msra.mxu1 %v5741_v5 }
 0x293   : > { %5188 = vmatprep.mubr.bf16.mxu0 %v6994_v42  ;;  %5201 = vmatpush3.bf16.msra.mxu0 %v5740_v57  ;;  %v2391_v12 = vsel %vm1948_vm2, %v2382_v16, %v6893_v7  ;;  %v5751_v7 = vld [vmem:[#allocation11 + $0x168] sm:$0xff]  }
 0x294   : > { %5202 = vmatprep.subr.bf16.mxu0 %v5742_v27  ;;  %5112 = vmatprep.mubr.bf16.mxu1 %v7024_v38  ;;  %v5748_v38 = vld [vmem:[#allocation11 + $0x150] sm:$0xff]   ;;  %v5763_v57 = vld [vmem:[#allocation11 + $0x208] sm:$0xff]  }
 0x295   : > { %5110 = vmatprep.subr.bf16.mxu1 %v5743_v9 }
 0x296   : > { %5111 = vmatpush3.bf16.msra.mxu1 %v5743_v9 }
 0x297   : > { %5203 = vmatpush3.bf16.msra.mxu0 %v5742_v27  ;;  %5224 = vmatprep.subr.bf16.mxu1 %v5745_v58  ;;  %v5768_v27 = vld [vmem:[#allocation11 + $0x230] sm:$0xff]  }
 0x298   : > { %5204 = vmatprep.subr.bf16.mxu0 %v5744_v28 }
 0x299   : > { %5113 = vmatmul.mubr.bf16.vlgmr.msra.gmra.mrb[4].mxu1 %v6865_v40  ;;  %v5750_v40 = vld [vmem:[#allocation11 + $0x160] sm:$0xff]  }
 0x29a   : > { %5189 = vmatmul.mubr.bf16.gmra.mrb[32].mxu0 %v2208_v59  ;;  %5225 = vmatpush3.bf16.msra.mxu1 %v5745_v58 }
 0x29b   : > { %5205 = vmatpush3.bf16.msra.mxu0 %v5744_v28  ;;  %5208 = vmatprep.mubr.bf16.mxu0 %v2391_v12 }
 0x29c   : > { %5206 = vmatprep.subr.bf16.mxu0 %v5746_v60  ;;  %5116 = vmatprep.mubr.bf16.mxu1 %v6900_v17  ;;  %v1700_v17 = vld [vmem:[#allocation2 + $0x50] sm:$0xf] }
 0x29d   : > { %5226 = vmatprep.subr.bf16.mxu1 %v5747_v23 }
 0x29e   : > { %5227 = vmatpush3.bf16.msra.mxu1 %v5747_v23 }
 0x29f   : > { %5207 = vmatpush3.bf16.msra.mxu0 %v5746_v60  ;;  %5228 = vmatprep.subr.bf16.mxu1 %v5748_v38 }
 0x2a1   : > { %5117 = vmatmul.mubr.bf16.gmra.mrb[8].mxu1 %v6903_v19  ;;  %v5752_v19 = vld [vmem:[#allocation11 + $0x170] sm:$0xff]  }
 0x2a2   : > { %5209 = vmatmul.mubr.bf16.vlgmr.msra.gmra.mrb[20].mxu0 %v6931_v55  ;;  %5229 = vmatpush3.bf16.msra.mxu1 %v5748_v38  ;;  %v1742_v55 = vrot.slane %v1700_v17, 4 }
 0x2a3   : > { %5212 = vmatprep.mubr.bf16.mxu0 %v6968_v4  ;;  %5120 = vmatprep.mubr.bf16.mxu1 %v6958_v62  ;;  %v2447_v4 = vshrl.u32 %v1700_v17, 16  ;;  %v2450_v62 = vshll.u32 %v1700_v17, 16 }
 0x2a4   : > { %5230 = vmatprep.subr.bf16.mxu1 %v5749_v36  ;;  %v1743_v26 = vsel %vm1146_vm1, %v1740_v61, %v1742_v55  ;;  %v5757_v61 = vld [vmem:[#allocation11 + $0x98] sm:$0xff]  }
 0x2a5   : > { %v2449_v31 = vrot.slane %v2447_v4, 3 }
 0x2a6   : > { %5231 = vmatpush3.bf16.msra.mxu1 %v5749_v36 }
 0x2a7   : > { %5232 = vmatprep.subr.bf16.mxu1 %v5750_v40 }
 0x2a9   : > { %5121 = vmatmul.mubr.bf16.gmra.mrb[12].mxu1 %v6963_v0  ;;  %v5753_v0 = vld [vmem:[#allocation11 + $0x178] sm:$0xff]  }
 0x2aa   : > { %5213 = vmatmul.mubr.bf16.gmra.mrb[24].mxu0 %v6975_v14  ;;  %5233 = vmatpush3.bf16.msra.mxu1 %v5750_v40  ;;  %v2452_v14 = vrot.slane %v2450_v62, 4 }
 0x2ab   : > { %5216 = vmatprep.mubr.bf16.mxu0 %v6994_v42  ;;  %5124 = vmatprep.mubr.bf16.mxu1 %v7039_v52  ;;  %v5754_v42 = vld [vmem:[#allocation11 + $0x80] sm:$0xff]  }
 0x2ac   : > { %5234 = vmatprep.subr.bf16.mxu1 %v5751_v7  ;;  %v2453_v52 = vor.u32 %v2452_v14, %v2449_v31 }
 0x2ae   : > { %5235 = vmatpush3.bf16.msra.mxu1 %v5751_v7  ;;  %v2454_v46 = vsel %vm1948_vm2, %v7050_v30, %v2453_v52 }
 0x2af   : > { %5236 = vmatprep.subr.bf16.mxu1 %v5752_v19 }
 0x2b1   : > { %5125 = vmatmul.mubr.bf16.gmra.mrb[16].mxu1 %v1743_v26 }
 0x2b2   : > { %5217 = vmatmul.mubr.bf16.gmra.mrb[28].mxu0 %v7010_v6  ;;  %5237 = vmatpush3.bf16.msra.mxu1 %v5752_v19  ;;  %v5756_v6 = vld [vmem:[#allocation11 + $0x90] sm:$0xff]  }
 0x2b3   : > { %5220 = vmatprep.mubr.bf16.mxu0 %v7068_v11  ;;  %5240 = vmatprep.mubr.bf16.mxu1 %v7060_v56  ;;  %v2642_v56 = vld [vmem:[#allocation2 + $0x48] sm:$0x1f]  ;;  %v5758_v11 = vld [vmem:[#allocation11 + $0xa0] sm:$0xff]  }
 0x2b4   : > { %5238 = vmatprep.subr.bf16.mxu1 %v5753_v0  ;;  %v2698_v30 = vshrl.u32 %v2642_v56, 16  ;;  %v2701_v51 = vshll.u32 %v2642_v56, 16 }
 0x2b6   : > { %5239 = vmatpush3.bf16.msra.mxu1 %v5753_v0  ;;  %v2700_v54 = vrot.slane %v2698_v30, 4  ;;  %v2703_v34 = vrot.slane %v2701_v51, 5 }
 0x2b7   : > { %5256 = vmatprep.subr.bf16.mxu1 %v5754_v42 }
 0x2b8   : > { %v2704_v18 = vor.u32 %v2703_v34, %v2700_v54 }
 0x2b9   : > { %5241 = vmatmul.mubr.bf16.vlgmr.msra.gmra.mrb[20].mxu1 %v7083_v44 }
 0x2ba   : > { %5221 = vmatmul.mubr.bf16.gmra.mrb[32].mxu0 %v2454_v46  ;;  %5257 = vmatpush3.bf16.msra.mxu1 %v5754_v42  ;;  %v2705_v5 = vsel %vm2660_vm3, %v7114_v41, %v2704_v18  ;;  %v2624_v41 = vld [vmem:[#allocation2 + $0x40] sm:$0x1f] }
 0x2bb   : > { %5244 = vmatprep.mubr.bf16.mxu1 %v7091_v32  ;;  %5258 = vmatprep.subr.bf16.mxu1 %v5755_v43  ;;  %v2873_v10 = vshrl.u32 %v2624_v41, 16  ;;  %v2876_v22 = vshll.u32 %v2624_v41, 16 }
 0x2bd   : > { %v2875_v33 = vrot.slane %v2873_v10, 4 }
 0x2be   : > { %5259 = vmatpush3.bf16.msra.mxu1 %v5755_v43 }
 0x2bf   : > { %5260 = vmatprep.subr.bf16.mxu1 %v5756_v6 }
 0x2c1   : > { %5245 = vmatmul.mubr.bf16.gmra.mrb[24].mxu1 %v7096_v8 }
 0x2c2   : > { %5261 = vmatpush3.bf16.msra.mxu1 %v5756_v6  ;;  %5248 = vmatprep.mubr.bf16.mxu1 %v7106_v20 }
 0x2c3   : > { %5262 = vmatprep.subr.bf16.mxu1 %v5757_v61 }
 0x2c6   : > { %5263 = vmatpush3.bf16.msra.mxu1 %v5757_v61 }
 0x2c7   : > { %5264 = vmatprep.subr.bf16.mxu1 %v5758_v11 }
 0x2c9   : > { %5249 = vmatmul.mubr.bf16.gmra.mrb[28].mxu1 %v7112_v47 }
 0x2ca   : > { %5265 = vmatpush3.bf16.msra.mxu1 %v5758_v11  ;;  %5252 = vmatprep.mubr.bf16.mxu1 %v7125_v2 }
 0x2cb   : > { %5266 = vmatprep.subr.bf16.mxu1 %v5759_v53 }
 0x2ce   : > { %5267 = vmatpush3.bf16.msra.mxu1 %v5759_v53 }
 0x2cf   : > { %5268 = vmatprep.subr.bf16.mxu1 %v5760_v37 }
 0x2d1   : > { %5253 = vmatmul.mubr.bf16.gmra.mrb[32].mxu1 %v2705_v5 }
 0x2d2   : > { %5269 = vmatpush3.bf16.msra.mxu1 %v5760_v37  ;;  %5272 = vmatprep.mubr.bf16.mxu1 %v7132_v63  ;;  %v5766_v63 = vld [vmem:[#allocation11 + $0x220] sm:$0xff]  }
 0x2d3   : > { %5270 = vmatprep.subr.bf16.mxu1 %v5761_v39 }
 0x2d6   : > { %5271 = vmatpush3.bf16.msra.mxu1 %v5761_v39 }
 0x2d7   : > { %5288 = vmatprep.subr.bf16.mxu1 %v5762_v49 }
 0x2d9   : > { %5273 = vmatmul.mubr.bf16.vlgmr.msra.gmra.mrb[20].mxu1 %v7136_v35  ;;  %v5767_v35 = vld [vmem:[#allocation11 + $0x228] sm:$0xff]  }
 0x2da   : > { %5289 = vmatpush3.bf16.msra.mxu1 %v5762_v49  ;;  %5276 = vmatprep.mubr.bf16.mxu1 %v7083_v44  ;;  %v2878_v44 = vrot.slane %v2876_v22, 5 }
 0x2db   : > { %5290 = vmatprep.subr.bf16.mxu1 %v5763_v57 }
 0x2dc   : > { %v2879_v9 = vor.u32 %v2878_v44, %v2875_v33 }
 0x2de   : > { %5291 = vmatpush3.bf16.msra.mxu1 %v5763_v57  ;;  %v2880_v29 = vsel %vm2660_vm3, %v7098_v3, %v2879_v9  ;;  %v5770_v3 = vld [vmem:[#allocation12] sm:$0xff]  }
 0x2df   : > { %5292 = vmatprep.subr.bf16.mxu1 %v5764_v13  ;;  %5320 = vmatprep.subr.bf16.mxu0 %v5770_v3 }
 0x2e0   : > { %5321 = vmatpush3.bf16.msra.mxu0 %v5770_v3 }
 0x2e1   : > { %5277 = vmatmul.mubr.bf16.gmra.mrb[24].mxu1 %v7091_v32  ;;  %5322 = vmatprep.subr.bf16.mxu0 %v5771_v1 }
 0x2e2   : > { %5293 = vmatpush3.bf16.msra.mxu1 %v5764_v13  ;;  %5280 = vmatprep.mubr.bf16.mxu1 %v7096_v8 }
 0x2e3   : > { %5294 = vmatprep.subr.bf16.mxu1 %v5765_v21 }
 0x2e4   : > { %5323 = vmatpush3.bf16.msra.mxu0 %v5771_v1 }
 0x2e6   : > { %5295 = vmatpush3.bf16.msra.mxu1 %v5765_v21 }
 0x2e7   : > { %5296 = vmatprep.subr.bf16.mxu1 %v5766_v63 }
 0x2e9   : > { %5281 = vmatmul.mubr.bf16.gmra.mrb[28].mxu1 %v7106_v20 }
 0x2ea   : > { %5297 = vmatpush3.bf16.msra.mxu1 %v5766_v63  ;;  %5284 = vmatprep.mubr.bf16.mxu1 %v7112_v47 }
 0x2eb   : > { %5298 = vmatprep.subr.bf16.mxu1 %v5767_v35 }
 0x2ee   : > { %5299 = vmatpush3.bf16.msra.mxu1 %v5767_v35 }
 0x2ef   : > { %5300 = vmatprep.subr.bf16.mxu1 %v5768_v27 }
 0x2f1   : > { %5285 = vmatmul.mubr.bf16.gmra.mrb[32].mxu1 %v2880_v29 }
 0x2f2   : > { %5301 = vmatpush3.bf16.msra.mxu1 %v5768_v27  ;;  %5304 = vmatprep.mubr.bf16.mxu1 %v7145_v45  ;;  %v5772_v45 = vld [vmem:[#allocation12 + $0x10] sm:$0xff]  }
 0x2f3   : > { %5302 = vmatprep.subr.bf16.mxu1 %v5769_v50  ;;  %5324 = vmatprep.subr.bf16.mxu0 %v5772_v45 }
 0x2f4   : > { %5325 = vmatpush3.bf16.msra.mxu0 %v5772_v45 }
 0x2f6   : > { %5303 = vmatpush3.bf16.msra.mxu1 %v5769_v50 }
 0x2f9   : > { %5305 = vmatmul.mubr.bf16.vlgmr.msra.gmra.mrb[20].mxu1 %v7091_v32  ;;  %v5773_v32 = vld [vmem:[#allocation12 + $0x18] sm:$0xff]  }
 0x2fa   : > { %5308 = vmatprep.mubr.bf16.mxu1 %v7096_v8  ;;  %5326 = vmatprep.subr.bf16.mxu0 %v5773_v32  ;;  %v5774_v8 = vld [vmem:[#allocation12 + $0x20] sm:$0xff]  }
 0x2fb   : > { %5327 = vmatpush3.bf16.msra.mxu0 %v5773_v32 }
 0x2fc   : > { %5328 = vmatprep.subr.bf16.mxu0 %v5774_v8 }
 0x2ff   : > { %5329 = vmatpush3.bf16.msra.mxu0 %v5774_v8 }
 0x301   : > { %5309 = vmatmul.mubr.bf16.gmra.mrb[24].mxu1 %v7106_v20  ;;  %v5775_v20 = vld [vmem:[#allocation12 + $0x28] sm:$0xff]  }
 0x302   : > { %5312 = vmatprep.mubr.bf16.mxu1 %v7112_v47  ;;  %v5776_v47 = vld [vmem:[#allocation12 + $0x30] sm:$0xff]   ;;  %5330 = vmatprep.subr.bf16.mxu0 %v5775_v20 }
 0x303   : > { %5331 = vmatpush3.bf16.msra.mxu0 %v5775_v20 }
 0x304   : > { %5332 = vmatprep.subr.bf16.mxu0 %v5776_v47 }
 0x307   : > { %5333 = vmatpush3.bf16.msra.mxu0 %v5776_v47 }
 0x309   : > { %5313 = vmatmul.mubr.bf16.gmra.mrb[28].mxu1 %v7125_v2  ;;  %v5777_v2 = vld [vmem:[#allocation12 + $0x38] sm:$0xff]  }
 0x30a   : > { %5316 = vmatprep.mubr.bf16.mxu1 %v7150_v15  ;;  %5334 = vmatprep.subr.bf16.mxu0 %v5777_v2  ;;  %v7208_v15 = vld [vmem:[#allocation14] sm:$0xff]  }
 0x30b   : > { %5335 = vmatpush3.bf16.msra.mxu0 %v5777_v2 }
 0x30c   : > { %5352 = vmatprep.subr.bf16.mxu0 %v7208_v15 }
 0x311   : > { %5317 = vmatmul.mubr.bf16.gmra.mrb[32].mxu1 %v7155_v48  ;;  %v3261_v48 = vlaneseq }
 0x313   : > { %v7211_v25 = vshrl.u32 %v3261_v48, 7 }
 0x315   : > { %v3264_v58 = vadd.s32 16, %v7211_v25  ;;  %v3282_v23 = vand.u32 15, %v7211_v25  ;;  %v3268_v12 = vadd.s32 48, %v7211_v25  ;;  %v3266_v36 = vadd.s32 32, %v7211_v25 }
 0x316   : > { %v3272_v6 = vadd.s32 80, %v7211_v25  ;;  %v3270_v56 = vadd.s32 64, %v7211_v25  ;;  %v3276_v63 = vadd.s32 112, %v7211_v25  ;;  %v3274_v22 = vadd.s32 96, %v7211_v25 }
 0x317   : > { %v3296_v59 = vand.u32 15, %v3264_v58  ;;  %vm3470_vm5 = vcmp.eq.s32.totalorder %v3282_v23, 0  ;;  %v3324_v31 = vand.u32 15, %v3268_v12  ;;  %v3310_v43 = vand.u32 15, %v3266_v36 }
 0x318   : > { %v3352_v5 = vand.u32 15, %v3272_v6  ;;  %v3338_v21 = vand.u32 15, %v3270_v56  ;;  %v3380_v45 = vand.u32 15, %v3276_v63  ;;  %v3366_v47 = vand.u32 15, %v3274_v22 }
 0x319   : > { %vm3472_vm4 = vcmp.eq.s32.totalorder %v3296_v59, 0  ;;  %vm3476_vm6 = vcmp.eq.s32.totalorder %v3324_v31, 0  ;;  %vm3474_vm7 = vcmp.eq.s32.totalorder %v3310_v43, 0  ;;  %v3265_v36 = vadd.s32 24, %v7211_v25 }
 0x31a   : > { %vm3480_vm8 = vcmp.eq.s32.totalorder %v3352_v5, 0  ;;  %vm3478_vm9 = vcmp.eq.s32.totalorder %v3338_v21, 0  ;;  %vm3484_vm10 = vcmp.eq.s32.totalorder %v3380_v45, 0  ;;  %vm3482_vm11 = vcmp.eq.s32.totalorder %v3366_v47, 0 }
 0x31b   : > { %v3267_v31 = vadd.s32 40, %v7211_v25 }
 0x36c   : > { %v5114_v28 = vpop.f32.mrb[4].mxu1 }
 0x36d   : > { %v1834_v24 = vpop.f32.mrb[5].mxu1 }
 0x36e   : > { %v5115_v16 = vpop.f32.mrb[6].mxu1 }
 0x36f   : > { %v1837_v60 = vpop.f32.mrb[7].mxu1 }
 0x374   : > { %v5118_v38 = vpop.f32.mrb[8].mxu1 }
 0x375   : > { %v5210_v40 = vpop.f32.mrb[20].mxu0  ;;  %v1850_v7 = vpop.f32.mrb[9].mxu1 }
 0x376   : > { %v3520_v17 = vsel %vm3472_vm4, 0.0, %v5210_v40  ;;  %v2545_v19 = vpop.f32.mrb[21].mxu0  ;;  %v5119_v55 = vpop.f32.mrb[10].mxu1  ;;  %v3263_v40 = vadd.s32 8, %v7211_v25 }
 0x377   : > { %v7217_v4 = vadd.f32 %v5114_v28, %v3520_v17  ;;  %v3518_v62 = vsel %vm3470_vm5, 0.0, %v2545_v19  ;;  %v5211_v26 = vpop.f32.mrb[22].mxu0  ;;  %v1853_v0 = vpop.f32.mrb[11].mxu1 }
 0x378   : > { %v7219_v14 = vadd.f32 %v3518_v62, %v1834_v24  ;;  %v7221_v42 = vadd.f32 %v5211_v26, %v5115_v16  ;;  %v2548_v52 = vpop.f32.mrb[23].mxu0  ;;  %v3289_v17 = vand.u32 15, %v3263_v40  ;;  %v3269_v62 = vadd.s32 56, %v7211_v25 }
 0x379   : > { %v7223_v46 = vadd.f32 %v2548_v52, %v1837_v60 }
 0x37a   : > { %vm3551_vm13 = vcmp.eq.s32.totalorder %v3289_v17, 15  ;;  %v3277_v17 = vadd.s32 120, %v7211_v25 }
 0x37c   : > { %v5122_v61 = vpop.f32.mrb[12].mxu1 }
 0x37d   : > { %v5214_v11 = vpop.f32.mrb[24].mxu0  ;;  %v1866_v30 = vpop.f32.mrb[13].mxu1 }
 0x37e   : > { %v3524_v51 = vsel %vm3476_vm6, 0.0, %v5214_v11  ;;  %v2561_v53 = vpop.f32.mrb[25].mxu0  ;;  %v5123_v54 = vpop.f32.mrb[14].mxu1 }
 0x37f   : > { %v7227_v34 = vadd.f32 %v5118_v38, %v3524_v51  ;;  %v3522_v37 = vsel %vm3474_vm7, 0.0, %v2561_v53  ;;  %v5215_v18 = vpop.f32.mrb[26].mxu0  ;;  %v1869_v39 = vpop.f32.mrb[15].mxu1  ;;  %v3331_v53 = vand.u32 15, %v3269_v62 }
 0x380   : > { %v7229_v49 = vadd.f32 %v3522_v37, %v1850_v7  ;;  %v7231_v57 = vadd.f32 %v5215_v18, %v5119_v55  ;;  %v2564_v13 = vpop.f32.mrb[27].mxu0  ;;  %v3303_v7 = vand.u32 15, %v3265_v36  ;;  %v7258_v55 = vld [vmem:[%s7709_s3] ss:$0 sm:$0xff]  ;;  %v3317_v37 = vand.u32 15, %v3267_v31  ;;  %s4676_s3 = sshll.u32 %s7702_s17, 4 }
 0x381   : > { %v7233_v41 = vadd.f32 %v2564_v13, %v1853_v0  ;;  %vm7279_vm14 = vcmp.eq.s32.totalorder %v3331_v53, 15  ;;  %v3387_v53 = vand.u32 15, %v3277_v17  ;;  %s4303_s17 = sadd.s32 %s4677_s28, %s4676_s3 }
 0x382   : > { %vm3553_vm12 = vcmp.eq.s32.totalorder %v3303_v7, 15  ;;  %vm7285_vm15 = vcmp.eq.s32.totalorder %v3317_v37, 15  ;;  %v5779_v7 = vld [vmem:[#allocation14 + $0x8] sm:$0xff]  }
 0x383   : > { %vm7331_vm2 = vcmp.eq.s32.totalorder %v3387_v53, 15 }
 0x384   : > { %v5126_v10 = vpop.f32.mrb[16].mxu1 }
 0x385   : > { %v5218_v35 = vpop.f32.mrb[28].mxu0  ;;  %v1882_v33 = vpop.f32.mrb[17].mxu1 }
 0x386   : > { %v3528_v44 = vsel %vm3480_vm8, 0.0, %v5218_v35  ;;  %v2577_v27 = vpop.f32.mrb[29].mxu0  ;;  %v5127_v9 = vpop.f32.mrb[18].mxu1 }
 0x387   : > { %v7237_v50 = vadd.f32 %v5122_v61, %v3528_v44  ;;  %v3526_v29 = vsel %vm3478_vm9, 0.0, %v2577_v27  ;;  %v5219_v3 = vpop.f32.mrb[30].mxu0  ;;  %v1885_v1 = vpop.f32.mrb[19].mxu1  ;;  %v7268_v61 = vld [vmem:[%s7710_s14] ss:$0 sm:$0xff]  ;;  %s4678_s14 = sshll.u32 %s4303_s17, 6 }
 0x388   : > { %v7239_v32 = vadd.f32 %v3526_v29, %v1866_v30  ;;  %v7241_v8 = vadd.f32 %v5219_v3, %v5123_v54  ;;  %v2580_v20 = vpop.f32.mrb[31].mxu0 }
 0x389   : > { %v7243_v2 = vadd.f32 %v2580_v20, %v1869_v39  ;;  %v3273_v39 = vadd.s32 88, %v7211_v25 }
 0x38b   : > { %v3359_v3 = vand.u32 15, %v3273_v39 }
 0x38d   : > { %v5222_v48 = vpop.f32.mrb[32].mxu0  ;;  %vm7305_vm0 = vcmp.eq.s32.totalorder %v3359_v3, 15 }
 0x38e   : > { %v3532_v58 = vsel %vm3484_vm10, 0.0, %v5222_v48  ;;  %v2593_v28 = vpop.f32.mrb[33].mxu0 }
 0x38f   : > { %v7245_v24 = vadd.f32 %v5126_v10, %v3532_v58  ;;  %v3530_v16 = vsel %vm3482_vm11, 0.0, %v2593_v28  ;;  %v5223_v60 = vpop.f32.mrb[34].mxu0 }
 0x390   : > { %v7247_v59 = vadd.f32 %v3530_v16, %v1882_v33  ;;  %v7249_v23 = vadd.f32 %v5223_v60, %v5127_v9  ;;  %v2596_v12 = vpop.f32.mrb[35].mxu0  ;;  %v3271_v33 = vadd.s32 72, %v7211_v25 }
 0x391   : > { %v7251_v38 = vadd.f32 %v2596_v12, %v1885_v1 }
 0x392   : > { %v3345_v12 = vand.u32 15, %v3271_v33 }
 0x394   : > { %vm7312_vm1 = vcmp.eq.s32.totalorder %v3345_v12, 15 }
 0x3cc   : > { %v5306_v19 = vpop.f32.mrb[20].mxu1 }
 0x3cd   : > { %v3616_v26 = vadd.f32 %v5306_v19, %v7217_v4  ;;  %v3182_v0 = vpop.f32.mrb[21].mxu1 }
 0x3ce   : > { %v3614_v52 = vadd.f32 %v7219_v14, %v3182_v0  ;;  %v5307_v43 = vpop.f32.mrb[22].mxu1 }
 0x3cf   : > { %v3639_v6 = vmul.f32 %v7258_v55, %v3616_v26  ;;  %v3601_v56 = vsel %vm3553_vm12, 0.0, %v5307_v43  ;;  %v3185_v11 = vpop.f32.mrb[23].mxu1  ;;  %v5785_v43 = vld [vmem:[#allocation14 + $0x38] sm:$0xff]  }
 0x3d0   : > { %v3637_v30 = vmul.f32 %v7258_v55, %v3614_v52  ;;  %v3617_v4 = vadd.f32 %v3601_v56, %v7221_v42  ;;  %v3599_v51 = vsel %vm3551_vm13, 0.0, %v3185_v11 }
 0x3d1   : > { %v3615_v54 = vadd.f32 %v3599_v51, %v7223_v46  ;;  %v3662_v14 = vadd.f32 %v7268_v61, %v3639_v6  ;;  %v3275_v6 = vadd.s32 104, %v7211_v25 }
 0x3d2   : > { %v3640_v18 = vmul.f32 %v7258_v55, %v3617_v4  ;;  %v3660_v5 = vadd.f32 %v7268_v61, %v3637_v30  ;;  %v5780_v4 = vld [vmem:[#allocation14 + $0x10] sm:$0xff]  }
 0x3d3   : > { %v3638_v13 = vmul.f32 %v7258_v55, %v3615_v54  ;;  %v3678_v44 = vmax.f32 %v3662_v14, 0.0 }
 0x3d4   : > { %v3663_v21 = vadd.f32 %v7268_v61, %v3640_v18  ;;  %v5310_v63 = vpop.f32.mrb[24].mxu1  ;;  %v3676_v1 = vmax.f32 %v3660_v5, 0.0 }
 0x3d5   : > { %v3661_v46 = vadd.f32 %v7268_v61, %v3638_v13  ;;  %v3620_v10 = vadd.f32 %v5310_v63, %v7227_v34  ;;  %v3198_v22 = vpop.f32.mrb[25].mxu1 }
 0x3d6   : > { %v3679_v27 = vmax.f32 %v3663_v21, 0.0  ;;  %v3618_v9 = vadd.f32 %v7229_v49, %v3198_v22  ;;  %v5311_v29 = vpop.f32.mrb[26].mxu1  ;;  %v3373_v21 = vand.u32 15, %v3275_v6  ;;  %v5788_v6 = vld [vmem:[%s6710_s15 + $0x10] sm:$0xff]  }
 0x3d7   : > { %v3643_v45 = vmul.f32 %v7258_v55, %v3620_v10  ;;  %v3605_v20 = vsel %vm7279_vm14, 0.0, %v5311_v29  ;;  %v3201_v34 = vpop.f32.mrb[27].mxu1  ;;  %v3677_v47 = vmax.f32 %v3661_v46, 0.0  ;;  %v5781_v46 = vld [vmem:[#allocation14 + $0x18] sm:$0xff]  }
 0x3d8   : > { %v3693_v48 = vpack.c.bf16 %v3679_v27, %v3678_v44  ;;  %v3641_v58 = vmul.f32 %v7258_v55, %v3618_v9  ;;  %v3621_v28 = vadd.f32 %v3605_v20, %v7231_v57  ;;  %v3603_v16 = vsel %vm7285_vm15, 0.0, %v3201_v34 }
 0x3d9   : > { %v3619_v49 = vadd.f32 %v3603_v16, %v7233_v41  ;;  %v3692_v60 = vpack.c.bf16 %v3677_v47, %v3676_v1  ;;  %v3666_v36 = vadd.f32 %v7268_v61, %v3643_v45  ;;  %vm7337_vm3 = vcmp.eq.s32.totalorder %v3373_v21, 15  ;;  %v5782_v45 = vld [vmem:[#allocation14 + $0x20] sm:$0xff]  }
 0x3da   : > { %v3644_v40 = vmul.f32 %v7258_v55, %v3621_v28  ;;  %v3664_v19 = vadd.f32 %v7268_v61, %v3641_v58 }
 0x3db   : > { %v3642_v62 = vmul.f32 %v7258_v55, %v3619_v49  ;;  %5336 = vmatprep.mubr.bf16.mxu0 %v3692_v60  ;;  %v3682_v56 = vmax.f32 %v3666_v36, 0.0 }
 0x3dc   : > { %v3667_v57 = vadd.f32 %v7268_v61, %v3644_v40  ;;  %v5314_v26 = vpop.f32.mrb[28].mxu1  ;;  %5337 = vmatmul.mubr.bf16.vlgmr.msra.gmra.mrb[36].mxu0 %v3693_v48  ;;  %v3680_v54 = vmax.f32 %v3664_v19, 0.0 }
 0x3dd   : > { %v3665_v0 = vadd.f32 %v7268_v61, %v3642_v62  ;;  %v3624_v31 = vadd.f32 %v5314_v26, %v7237_v50  ;;  %5353 = vmatpush3.bf16.msra.mxu0 %v7208_v15  ;;  %v3214_v52 = vpop.f32.mrb[29].mxu1 }
 0x3de   : > { %v3622_v11 = vadd.f32 %v7239_v32, %v3214_v52  ;;  %v5315_v30 = vpop.f32.mrb[30].mxu1  ;;  %5354 = vmatprep.subr.bf16.mxu0 %v5779_v7  ;;  %v3683_v51 = vmax.f32 %v3667_v57, 0.0  ;;  %v5784_v57 = vld [vmem:[#allocation14 + $0x30] sm:$0xff]   ;;  %v5786_v52 = vld [vmem:[%s6710_s15] sm:$0xff]  }
 0x3df   : > { %v3647_v50 = vmul.f32 %v7258_v55, %v3624_v31  ;;  %v3609_v15 = vsel %vm7305_vm0, 0.0, %v5315_v30  ;;  %v3217_v37 = vpop.f32.mrb[31].mxu1  ;;  %v3681_v14 = vmax.f32 %v3665_v0, 0.0  ;;  %v5791_v30 = vld [vmem:[%s6710_s15 + $0x28] sm:$0xff]  }
 0x3e0   : > { %v3645_v18 = vmul.f32 %v7258_v55, %v3622_v11  ;;  %v3625_v25 = vadd.f32 %v3609_v15, %v7241_v8  ;;  %v3607_v32 = vsel %vm7312_vm1, 0.0, %v3217_v37  ;;  %v3695_v39 = vpack.c.bf16 %v3683_v51, %v3682_v56  ;;  %v5789_v56 = vld [vmem:[%s6710_s15 + $0x18] sm:$0xff]   ;;  %v5790_v11 = vld [vmem:[%s6710_s15 + $0x20] sm:$0xff]  }
 0x3e1   : > { %v3623_v5 = vadd.f32 %v3607_v32, %v7243_v2  ;;  %5355 = vmatpush3.bf16.msra.mxu0 %v5779_v7  ;;  %v3694_v13 = vpack.c.bf16 %v3681_v14, %v3680_v54  ;;  %v3670_v63 = vadd.f32 %v7268_v61, %v3647_v50  ;;  %v5783_v7 = vld [vmem:[#allocation14 + $0x28] sm:$0xff]   ;;  %v5793_v51 = vld [vmem:[%s6710_s15 + $0x38] sm:$0xff]  }
 0x3e2   : > { %v3648_v42 = vmul.f32 %v7258_v55, %v3625_v25  ;;  %5356 = vmatprep.subr.bf16.mxu0 %v5780_v4  ;;  %v3668_v10 = vadd.f32 %v7268_v61, %v3645_v18 }
 0x3e3   : > { %v3646_v22 = vmul.f32 %v7258_v55, %v3623_v5  ;;  %5340 = vmatprep.mubr.bf16.mxu0 %v3694_v13  ;;  %v3686_v29 = vmax.f32 %v3670_v63, 0.0 }
 0x3e4   : > { %v3671_v8 = vadd.f32 %v7268_v61, %v3648_v42  ;;  %v5318_v35 = vpop.f32.mrb[32].mxu1  ;;  %5341 = vmatmul.mubr.bf16.gmra.mrb[40].mxu0 %v3695_v39  ;;  %v3684_v34 = vmax.f32 %v3668_v10, 0.0  ;;  %v7383_v10 = vld [vmem:[%s7723_s13] ss:$0 sm:$0xff]  ;;  %s7728_s13 = sld [smem:[#allocation51_spill]] }
 0x3e5   : > { %v3669_v33 = vadd.f32 %v7268_v61, %v3646_v22  ;;  %v3628_v44 = vadd.f32 %v5318_v35, %v7245_v24  ;;  %5357 = vmatpush3.bf16.msra.mxu0 %v5780_v4  ;;  %v3230_v27 = vpop.f32.mrb[33].mxu1  ;;  %v5792_v4 = vld [vmem:[%s6710_s15 + $0x30] sm:$0xff]   ;;  %v7388_v22 = vld [vmem:[%s7724_s10] ss:$0 sm:$0xff]  ;;  %s5996_s10 = scalar_lea.vmem %s7485_s9, 1024 }
 0x3e6   : > { %v3626_v3 = vadd.f32 %v7247_v59, %v3230_v27  ;;  %v5319_v1 = vpop.f32.mrb[34].mxu1  ;;  %5358 = vmatprep.subr.bf16.mxu0 %v5781_v46  ;;  %v3687_v20 = vmax.f32 %v3671_v8, 0.0  ;;  %v7394_v35 = vld [vmem:[%s7725_s6] ss:$0 sm:$0xff]  ;;  %p5997_p4 = scmp.ne.s32.totalorder %s7485_s9, %s5996_s10  ;;  %s6002_s6 = scalar_lea.vmem %s6001_s1, 2048 }
 0x3e7   : > { %v3651_v47 = vmul.f32 %v7258_v55, %v3628_v44  ;;  %v3613_v48 = vsel %vm7331_vm2, 0.0, %v5319_v1  ;;  %v3233_v24 = vpop.f32.mrb[35].mxu1  ;;  %v3685_v58 = vmax.f32 %v3669_v33, 0.0  ;;  %v7400_v44 = vld [vmem:[%s7726_s4] ss:$0 sm:$0xff]  ;;  %p6004_p8 = scmp.lt.s32.totalorder %s6002_s6, %s5996_s10 }
 0x3e8   : > { %v3649_v28 = vmul.f32 %v7258_v55, %v3626_v3  ;;  %v3629_v16 = vadd.f32 %v3613_v48, %v7249_v23  ;;  %v3611_v49 = vsel %vm7337_vm3, 0.0, %v3233_v24  ;;  %v3697_v59 = vpack.c.bf16 %v3687_v20, %v3686_v29  ;;  %p5998_p7 = pnand %p5997_p4, %p7729_p0 }
 0x3e9   : > { %v3627_v60 = vadd.f32 %v3611_v49, %v7251_v38  ;;  %5359 = vmatpush3.bf16.msra.mxu0 %v5781_v46  ;;  %v3696_v12 = vpack.c.bf16 %v3685_v58, %v3684_v34  ;;  %v3674_v36 = vadd.f32 %v7268_v61, %v3651_v47  ;;  %p6005_p5 = por %p6004_p8, %p6003_p9 }
 0x3ea   : > { %v3652_v40 = vmul.f32 %v7258_v55, %v3629_v16  ;;  %5360 = vmatprep.subr.bf16.mxu0 %v5782_v45  ;;  %v3672_v17 = vadd.f32 %v7268_v61, %v3649_v28  ;;  %s7490_s12 = scalar_lea.hbm %s7728_s13, %s4678_s14  ;;  %p5999_p3 = pneg %p5998_p7 }
 0x3eb   : > { %v3650_v19 = vmul.f32 %v7258_v55, %v3627_v60  ;;  %5344 = vmatprep.mubr.bf16.mxu0 %v3696_v12  ;;  %v3690_v38 = vmax.f32 %v3674_v36, 0.0 }
 0x3ec   : > { %v3675_v23 = vadd.f32 %v7268_v61, %v3652_v40  ;;  %5345 = vmatmul.mubr.bf16.gmra.mrb[44].mxu0 %v3697_v59  ;;  %v3688_v41 = vmax.f32 %v3672_v17, 0.0  ;;  %p6006_p1 = pnand %p6005_p5, %p5999_p3 }
 0x3ed   : > { %v3673_v62 = vadd.f32 %v7268_v61, %v3650_v19  ;;  %5361 = vmatpush3.bf16.msra.mxu0 %v5782_v45  ;;  %v5787_v61 = vld [vmem:[%s6710_s15 + $0x8] sm:$0xff]  }
 0x3ee   : > { %5362 = vmatprep.subr.bf16.mxu0 %v5783_v7  ;;  %v3691_v26 = vmax.f32 %v3675_v23, 0.0 }
 0x3ef   : > { %v3689_v0 = vmax.f32 %v3673_v62, 0.0 }
 0x3f0   : > { %v3699_v31 = vpack.c.bf16 %v3691_v26, %v3690_v38 }
 0x3f1   : > { %5363 = vmatpush3.bf16.msra.mxu0 %v5783_v7  ;;  %v3698_v55 = vpack.c.bf16 %v3689_v0, %v3688_v41 }
 0x3f2   : > { %5364 = vmatprep.subr.bf16.mxu0 %v5784_v57 }
 0x3f3   : > { %5348 = vmatprep.mubr.bf16.mxu0 %v3698_v55 }
 0x3f4   : > { %5349 = vmatmul.mubr.bf16.gmra.mrb[48].mxu0 %v3699_v31 }
 0x3f5   : > { %5365 = vmatpush3.bf16.msra.mxu0 %v5784_v57  ;;  %5368 = vmatprep.mubr.bf16.mxu0 %v5786_v52 }
 0x3f6   : > { %5366 = vmatprep.subr.bf16.mxu0 %v5785_v43 }
 0x3f9   : > { %5367 = vmatpush3.bf16.msra.mxu0 %v5785_v43 }
 0x3fc   : > { %5369 = vmatmul.mubr.bf16.vlgmr.msra.gmra.mrb[52].mxu0 %v5787_v61 }
 0x3fd   : > { %5372 = vmatprep.mubr.bf16.mxu0 %v5788_v6 }
 0x404   : > { %5373 = vmatmul.mubr.bf16.gmra.mrb[56].mxu0 %v5789_v56 }
 0x405   : > { %5376 = vmatprep.mubr.bf16.mxu0 %v5790_v11 }
 0x40c   : > { %5377 = vmatmul.mubr.bf16.gmra.mrb[60].mxu0 %v5791_v30 }
 0x40d   : > { %5380 = vmatprep.mubr.bf16.mxu0 %v5792_v4 }
 0x414   : > { %5381 = vmatmul.mubr.bf16.gmra.mrb[64].mxu0 %v5793_v51 }
 0x4af   : > { %v5338_v53 = vpop.f32.mrb[36].mxu0 }
 0x4b0   : > { %v3798_v54 = vpop.f32.mrb[37].mxu0  ;;  %v3870_v8 = vmul.f32 %v5338_v53, %v7383_v10 }
 0x4b1   : > { %v5339_v50 = vpop.f32.mrb[38].mxu0  ;;  %v3868_v2 = vmul.f32 %v7383_v10, %v3798_v54 }
 0x4b2   : > { %v3801_v15 = vpop.f32.mrb[39].mxu0  ;;  %v3871_v27 = vmul.f32 %v5339_v50, %v7383_v10  ;;  %v3893_v20 = vadd.f32 %v7394_v35, %v3870_v8 }
 0x4b3   : > { %v3869_v3 = vmul.f32 %v7383_v10, %v3801_v15  ;;  %v3891_v24 = vadd.f32 %v7394_v35, %v3868_v2 }
 0x4b4   : > { %v3894_v16 = vadd.f32 %v7394_v35, %v3871_v27 }
 0x4b5   : > { %v3892_v60 = vadd.f32 %v7394_v35, %v3869_v3 }
 0x4b7   : > { %v5342_v37 = vpop.f32.mrb[40].mxu0 }
 0x4b8   : > { %v3814_v14 = vpop.f32.mrb[41].mxu0  ;;  %v3874_v40 = vmul.f32 %v5342_v37, %v7383_v10 }
 0x4b9   : > { %v5343_v18 = vpop.f32.mrb[42].mxu0  ;;  %v3872_v17 = vmul.f32 %v7383_v10, %v3814_v14 }
 0x4ba   : > { %v3817_v25 = vpop.f32.mrb[43].mxu0  ;;  %v3875_v62 = vmul.f32 %v5343_v18, %v7383_v10  ;;  %v3897_v61 = vadd.f32 %v7394_v35, %v3874_v40 }
 0x4bb   : > { %v3873_v0 = vmul.f32 %v7383_v10, %v3817_v25  ;;  %v3895_v4 = vadd.f32 %v7394_v35, %v3872_v17 }
 0x4bc   : > { %v3898_v50 = vadd.f32 %v7394_v35, %v3875_v62 }
 0x4bd   : > { %v3896_v14 = vadd.f32 %v7394_v35, %v3873_v0 }
 0x4bf   : > { %v7364_v32 = vpop.f32.mrb[44].mxu0 }
 0x4c0   : > { %v7366_v39 = vpop.f32.mrb[45].mxu0  ;;  %v3878_v8 = vmul.f32 %v7364_v32, %v7383_v10 }
 0x4c1   : > { %v7368_v5 = vpop.f32.mrb[46].mxu0 }
 0x4c2   : > { %v7370_v13 = vpop.f32.mrb[47].mxu0 }
 0x4c7   : > { %v7372_v21 = vpop.f32.mrb[48].mxu0 }
 0x4c8   : > { %v7374_v63 = vpop.f32.mrb[49].mxu0 }
 0x4c9   : > { %v7376_v42 = vpop.f32.mrb[50].mxu0 }
 0x4ca   : > { %v7378_v46 = vpop.f32.mrb[51].mxu0 }
 0x4cf   : > { %v5370_v33 = vpop.f32.mrb[52].mxu0 }
 0x4d0   : > { %v4141_v9 = vmul.f32 %v5370_v33, %v7388_v22  ;;  %v4069_v29 = vpop.f32.mrb[53].mxu0  ;;  %v3876_v33 = vmul.f32 %v7383_v10, %v7366_v39 }
 0x4d1   : > { %v4139_v1 = vmul.f32 %v7388_v22, %v4069_v29  ;;  %v5371_v45 = vpop.f32.mrb[54].mxu0  ;;  %v3879_v29 = vmul.f32 %v7368_v5, %v7383_v10 }
 0x4d2   : > { %v4164_v34 = vadd.f32 %v7400_v44, %v4141_v9  ;;  %v4142_v47 = vmul.f32 %v5371_v45, %v7388_v22  ;;  %v4072_v48 = vpop.f32.mrb[55].mxu0 }
 0x4d3   : > { %v4162_v58 = vadd.f32 %v7400_v44, %v4139_v1  ;;  %v4140_v28 = vmul.f32 %v7388_v22, %v4072_v48 }
 0x4d4   : > { %v4180_v49 = vadd.f32 %v4164_v34, %v3893_v20  ;;  %v4165_v59 = vadd.f32 %v7400_v44, %v4142_v47  ;;  %v3877_v34 = vmul.f32 %v7383_v10, %v7370_v13 }
 0x4d5   : > { %v4178_v12 = vadd.f32 %v4162_v58, %v3891_v24  ;;  %v4163_v36 = vadd.f32 %v7400_v44, %v4140_v28  ;;  %v3901_v24 = vadd.f32 %v7394_v35, %v3878_v8 }
 0x4d6   : > { %v4181_v7 = vadd.f32 %v4165_v59, %v3894_v16  ;;  %v4196_v38 = vmax.f32 %v4180_v49, 0.0  ;;  %v3899_v49 = vadd.f32 %v7394_v35, %v3876_v33 }
 0x4d7   : > { %v4179_v19 = vadd.f32 %v4163_v36, %v3892_v60  ;;  %v5374_v23 = vpop.f32.mrb[56].mxu0  ;;  %v4194_v31 = vmax.f32 %v4178_v12, 0.0  ;;  %v3902_v12 = vadd.f32 %v7394_v35, %v3879_v29 }
 0x4d8   : > { %v4197_v57 = vmax.f32 %v4181_v7, 0.0  ;;  %v4145_v26 = vmul.f32 %v5374_v23, %v7388_v22  ;;  %v4085_v41 = vpop.f32.mrb[57].mxu0  ;;  %v3900_v7 = vadd.f32 %v7394_v35, %v3877_v34  ;;  %v3882_v23 = vmul.f32 %v7372_v21, %v7383_v10 }
 0x4d9   : > { %v4195_v55 = vmax.f32 %v4179_v19, 0.0  ;;  %v4143_v52 = vmul.f32 %v7388_v22, %v4085_v41  ;;  %v5375_v43 = vpop.f32.mrb[58].mxu0  ;;  %v3883_v41 = vmul.f32 %v7376_v42, %v7383_v10 }
 0x4da   : > { %v4711_v6 = vpack.c.bf16 %v4197_v57, %v4196_v38  ;;  %v4168_v56 = vadd.f32 %v7400_v44, %v4145_v26  ;;  %v4146_v11 = vmul.f32 %v5375_v43, %v7388_v22  ;;  %v4088_v30 = vpop.f32.mrb[59].mxu0  ;;  %v3880_v38 = vmul.f32 %v7383_v10, %v7374_v63 }
 0x4db   : > { %v4706_v51 = vpack.c.bf16 %v4195_v55, %v4194_v31  ;;  %v4166_v53 = vadd.f32 %v7400_v44, %v4143_v52  ;;  %v4144_v54 = vmul.f32 %v7388_v22, %v4088_v30  ;;  %v3881_v43 = vmul.f32 %v7383_v10, %v7378_v46 }
 0x4dc   : > { %4743 = vst [vmem:[%s7431_s20 + $0x8] sm:$0xff] %v4711_v6   ;;  %v4184_v15 = vadd.f32 %v4168_v56, %v3897_v61  ;;  %v4169_v37 = vadd.f32 %v7400_v44, %v4146_v11  ;;  %v3905_v56 = vadd.f32 %v7394_v35, %v3882_v23  ;;  %v3903_v46 = vadd.f32 %v7394_v35, %v3880_v38 }
 0x4dd   : > { %4707 = vst [vmem:[%s7431_s20] sm:$0xff] %v4706_v51   ;;  %v4182_v18 = vadd.f32 %v4166_v53, %v3895_v4  ;;  %v4167_v25 = vadd.f32 %v7400_v44, %v4144_v54  ;;  %v3906_v54 = vadd.f32 %v7394_v35, %v3883_v41 }
 0x4de   : > { %v4185_v2 = vadd.f32 %v4169_v37, %v3898_v50  ;;  %v4200_v3 = vmax.f32 %v4184_v15, 0.0  ;;  %v3904_v37 = vadd.f32 %v7394_v35, %v3881_v43 }
 0x4df   : > { %v4183_v27 = vadd.f32 %v4167_v25, %v3896_v14  ;;  %v5378_v9 = vpop.f32.mrb[60].mxu0  ;;  %v4198_v47 = vmax.f32 %v4182_v18, 0.0 }
 0x4e0   : > { %v4201_v1 = vmax.f32 %v4185_v2, 0.0  ;;  %v4149_v45 = vmul.f32 %v5378_v9, %v7388_v22  ;;  %v4101_v20 = vpop.f32.mrb[61].mxu0 }
 0x4e1   : > { %v4199_v32 = vmax.f32 %v4183_v27, 0.0  ;;  %v4147_v48 = vmul.f32 %v7388_v22, %v4101_v20  ;;  %v5379_v39 = vpop.f32.mrb[62].mxu0 }
 0x4e2   : > { %v4721_v58 = vpack.c.bf16 %v4201_v1, %v4200_v3  ;;  %v4172_v5 = vadd.f32 %v7400_v44, %v4149_v45  ;;  %v4150_v28 = vmul.f32 %v5379_v39, %v7388_v22  ;;  %v4104_v16 = vpop.f32.mrb[63].mxu0 }
 0x4e3   : > { %v4716_v59 = vpack.c.bf16 %v4199_v32, %v4198_v47  ;;  %v4170_v60 = vadd.f32 %v7400_v44, %v4147_v48  ;;  %v4148_v13 = vmul.f32 %v7388_v22, %v4104_v16 }
 0x4e4   : > { %4745 = vst [vmem:[%s7431_s20 + $0x18] sm:$0xff] %v4721_v58   ;;  %v4188_v36 = vadd.f32 %v4172_v5, %v3901_v24  ;;  %v4173_v40 = vadd.f32 %v7400_v44, %v4150_v28 }
 0x4e5   : > { %4744 = vst [vmem:[%s7431_s20 + $0x10] sm:$0xff] %v4716_v59   ;;  %v4186_v17 = vadd.f32 %v4170_v60, %v3899_v49  ;;  %v4171_v19 = vadd.f32 %v7400_v44, %v4148_v13 }
 0x4e6   : > { %v4189_v62 = vadd.f32 %v4173_v40, %v3902_v12  ;;  %v4204_v0 = vmax.f32 %v4188_v36, 0.0 }
 0x4e7   : > { %v4187_v57 = vadd.f32 %v4171_v19, %v3900_v7  ;;  %v5382_v26 = vpop.f32.mrb[64].mxu0  ;;  %v4202_v21 = vmax.f32 %v4186_v17, 0.0 }
 0x4e8   : > { %v4205_v31 = vmax.f32 %v4189_v62, 0.0  ;;  %v4153_v55 = vmul.f32 %v5382_v26, %v7388_v22  ;;  %v4117_v52 = vpop.f32.mrb[65].mxu0 }
 0x4e9   : > { %v4203_v61 = vmax.f32 %v4187_v57, 0.0  ;;  %v4151_v63 = vmul.f32 %v7388_v22, %v4117_v52  ;;  %v5383_v6 = vpop.f32.mrb[66].mxu0 }
 0x4ea   : > { %v4731_v11 = vpack.c.bf16 %v4205_v31, %v4204_v0  ;;  %v4176_v42 = vadd.f32 %v7400_v44, %v4153_v55  ;;  %v4154_v30 = vmul.f32 %v5383_v6, %v7388_v22  ;;  %v4120_v4 = vpop.f32.mrb[67].mxu0 }
 0x4eb   : > { %v4726_v10 = vpack.c.bf16 %v4203_v61, %v4202_v21  ;;  %v4174_v51 = vadd.f32 %v7400_v44, %v4151_v63  ;;  %v4152_v53 = vmul.f32 %v7388_v22, %v4120_v4 }
 0x4ec   : > { %4747 = vst [vmem:[%s7431_s20 + $0x28] sm:$0xff] %v4731_v11   ;;  %v4192_v50 = vadd.f32 %v4176_v42, %v3905_v56  ;;  %v4177_v15 = vadd.f32 %v7400_v44, %v4154_v30 }
 0x4ed   : > { %4746 = vst [vmem:[%s7431_s20 + $0x20] sm:$0xff] %v4726_v10   ;;  %v4190_v14 = vadd.f32 %v4174_v51, %v3903_v46  ;;  %v4175_v18 = vadd.f32 %v7400_v44, %v4152_v53 }
 0x4ee   : > { %v4193_v25 = vadd.f32 %v4177_v15, %v3906_v54  ;;  %v4208_v22 = vmax.f32 %v4192_v50, 0.0 }
 0x4ef   : > { %v4191_v8 = vadd.f32 %v4175_v18, %v3904_v37  ;;  %v4206_v33 = vmax.f32 %v4190_v14, 0.0 }
 0x4f0   : > { %v4209_v2 = vmax.f32 %v4193_v25, 0.0 }
 0x4f1   : > { %v4207_v27 = vmax.f32 %v4191_v8, 0.0 }
 0x4f2   : > { %v4741_v9 = vpack.c.bf16 %v4209_v2, %v4208_v22 }
 0x4f3   : > { %v4736_v35 = vpack.c.bf16 %v4207_v27, %v4206_v33 }
 0x4f4   : > { %4749 = vst [vmem:[%s7431_s20 + $0x38] sm:$0xff] %v4741_v9  }
 0x4f5   : > { %4748 = vst [vmem:[%s7431_s20 + $0x30] sm:$0xff] %v4736_v35  }
 0x4f6   : > { %6009 = shalt.err (!%p6006_p1)
}
 0x4f7   : > { %s6010_s29 = scalar_lea.hbm %s7490_s12, 1024  ;;  %s6014_s20 = scalar_lea.hbm %s7728_s13, 4096 }
 0x4f8   : > { %p6011_p11 = scmp.ne.s32.totalorder %s7490_s12, %s6010_s29  ;;  %p6015_p2 = scmp.lt.u32.totalorder %s7490_s12, %s7728_s13 }
 0x4f9   : > { %p6016_p12 = scmp.lt.u32.totalorder %s6014_s20, %s6010_s29  ;;  %p6018_p4 = scmp.lt.u32.totalorder %s6010_s29, %s7490_s12 }
 0x4fa   : > { %p6012_p10 = pnand %p6011_p11, %p7729_p0 }
 0x4fb   : > { %p6017_p6 = por %p6016_p12, %p6015_p2 }
 0x4fc   : > { %p6013_p13 = pneg %p6012_p10 }
 0x4fd   : > { %p6019_p7 = por %p6018_p4, %p6017_p6 }
 0x4ff   : > { %p6020_p3 = pnand %p6019_p7, %p6013_p13 }
 0x501   : > { %6023 = shalt.err (!%p6020_p3)
}
 0x502   : > { %s6173_s28 = smov 64   ;;  %s6174_s17 = smov 4  }
 0x503   : > { %5502 = dma.vmem_to_hbm [thread:$0]  (%p7729_p0), %s7485_s9, 1024, %s7490_s12, %s4291_s22, %s6173_s28, %s6173_s28, %s6174_s17  }
 0x504 PF: > { %p5540_p9 = scmp.ge.s32.totalorder %s6158_s16, 2  ;;  %s4321_s14 = sand.u32 1, %s6130_s24  }
 0x505   : > { %p7730_p8 = scmp.ne.s32.totalorder %s7672_s7, 0  ;;  %s4322_s15 = scalar_lea.sflag [#allocation5], %s4321_s14 }
 0x507   : > { %p5528_p5 = pnand %p5540_p9, %p7730_p8 }
 0x509   : > { %6101 = dma.done.wait (!%p5528_p5), %s4322_s15, 1024  }
 0x50a   : > { %6103 = vsyncadd (!%p5528_p5), %s4322_s15, 4294966272  ;;  %s36_s16 = sadd.s32 1, %s6158_s16   ;;  %s7732_s2 = sld [smem:[#allocation23_spill]] }
 0x50b   : > { %p7523_p1 = scmp.ge.s32.totalorder %s36_s16, 6   ;;  %s7733_s5 = sld [smem:[#allocation24_spill]] }
 0x50c   : > { %s7734_s9 = sld [smem:[#allocation25_spill]]  ;;  %s7735_s12 = smov %s6444_s21 }
 0x50d   : > { %s7736_s10 = smov %s6552_s19  ;;  %s7737_s7 = sld [smem:[#allocation28_spill]] }
 0x50e   : > { %s7738_s28 = sld [smem:[#allocation29_spill]]  ;;  %s7739_s29 = sld [smem:[#allocation31_spill]] }
 0x50f   : > { %s7740_s30 = sld [smem:[#allocation32_spill]]  ;;  %s7744_s20 = smov %s7767_s27 }
 0x510   : > { %s7742_s18 = smov %s7732_s2  ;;  %s7746_s22 = smov %s6126_s23 }
 0x511   : > { %s7743_s19 = smov %s7733_s5  ;;  %s7747_s23 = smov %s7735_s12 }
 0x512   : > { %s7745_s21 = smov %s7734_s9  ;;  %s7748_s24 = smov %s6134_s25 }
 0x513   : > { %s7749_s25 = smov %s6138_s26  ;;  %s7750_s26 = smov %s7736_s10 }
 0x514   : > { %s7751_s27 = smov %s7737_s7  ;;  %35 = sbr.rel (!%p7523_p1) target bundleno = 31 (0x1f), region = 173 }
 0x51b   :  { %4327 = vsyncpa [#allocation4], 1 }
 0x51c   :  { %4329 = vsyncpa [#allocation4 + $0x1], 1 }
 0x51d   :  { %4330 = vsyncpa [#allocation7], 1 }
 0x51e   :  { %4332 = vsyncpa [#allocation7 + $0x1], 1 }
 0x51f   :  { %4333 = vsyncpa [#allocation10], 1 }
 0x520   :  { %4334 = vsyncpa [#allocation13], 1 }
 0x521   :  { %4335 = vsyncpa [#allocation5], 1 }
 0x522   :  { %4337 = vsyncpa [#allocation5 + $0x1], 1 }

// kernel: tpu_custom_call.1
= control target key start
LH: loop header
LB: loop body
LE: loop exit
PB: predicated region body
PF: predicated region fallthrough
CT: control target
= control target key end

     0   :  { %s7570_s0 = inlined_call_operand.hbm [shape: bf16[2,256,128], index: 0, kind: input, shape index: {}]   ;;  %s7571_s1 = inlined_call_operand.hbm [shape: bf16[2,256,128], index: 1, kind: input, shape index: {}]   ;;  %s7572_s2 = inlined_call_operand.hbm [shape: bf16[2,256,128], index: 2, kind: input, shape index: {}]   ;;  %s7573_s3 = inlined_call_operand.hbm [shape: bf16[128,128], index: 3, kind: input, shape index: {}]   ;;  %s7574_s4 = inlined_call_operand.vmem [shape: f32[1,128], index: 4, kind: input, shape index: {}]   ;;  %s7575_s5 = inlined_call_operand.vmem [shape: f32[1,128], index: 5, kind: input, shape index: {}]   ;;  %s7576_s6 = inlined_call_operand.hbm [shape: bf16[9,128,128], index: 6, kind: input, shape index: {}]   ;;  %s7577_s7 = inlined_call_operand.vmem [shape: f32[1,128], index: 7, kind: input, shape index: {}]   ;;  %s7578_s8 = inlined_call_operand.vmem [shape: f32[1,128], index: 8, kind: input, shape index: {}]   ;;  %s7579_s9 = inlined_call_operand.hbm [shape: bf16[128,128], index: 9, kind: input, shape index: {}]   ;;  %s7580_s10 = inlined_call_operand.vmem [shape: f32[1,128], index: 10, kind: input, shape index: {}]   ;;  %s7581_s11 = inlined_call_operand.vmem [shape: f32[1,128], index: 11, kind: input, shape index: {}]   ;;  %s7582_s12 = inlined_call_operand.hbm [shape: bf16[128,128], index: 12, kind: input, shape index: {}]   ;;  %s7583_s13 = inlined_call_operand.vmem [shape: f32[1,128], index: 13, kind: input, shape index: {}]   ;;  %s7584_s14 = inlined_call_operand.vmem [shape: f32[1,128], index: 14, kind: input, shape index: {}]   ;;  %s7585_s15 = inlined_call_operand.hbm [shape: bf16[2,256,128], index: 15, kind: output, shape index: {}]  }
   0x1   :  { %7621 = sst [smem:[#allocation36_spill]] %s7570_s0 }
   0x2   :  { %7622 = sst [smem:[#allocation37_spill]] %s7571_s1 }
   0x3   :  { %7623 = sst [smem:[#allocation38_spill]] %s7572_s2 }
   0x4   :  { %7624 = sst [smem:[#allocation39_spill]] %s7573_s3 }
   0x5   :  { %7625 = sst [smem:[#allocation40_spill]] %s7574_s4 }
   0x6   :  { %7626 = sst [smem:[#allocation41_spill]] %s7575_s5 }
   0x7   :  { %7627 = sst [smem:[#allocation42_spill]] %s7576_s6 }
   0x8   :  { %7628 = sst [smem:[#allocation43_spill]] %s7577_s7 }
   0x9   :  { %7629 = sst [smem:[#allocation44_spill]] %s7578_s8 }
   0xa   :  { %7630 = sst [smem:[#allocation45_spill]] %s7579_s9 }
   0xb   :  { %7631 = sst [smem:[#allocation46_spill]] %s7580_s10 }
   0xc   :  { %7632 = sst [smem:[#allocation47_spill]] %s7581_s11 }
   0xd   :  { %7633 = sst [smem:[#allocation48_spill]] %s7582_s12 }
   0xe   :  { %7634 = sst [smem:[#allocation49_spill]] %s7583_s13 }
   0xf   :  { %7635 = sst [smem:[#allocation50_spill]] %s7584_s14 }
  0x10   :  { %7636 = sst [smem:[#allocation51_spill]] %s7585_s15 }
  0x11   :  { %20 = vsyncpa [#allocation4], 0 }
  0x12   :  { %22 = vsyncpa [#allocation4 + $0x1], 0 }
  0x13   :  { %23 = vsyncpa [#allocation7], 0 }
  0x14   :  { %25 = vsyncpa [#allocation7 + $0x1], 0 }
  0x15   :  { %26 = vsyncpa [#allocation10], 0 }
  0x16   :  { %27 = vsyncpa [#allocation13], 0 }
  0x17   :  { %28 = vsyncpa [#allocation5], 0 }
  0x18   :  { %30 = vsyncpa [#allocation5 + $0x1], 0  ;;  %s6255_s18 = smov 0   ;;  %s6257_s19 = smov 0  }
  0x19   :  { %s6259_s20 = smov 0   ;;  %s6261_s21 = smov 0  }
  0x1a   :  { %s6263_s22 = smov 0   ;;  %s6265_s23 = smov 0  }
  0x1b   :  { %s6267_s24 = smov 0   ;;  %s6269_s25 = smov 0  }
  0x1c   :  { %s6271_s26 = smov 0   ;;  %s6273_s27 = smov 0  }
  0x1d   :  { %s6275_s28 = smov 0   ;;  %s6277_s29 = smov 0  }
  0x1e   :  { %s6279_s30 = smov 0   ;;  %s6281_s16 = smov 0  }
  0x1f LB: > { %7637 = sst [smem:[#allocation22_spill]] %s6106_s18  ;;  %s6326_s17 = sadd.s32 4294967295, %s6158_s16   ;;  %s6158_s16 = sphi %s6281_s16, %s36_s16   ;;  %s6154_s30 = sphi %s6279_s30, %s7740_s30   ;;  %s6150_s29 = sphi %s6277_s29, %s7739_s29   ;;  %s6146_s28 = sphi %s6275_s28, %s7738_s28   ;;  %s6142_s27 = sphi %s6273_s27, %s7751_s27   ;;  %s6138_s26 = sphi %s6271_s26, %s7750_s26   ;;  %s6134_s25 = sphi %s6269_s25, %s7749_s25   ;;  %s6130_s24 = sphi %s6267_s24, %s7748_s24   ;;  %s6126_s23 = sphi %s6265_s23, %s7747_s23   ;;  %s6122_s22 = sphi %s6263_s22, %s7746_s22   ;;  %s6118_s21 = sphi %s6261_s21, %s7745_s21   ;;  %s6114_s20 = sphi %s6259_s20, %s7744_s20   ;;  %s6110_s19 = sphi %s6257_s19, %s7743_s19   ;;  %s6106_s18 = sphi %s6255_s18, %s7742_s18  }
  0x20   : > { %7638 = sst [smem:[#allocation23_spill]] %s6110_s19  ;;  %p4491_p0 = scmp.ge.s32.totalorder %s6158_s16, 1 }
  0x21   : > { %7639 = sst [smem:[#allocation24_spill]] %s6114_s20  ;;  %p7589_p1 = scmp.eq.s32.totalorder %s6326_s17, 0 }
  0x22   : > { %7640 = sst [smem:[#allocation25_spill]] %s6122_s22  ;;  %p433_p2 = scmp.lt.s32.totalorder %s6158_s16, 5 }
  0x23   : > { %7641 = sst [smem:[#allocation26_spill]] %s6142_s27  ;;  %s6161_s13 = smov [#allocation12]  }
  0x24   : > { %7642 = sst [smem:[#allocation27_spill]] %s6146_s28  ;;  %p6331_p3 = pnand %p4491_p0, %p433_p2 }
  0x25   : > { %7643 = sst [smem:[#allocation28_spill]] %s6150_s29  ;;  %s6160_s28 = smov [#allocation9]  }
  0x26   : > { %7644 = sst [smem:[#allocation29_spill]] %s6154_s30  ;;  %s445_s14 = sshll.u32 %s6160_s28, 4  ;;  %s446_s14 = int_to_ptr.vmem [resolvable:$true] %s445_s14 }
  0x27   : > { %s7645_s15 = scalar_select %p6331_p3, 1, 0 }
  0x28   : > { %p5504_p4 = pneg %p6331_p3  ;;  %s483_s10 = sshll.u32 %s6161_s13, 4  ;;  %s6343_s10 = int_to_ptr.vmem [resolvable:$true] %s483_s10 }
  0x29   : > { %7646 = sst [smem:[#allocation30_spill]] %s7645_s15  ;;  %s7648_s3 = sld [smem:[#allocation39_spill]] }
  0x2a   : > { %p6339_p5 = pnand %p5504_p4, %p7589_p1 }
  0x2c   : > { %s7647_s11 = scalar_select %p6339_p5, 1, 0 }
  0x2d   : > { %p6353_p7 = pneg %p6339_p5 }
  0x2f   : > { %s5794_s5 = scalar_lea.hbm %s7648_s3, 1024 }
  0x30   : > { %p5795_p6 = scmp.ne.s32.totalorder %s7648_s3, %s5794_s5  ;;  %p5801_p10 = scmp.lt.u32.totalorder %s5794_s5, %s7648_s3 }
  0x32   : > { %p5797_p8 = pnand %p6353_p7, %p5795_p6 }
  0x34   : > { %p5798_p9 = pneg %p5797_p8 }
  0x36   : > { %p5803_p11 = pnand %p5801_p10, %p5798_p9 }
  0x38   : > { %5806 = shalt.err (!%p5803_p11)
}
  0x39   : > { %s5807_s7 = scalar_lea.vmem %s446_s14, 1024  ;;  %p5815_p2 = scmp.lt.s32.totalorder %s446_s14, %s446_s14 }
  0x3a   : > { %p5808_p12 = scmp.ne.s32.totalorder %s446_s14, %s5807_s7  ;;  %p5816_p4 = scmp.lt.s32.totalorder %s5807_s7, %s5807_s7 }
  0x3c   : > { %p5810_p13 = pnand %p5808_p12, %p6353_p7  ;;  %p5817_p1 = por %p5816_p4, %p5815_p2 }
  0x3e   : > { %p5811_p0 = pneg %p5810_p13 }
  0x40   : > { %p5818_p3 = pnand %p5817_p1, %p5811_p0 }
  0x42   : > { %5821 = shalt.err (!%p5818_p3)
}
  0x43   : > { %s7594_s4 = smov 64   ;;  %s7596_s8 = smov 4  }
  0x44   : > { %5507 = dma.hbm_to_vmem [thread:$0]  (!%p6339_p5), %s7648_s3, 1024, %s446_s14, [#allocation10], %s7594_s4, %s7594_s4, %s7596_s8  }
  0x45   : > { %s7650_s9 = sld [smem:[#allocation45_spill]] }
  0x4b   : > { %s5822_s2 = scalar_lea.hbm %s7650_s9, 1024 }
  0x4c   : > { %p5823_p1 = scmp.ne.s32.totalorder %s7650_s9, %s5822_s2  ;;  %p5829_p8 = scmp.lt.u32.totalorder %s5822_s2, %s7650_s9 }
  0x4e   : > { %p5825_p3 = pnand %p5823_p1, %p6353_p7 }
  0x50   : > { %p5826_p6 = pneg %p5825_p3 }
  0x52   : > { %p5831_p9 = pnand %p5829_p8, %p5826_p6 }
  0x54   : > { %5834 = shalt.err (!%p5831_p9)
}
  0x55   : > { %s5835_s14 = scalar_lea.vmem %s6343_s10, 1024  ;;  %p5843_p13 = scmp.lt.s32.totalorder %s6343_s10, %s6343_s10 }
  0x56   : > { %p5836_p10 = scmp.ne.s32.totalorder %s6343_s10, %s5835_s14  ;;  %p5844_p0 = scmp.lt.s32.totalorder %s5835_s14, %s5835_s14 }
  0x58   : > { %p5838_p11 = pnand %p5836_p10, %p6353_p7  ;;  %p5845_p2 = por %p5844_p0, %p5843_p13 }
  0x5a   : > { %p5839_p12 = pneg %p5838_p11 }
  0x5c   : > { %p5846_p4 = pnand %p5845_p2, %p5839_p12 }
  0x5e   : > { %5849 = shalt.err (!%p5846_p4)
}
  0x5f   : > { %5513 = dma.hbm_to_vmem [thread:$0]  (!%p6339_p5), %s7650_s9, 1024, %s6343_s10, [#allocation13], %s7594_s4, %s7594_s4, %s7596_s8  }
  0x60   : > { %s45_s19 = sadd.s32 1, %s6150_s29  ;;  %s48_s20 = sadd.s32 1, %s6154_s30 }
  0x61   : > { %p46_p1 = scmp.ge.s32.totalorder %s45_s19, 2  ;;  %p7608_p3 = scmp.eq.s32.totalorder %s6158_s16, 0 }
  0x62   : > { %s4485_s5 = sshll.u32 %s6150_s29, 3  ;;  %s93_s15 = sadd.s32 1, %s6126_s23 }
  0x63   : > { %s7753_s19 = smov (%p46_p1, %s45_s19), 0  ;;  %s7755_s20 = smov (!%p46_p1, %s48_s20), %s6154_s30 }
  0x64   : > { %7651 = sst [smem:[#allocation31_spill]] %s7753_s19  ;;  %s53_s27 = ssub.s32 %s6150_s29, %s7753_s19 }
  0x65   : > { %s4486_s13 = sadd.s32 4294967295, %s4485_s5  ;;  %p50_p6 = scmp.ge.s32.totalorder %s7755_s20, 2 }
  0x66   : > { %p82_p8 = scmp.gt.s32.totalorder %s4486_s13, 0  ;;  %s4487_s10 = sshll.u32 %s7753_s19, 3 }
  0x67   : > { %p100_p9 = scmp.ne.s32.totalorder %s6126_s23, %s6122_s22  ;;  %s7757_s20 = smov (%p50_p6, %s7755_s20), 0 }
  0x68   : > { %7652 = sst [smem:[#allocation32_spill]] %s7757_s20  ;;  %s7759_s13 = smov (!%p82_p8, %s4486_s13), 0 }
  0x69   : > { %s6415_s7 = ssub.s32 %s6154_s30, %s7757_s20  ;;  %s4488_s14 = sadd.s32 4294967295, %s4487_s10 }
  0x6a   : > { %7653 = sst [smem:[#allocation33_spill]] %s6415_s7  ;;  %s6418_s2 = sor.u32 %s53_s27, %s6415_s7 }
  0x6b   : > { %p86_p10 = scmp.gt.s32.totalorder %s4488_s14, 0  ;;  %p6423_p12 = por %p100_p9, %p7608_p3 }
  0x6c   : > { %p106_p13 = scmp.ne.s32.totalorder %s6122_s22, %s6118_s21  ;;  %s6429_s4 = sadd.s32 8, %s4485_s5 }
  0x6d   : > { %s7761_s14 = smov (!%p86_p10, %s4488_s14), 0  ;;  %7655 = sst [smem:[#allocation34_spill]] %s6429_s4 }
  0x6e   : > { %s89_s8 = ssub.s32 %s7759_s13, %s7761_s14  ;;  %p7656_p2 = scmp.eq.s32.totalorder %s6326_s17, 0 }
  0x6f   : > { %s90_s27 = sor.u32 %s89_s8, %s6415_s7  ;;  %s6439_s9 = sadd.s32 8, %s4487_s10 }
  0x70   : > { %p6435_p4 = por %p106_p13, %p7656_p2  ;;  %p91_p1 = scmp.eq.s32.totalorder %s90_s27, 0 }
  0x71   : > { %p7607_p8 = scmp.lt.s32.totalorder %s6158_s16, 4  ;;  %s6447_s5 = sshll.u32 %s6154_s30, 5 }
  0x72   : > { %s7657_s3 = scalar_select %p6435_p4, 1, 0 }
  0x73   : > { %s6444_s21 = scalar_select %p91_p1, %s6126_s23, %s93_s15  }
  0x74   : > { %7658 = sst [smem:[#allocation35_spill]] %s7657_s3  ;;  %s545_s14 = sand.u32 1, %s6158_s16  }
  0x75   : > { %s547_s8 = sand.u32 1, %s6126_s23   ;;  %s4504_s19 = sshll.u32 %s7759_s13, 1 }
  0x76   : > { %s4501_s20 = sshll.u32 %s547_s8, 3  ;;  %s559_s22 = sadd.s32 %s4504_s19, %s6447_s5 }
  0x77   : > { %s4506_s7 = sshll.u32 %s559_s22, 6  ;;  %s549_s3 = scalar_lea.vmem [#allocation6], %s4501_s20 }
  0x78   : > { %s562_s27 = sshll.u32 %s549_s3, 4  ;;  %s7659_s1 = sld [smem:[#allocation37_spill]]  ;;  %s6457_s27 = int_to_ptr.vmem [resolvable:$true] %s562_s27 }
  0x79   : > { %p6463_p9 = pnand %p7607_p8, %p6423_p12  ;;  %s6164_s3 = smov [#allocation11]  }
  0x7a   : > { %s464_s22 = sshll.u32 %s6164_s3, 4  ;;  %s6469_s0 = scalar_lea.sflag [#allocation7], %s545_s14  ;;  %s6467_s22 = int_to_ptr.vmem [resolvable:$true] %s464_s22 }
  0x7b   : > { %p5852_p13 = pneg %p6463_p9 }
  0x7e   : > { %s6455_s10 = scalar_lea.hbm %s7659_s1, %s4506_s7  ;;  %s5855_s13 = scalar_lea.hbm %s7659_s1, 4096 }
  0x7f   : > { %s5850_s4 = scalar_lea.hbm %s6455_s10, 128  ;;  %p5856_p12 = scmp.lt.u32.totalorder %s6455_s10, %s7659_s1 }
  0x80   : > { %p5851_p10 = scmp.ne.s32.totalorder %s6455_s10, %s5850_s4  ;;  %p5857_p6 = scmp.lt.u32.totalorder %s5855_s13, %s5850_s4 }
  0x81   : > { %p5859_p8 = scmp.lt.u32.totalorder %s5850_s4, %s6455_s10 }
  0x82   : > { %p5853_p2 = pnand %p5852_p13, %p5851_p10  ;;  %p5858_p0 = por %p5857_p6, %p5856_p12 }
  0x84   : > { %p5854_p1 = pneg %p5853_p2  ;;  %p5860_p3 = por %p5859_p8, %p5858_p0 }
  0x86   : > { %p5861_p11 = pnand %p5860_p3, %p5854_p1 }
  0x88   : > { %5864 = shalt.err (!%p5861_p11)
}
  0x89   : > { %s5865_s14 = scalar_lea.vmem %s6457_s27, 128  ;;  %s6165_s8 = smov [#allocation6]  }
  0x8a   : > { %p5866_p10 = scmp.ne.s32.totalorder %s6457_s27, %s5865_s14  ;;  %s5870_s3 = sshll.u32 %s6165_s8, 4  ;;  %s5871_s3 = int_to_ptr.vmem [resolvable:$false] %s5870_s3 }
  0x8b   : > { %s5872_s19 = scalar_lea.vmem %s5871_s3, 256  ;;  %p5873_p5 = scmp.lt.s32.totalorder %s6457_s27, %s5871_s3 }
  0x8c   : > { %p5868_p2 = pnand %p5866_p10, %p5852_p13  ;;  %p5874_p6 = scmp.lt.s32.totalorder %s5872_s19, %s5865_s14 }
  0x8e   : > { %p5869_p4 = pneg %p5868_p2  ;;  %p5875_p12 = por %p5874_p6, %p5873_p5 }
  0x90   : > { %p5876_p0 = pnand %p5875_p12, %p5869_p4 }
  0x92   : > { %5879 = shalt.err (!%p5876_p0)
}
  0x93   : > { %s7661_s4 = smov 4   ;;  %s7662_s20 = smov 64  }
  0x94   : > { %5523 = dma.hbm_to_vmem [thread:$0]  (!%p6463_p9), %s6455_s10, 128, %s6457_s27, %s6469_s0, %s7662_s20, %s7662_s20, %s7661_s4  }
  0x95   : > { %s7663_s6 = sld [smem:[#allocation42_spill]] }
  0x9b   : > { %s5880_s18 = scalar_lea.hbm %s7663_s6, 9216 }
  0x9c   : > { %p5881_p5 = scmp.ne.s32.totalorder %s7663_s6, %s5880_s18  ;;  %p5887_p4 = scmp.lt.u32.totalorder %s5880_s18, %s7663_s6 }
  0x9e   : > { %p5883_p3 = pnand %p5881_p5, %p6353_p7 }
  0xa0   : > { %p5884_p11 = pneg %p5883_p3 }
  0xa2   : > { %p5889_p8 = pnand %p5887_p4, %p5884_p11 }
  0xa4   : > { %5892 = shalt.err (!%p5889_p8)
}
  0xa5   : > { %s5893_s27 = scalar_lea.vmem %s6467_s22, 9216  ;;  %p5901_p10 = scmp.lt.s32.totalorder %s6467_s22, %s6467_s22 }
  0xa6   : > { %p5894_p9 = scmp.ne.s32.totalorder %s6467_s22, %s5893_s27  ;;  %p5902_p2 = scmp.lt.s32.totalorder %s5893_s27, %s5893_s27 }
  0xa8   : > { %p5896_p13 = pnand %p5894_p9, %p6353_p7  ;;  %p5903_p6 = por %p5902_p2, %p5901_p10 }
  0xaa   : > { %p5897_p1 = pneg %p5896_p13 }
  0xac   : > { %p5904_p12 = pnand %p5903_p6, %p5897_p1 }
  0xae   : > { %5907 = shalt.err (!%p5904_p12)
}
  0xaf   : > { %p7664_p0 = scmp.ne.s32.totalorder %s7647_s11, 0  ;;  %s6166_s13 = smov [#allocation14]  }
  0xb0   : > { %s502_s7 = sshll.u32 %s6166_s13, 4  ;;  %s7665_s12 = sld [smem:[#allocation48_spill]]  ;;  %s503_s7 = int_to_ptr.vmem [resolvable:$true] %s502_s7 }
  0xb1   : > { %5510 = dma.hbm_to_vmem [thread:$0]  (!%p7664_p0), %s7663_s6, 9216, %s6467_s22, [#allocation10], %s7662_s20, %s7662_s20, %s7661_s4  }
  0xb6   : > { %s5908_s3 = scalar_lea.hbm %s7665_s12, 1024 }
  0xb7   : > { %p5909_p5 = scmp.ne.s32.totalorder %s7665_s12, %s5908_s3  ;;  %p5915_p4 = scmp.lt.u32.totalorder %s5908_s3, %s7665_s12 }
  0xb9   : > { %p5911_p3 = pnand %p5909_p5, %p6353_p7 }
  0xbb   : > { %p5912_p11 = pneg %p5911_p3 }
  0xbd   : > { %p5917_p8 = pnand %p5915_p4, %p5912_p11 }
  0xbf   : > { %5920 = shalt.err (!%p5917_p8)
}
  0xc0   : > { %s5921_s22 = scalar_lea.vmem %s503_s7, 1024  ;;  %p5929_p10 = scmp.lt.s32.totalorder %s503_s7, %s503_s7 }
  0xc1   : > { %p5922_p9 = scmp.ne.s32.totalorder %s503_s7, %s5921_s22  ;;  %p5930_p2 = scmp.lt.s32.totalorder %s5921_s22, %s5921_s22 }
  0xc3   : > { %p5924_p13 = pnand %p5922_p9, %p6353_p7  ;;  %p5931_p6 = por %p5930_p2, %p5929_p10 }
  0xc5   : > { %p5925_p1 = pneg %p5924_p13 }
  0xc7   : > { %p5932_p12 = pnand %p5931_p6, %p5925_p1 }
  0xc9   : > { %5935 = shalt.err (!%p5932_p12)
}
  0xca   : > { %5516 = dma.hbm_to_vmem [thread:$0]  (!%p7664_p0), %s7665_s12, 1024, %s503_s7, [#allocation13], %s7662_s20, %s7662_s20, %s7661_s4  }
  0xcb   : > { %s4484_s11 = sadd.s32 4294967294, %s6158_s16   ;;  %s57_s28 = sadd.s32 1, %s6138_s26 }
  0xcc   : > { %p7666_p7 = scmp.eq.s32.totalorder %s6418_s2, 0  ;;  %p64_p5 = scmp.ne.s32.totalorder %s6138_s26, %s6134_s25 }
  0xcd   : > { %p70_p3 = scmp.ne.s32.totalorder %s6134_s25, %s6130_s24  ;;  %p420_p11 = scmp.eq.s32.totalorder %s6326_s17, 3 }
  0xce   : > { %s6552_s19 = scalar_select %p7666_p7, %s6138_s26, %s57_s28  }
  0xcf   : > { %p426_p4 = scmp.eq.s32.totalorder %s4484_s11, 3  ;;  %p7667_p8 = scmp.eq.s32.totalorder %s6158_s16, 0 }
  0xd0   : > { %p7669_p13 = scmp.eq.s32.totalorder %s6326_s17, 0  ;;  %p6571_p0 = por %p420_p11, %p64_p5 }
  0xd1   : > { %p6561_p9 = por %p7667_p8, %p64_p5  ;;  %p6575_p10 = por %p426_p4, %p70_p3 }
  0xd2   : > { %p6567_p1 = por %p7669_p13, %p70_p3  ;;  %s522_s8 = sand.u32 1, %s6138_s26  }
  0xd3   : > { %s7671_s2 = scalar_select %p6571_p0, 1, 0 }
  0xd4   : > { %s7672_s7 = scalar_select %p6575_p10, 1, 0 }
  0xd5   : > { %s4498_s3 = sshll.u32 %s6150_s29, 4  ;;  %s4497_s15 = sshll.u32 %s522_s8, 6 }
  0xd6   : > { %s532_s14 = sadd.s32 %s6447_s5, %s4498_s3  ;;  %s526_s22 = scalar_lea.vmem [#allocation3], %s4497_s15 }
  0xd7   : > { %s4500_s27 = sshll.u32 %s532_s14, 6  ;;  %s535_s1 = sshll.u32 %s526_s22, 4  ;;  %s6587_s1 = int_to_ptr.vmem [resolvable:$true] %s535_s1 }
  0xd8   : > { %s7673_s28 = sld [smem:[#allocation36_spill]]  ;;  %p7675_p2 = scmp.lt.s32.totalorder %s6158_s16, 4 }
  0xd9   : > { %s6597_s3 = scalar_lea.sflag [#allocation4], %s522_s8 }
  0xda   : > { %p6593_p6 = pnand %p7675_p2, %p6561_p9 }
  0xdc   : > { %p5938_p7 = pneg %p6593_p6 }
  0xde   : > { %s7674_s6 = smov %s7673_s28  ;;  %s6585_s12 = scalar_lea.hbm %s7673_s28, %s4500_s27 }
  0xdf   : > { %s5936_s15 = scalar_lea.hbm %s6585_s12, 1024  ;;  %s5941_s13 = scalar_lea.hbm %s7674_s6, 4096 }
  0xe0   : > { %p5937_p12 = scmp.ne.s32.totalorder %s6585_s12, %s5936_s15  ;;  %p5942_p11 = scmp.lt.u32.totalorder %s6585_s12, %s7674_s6 }
  0xe1   : > { %p5943_p4 = scmp.lt.u32.totalorder %s5941_s13, %s5936_s15  ;;  %p5945_p9 = scmp.lt.u32.totalorder %s5936_s15, %s6585_s12 }
  0xe2   : > { %p5939_p5 = pnand %p5938_p7, %p5937_p12 }
  0xe3   : > { %p5944_p8 = por %p5943_p4, %p5942_p11 }
  0xe4   : > { %p5940_p3 = pneg %p5939_p5 }
  0xe5   : > { %p5946_p13 = por %p5945_p9, %p5944_p8 }
  0xe7   : > { %p5947_p2 = pnand %p5946_p13, %p5940_p3 }
  0xe9   : > { %5950 = shalt.err (!%p5947_p2)
}
  0xea   : > { %s5951_s8 = scalar_lea.vmem %s6587_s1, 1024  ;;  %s6167_s11 = smov [#allocation3]  }
  0xeb   : > { %p5952_p12 = scmp.ne.s32.totalorder %s6587_s1, %s5951_s8  ;;  %s5956_s28 = sshll.u32 %s6167_s11, 4  ;;  %s5957_s28 = int_to_ptr.vmem [resolvable:$false] %s5956_s28 }
  0xec   : > { %s5958_s14 = scalar_lea.vmem %s5957_s28, 2048  ;;  %p5959_p0 = scmp.lt.s32.totalorder %s6587_s1, %s5957_s28 }
  0xed   : > { %p5954_p5 = pnand %p5952_p12, %p5938_p7  ;;  %p5960_p11 = scmp.lt.s32.totalorder %s5958_s14, %s5951_s8 }
  0xef   : > { %p5955_p10 = pneg %p5954_p5  ;;  %p5961_p4 = por %p5960_p11, %p5959_p0 }
  0xf1   : > { %p5962_p8 = pnand %p5961_p4, %p5955_p10 }
  0xf3   : > { %5965 = shalt.err (!%p5962_p8)
}
  0xf4   : > { %s7677_s15 = sld [smem:[#allocation34_spill]]  ;;  %s7678_s27 = sld [smem:[#allocation24_spill]] }
  0xf5   : > { %s7679_s13 = sld [smem:[#allocation23_spill]]  ;;  %s7680_s22 = sld [smem:[#allocation22_spill]] }
  0xf6   : > { %s7681_s10 = sld [smem:[#allocation33_spill]]  ;;  %p7683_p10 = scmp.lt.s32.totalorder %s6439_s9, 15 }
  0xf7   : > { %5520 = dma.hbm_to_vmem [thread:$0]  (!%p6593_p6), %s6585_s12, 1024, %s6587_s1, %s6597_s3, %s7662_s20, %s7662_s20, %s7661_s4  }
  0xf8   : > { %s7765_s9 = smov (!%p7683_p10, %s6439_s9), 15  ;;  %p7684_p9 = scmp.eq.s32.totalorder %s6158_s16, 0 }
  0xf9   : > { %p7686_p12 = scmp.eq.s32.totalorder %s6326_s17, 0  ;;  %p7689_p6 = scmp.lt.s32.totalorder %s6158_s16, 4 }
  0xfa   : > { %p7682_p0 = scmp.lt.s32.totalorder %s7677_s15, 15  ;;  %s129_s30 = sadd.s32 1, %s7678_s27 }
  0xfb   : > { %p136_p7 = scmp.ne.s32.totalorder %s7678_s27, %s7679_s13  ;;  %p142_p3 = scmp.ne.s32.totalorder %s7679_s13, %s7680_s22 }
  0xfc   : > { %s7763_s15 = smov (!%p7682_p0, %s7677_s15), 15  ;;  %s574_s1 = sand.u32 1, %s7678_s27  }
  0xfd   : > { %s125_s8 = ssub.s32 %s7763_s15, %s7765_s9  ;;  %p6642_p13 = por %p136_p7, %p7684_p9 }
  0xfe   : > { %s126_s11 = sor.u32 %s125_s8, %s7681_s10  ;;  %p6648_p5 = por %p142_p3, %p7686_p12 }
  0xff   : > { %p127_p2 = scmp.eq.s32.totalorder %s126_s11, 0  ;;  %s4509_s3 = sshll.u32 %s7763_s15, 1 }
 0x100   : > { %s7687_s12 = scalar_select %p6648_p5, 1, 0 }
 0x101   : > { %s7767_s27 = smov (!%p127_p2, %s7678_s27), %s129_s30  ;;  %s4507_s9 = sshll.u32 %s574_s1, 3 }
 0x102   : > { %s586_s14 = sadd.s32 %s4509_s3, %s6447_s5  ;;  %s7688_s8 = sld [smem:[#allocation38_spill]] }
 0x103   : > { %s4511_s13 = sshll.u32 %s586_s14, 6  ;;  %s576_s11 = scalar_lea.vmem [#allocation8], %s4507_s9 }
 0x104   : > { %s589_s29 = sshll.u32 %s576_s11, 4  ;;  %p6668_p11 = pnand %p7689_p6, %p6642_p13  ;;  %s6662_s29 = int_to_ptr.vmem [resolvable:$true] %s589_s29 }
 0x106   : > { %p5968_p8 = pneg %p6668_p11 }
 0x108   : > { %s6660_s6 = scalar_lea.hbm %s7688_s8, %s4511_s13  ;;  %s5971_s3 = scalar_lea.hbm %s7688_s8, 4096 }
 0x109   : > { %s5966_s5 = scalar_lea.hbm %s6660_s6, 128  ;;  %p5972_p7 = scmp.lt.u32.totalorder %s6660_s6, %s7688_s8 }
 0x10a   : > { %p5967_p4 = scmp.ne.s32.totalorder %s6660_s6, %s5966_s5  ;;  %p5973_p3 = scmp.lt.u32.totalorder %s5971_s3, %s5966_s5 }
 0x10b   : > { %p5975_p13 = scmp.lt.u32.totalorder %s5966_s5, %s6660_s6 }
 0x10c   : > { %p5969_p0 = pnand %p5968_p8, %p5967_p4  ;;  %p5974_p9 = por %p5973_p3, %p5972_p7 }
 0x10e   : > { %p5970_p10 = pneg %p5969_p0  ;;  %p5976_p2 = por %p5975_p13, %p5974_p9 }
 0x110   : > { %p5977_p12 = pnand %p5976_p2, %p5970_p10 }
 0x112   : > { %5980 = shalt.err (!%p5977_p12)
}
 0x113   : > { %s5981_s14 = scalar_lea.vmem %s6662_s29, 128  ;;  %s6168_s13 = smov [#allocation8]  }
 0x114   : > { %p5982_p6 = scmp.ne.s32.totalorder %s6662_s29, %s5981_s14  ;;  %s5986_s22 = sshll.u32 %s6168_s13, 4  ;;  %s5987_s22 = int_to_ptr.vmem [resolvable:$false] %s5986_s22 }
 0x115   : > { %s5988_s10 = scalar_lea.vmem %s5987_s22, 256  ;;  %p5989_p5 = scmp.lt.s32.totalorder %s6662_s29, %s5987_s22 }
 0x116   : > { %p5984_p4 = pnand %p5982_p6, %p5968_p8  ;;  %p5990_p7 = scmp.lt.s32.totalorder %s5988_s10, %s5981_s14 }
 0x118   : > { %p5985_p0 = pneg %p5984_p4  ;;  %p5991_p3 = por %p5990_p7, %p5989_p5 }
 0x11a   : > { %p5992_p9 = pnand %p5991_p3, %p5985_p0 }
 0x11c   : > { %5995 = shalt.err (!%p5992_p9)
}
 0x11d   : > { %5526 = dma.hbm_to_vmem [thread:$0]  (!%p6668_p11), %s6660_s6, 128, %s6662_s29, %s6469_s0, %s7662_s20, %s7662_s20, %s7661_s4  }
 0x11e   : > { %s7691_s11 = sld [smem:[#allocation30_spill]] }
 0x124   : > { %p7692_p8 = scmp.ne.s32.totalorder %s7691_s11, 0 }
 0x125   : > { %s6704_s5 = sand.u32 (!%p7692_p8), 1, %s6134_s25  }
 0x126   : > { %601 = sbr.rel (%p7692_p8) target bundleno = 1284 (0x504), region = 80  ;;  %s4513_s30 = sshll.u32 (!%p7692_p8), %s6704_s5, 6 }
 0x127   : > { %s604_s1 = scalar_lea.sflag (!%p7692_p8), [#allocation4], %s6704_s5  ;;  %s6710_s15 = scalar_lea.vmem (!%p7692_p8), [#allocation3], %s4513_s30 }
 0x12d   : > { %6081 = dma.done.wait (%p6567_p1), %s604_s1, 1024  }
 0x12e   : > { %6083 = vsyncadd (%p6567_p1), %s604_s1, 4294966272  ;;  %s7693_s6 = sld [smem:[#allocation25_spill]]  ;;  %s7694_s29 = sld [smem:[#allocation35_spill]] }
 0x12f   : > { %s612_s0 = sand.u32 1, %s6326_s17  }
 0x130   : > { %s613_s3 = scalar_lea.sflag [#allocation7], %s612_s0 }
 0x134   : > { %s614_s4 = sand.u32 1, %s7693_s6   ;;  %p7695_p5 = scmp.ne.s32.totalorder %s7694_s29, 0 }
 0x135   : > { %s6718_s20 = sshll.u32 %s614_s4, 3 }
 0x136   : > { %s616_s28 = scalar_lea.vmem [#allocation6], %s6718_s20 }
 0x137   : > { %6085 = dma.done.wait (%p7695_p5), %s613_s3, 128  }
 0x138   : > { %6087 = vsyncadd (%p7695_p5), %s613_s3, 4294967168  ;;  %s7696_s9 = sld [smem:[#allocation23_spill]]  ;;  %p7697_p1 = scmp.ne.s32.totalorder %s7687_s12, 0 }
 0x13e   : > { %s623_s14 = sand.u32 1, %s7696_s9  }
 0x13f   : > { %s6726_s18 = sshll.u32 %s623_s14, 3 }
 0x140   : > { %s625_s13 = scalar_lea.vmem [#allocation8], %s6726_s18 }
 0x141   : > { %6089 = dma.done.wait (%p7697_p1), %s613_s3, 128  }
 0x142   : > { %6091 = vsyncadd (%p7697_p1), %s613_s3, 4294967168  ;;  %p7698_p11 = scmp.eq.s32.totalorder %s6326_s17, 0 }
 0x144   : > { %6093 = dma.done.wait (%p7698_p11), [#allocation10], 10240   ;;  %p7699_p10 = pmov %p7698_p11 }
 0x146   : > { %6095 = vsyncadd (%p7699_p10), [#allocation10], 4294957056  ;;  %p7700_p13 = pmov %p7699_p10 }
 0x147   : > { %p7701_p2 = pmov %p7699_p10 }
 0x148   : > { %6097 = dma.done.wait (%p7700_p13), [#allocation13], 2048  }
 0x149   : > { %6099 = vsyncadd (%p7701_p2), [#allocation13], 4294965248  ;;  %v6169_v0 = vmov 0.0   ;;  %vm6170_vm0 = vmmov 0   ;;  %v5664_v1 = vld [vmem:[#allocation9] sm:$0xff]   ;;  %v5666_v3 = vld [vmem:[#allocation9 + $0x8] sm:$0xff]  }
 0x14a   : > { %4992 = vmatprep.subr.bf16.mxu1 %v6169_v0  ;;  %5008 = vmatprep.mubr.msk.bf16.mxu1 %vm6170_vm0, %v6169_v0  ;;  %v5665_v2 = vld [vmem:[#allocation9] sm:$0xff]   ;;  %v5667_v4 = vld [vmem:[#allocation9 + $0x8] sm:$0xff]   ;;  %v5668_v5 = vld [vmem:[#allocation9 + $0x10] sm:$0xff]   ;;  %s7702_s17 = sld [smem:[#allocation26_spill]]  ;;  %v6171_v53 = vmov 0   ;;  %s7703_s10 = sld [smem:[#allocation40_spill]] }
 0x14b   : > { %4960 = vmatprep.subr.bf16.mxu0 %v5664_v1  ;;  %4993 = vmatpush3.bf16.msra.mxu1 %v5665_v2  ;;  %v5669_v6 = vld [vmem:[#allocation9 + $0x10] sm:$0xff]   ;;  %v5670_v7 = vld [vmem:[#allocation9 + $0x18] sm:$0xff]   ;;  %v5672_v9 = vld [vmem:[#allocation9 + $0x20] sm:$0xff]   ;;  %998 = vst [vmem:[#allocation2] sm:$0xf] %v6171_v53  ;;  %s7704_s6 = sld [smem:[#allocation41_spill]] }
 0x14c   : > { %4961 = vmatpush3.bf16.msra.mxu0 %v5664_v1  ;;  %4994 = vmatprep.subr.bf16.mxu1 %v6169_v0  ;;  %v5671_v8 = vld [vmem:[#allocation9 + $0x18] sm:$0xff]   ;;  %v5673_v10 = vld [vmem:[#allocation9 + $0x20] sm:$0xff]   ;;  %v5674_v11 = vld [vmem:[#allocation9 + $0x28] sm:$0xff]   ;;  %999 = vst [vmem:[#allocation2 + $0x50] sm:$0xf0] %v6171_v53  ;;  %vm1146_vm1 = vcmask 1043456  }
 0x14d   : > { %4962 = vmatprep.subr.bf16.mxu0 %v5666_v3  ;;  %v5680_v12 = vld [vmem:[%s6710_s15] sm:$0xff]   ;;  %v5675_v13 = vld [vmem:[#allocation9 + $0x28] sm:$0xff]   ;;  %v5676_v14 = vld [vmem:[#allocation9 + $0x30] sm:$0xff]   ;;  %vm1948_vm2 = vsmask.f32 4352  ;;  %s7709_s3 = sld [smem:[#allocation43_spill]] }
 0x14e   : > { %4976 = vmatprep.mubr.bf16.mxu0 %v5680_v12  ;;  %v5677_v15 = vld [vmem:[#allocation9 + $0x30] sm:$0xff]   ;;  %v5678_v16 = vld [vmem:[#allocation9 + $0x38] sm:$0xff]   ;;  %v5681_v18 = vld [vmem:[%s616_s28] sm:$0xff]   ;;  %vm2660_vm3 = vsmask.f32 3328  ;;  %s7710_s14 = sld [smem:[#allocation44_spill]] }
 0x14f   : > { %4995 = vmatpush3.bf16.msra.mxu1 %v5667_v4  ;;  %v5679_v17 = vld [vmem:[#allocation9 + $0x38] sm:$0xff]   ;;  %v5682_v19 = vld [vmem:[%s6710_s15 + $0x8] sm:$0xff]   ;;  %v5683_v20 = vld [vmem:[#allocation9] sm:$0xff]   ;;  %s7726_s4 = sld [smem:[#allocation50_spill]]  ;;  %s7431_s20 = scalar_lea.vmem [#allocation15], %s4513_s30 }
 0x150   : > { %4963 = vmatpush3.bf16.msra.mxu0 %v5666_v3  ;;  %4996 = vmatprep.subr.bf16.mxu1 %v6169_v0  ;;  %v5685_v21 = vld [vmem:[%s6710_s15 + $0x10] sm:$0xff]   ;;  %v5684_v22 = vld [vmem:[#allocation9 + $0x8] sm:$0xff]   ;;  %v5686_v23 = vld [vmem:[%s6710_s15 + $0x18] sm:$0xff]   ;;  %p1000_p12 = scmp.eq.s32.totalorder %s7702_s17, 0  ;;  %p1180_p6 = scmp.eq.s32.totalorder %s7702_s17, 1 }
 0x151   : > { %4964 = vmatprep.subr.bf16.mxu0 %v5668_v5  ;;  %v5687_v24 = vld [vmem:[#allocation9 + $0x10] sm:$0xff]   ;;  %v5689_v25 = vld [vmem:[%s6710_s15 + $0x20] sm:$0xff]   ;;  %v5688_v26 = vld [vmem:[#allocation9 + $0x18] sm:$0xff]   ;;  %s7727_s30 = sld [smem:[#allocation27_spill]]  ;;  %s4306_s9 = sshll.u32 %s7431_s20, 4  ;;  %s7485_s9 = int_to_ptr.vmem [resolvable:$true] %s4306_s9 }
 0x152   : > { %v5690_v27 = vld [vmem:[%s6710_s15 + $0x28] sm:$0xff]   ;;  %v5691_v28 = vld [vmem:[#allocation9 + $0x20] sm:$0xff]   ;;  %v5693_v29 = vld [vmem:[%s6710_s15 + $0x30] sm:$0xff]   ;;  %s1120_s29 = scalar_select %p1000_p12, 0.0, 1.0 }
 0x153   : > { %4997 = vmatpush3.bf16.msra.mxu1 %v5669_v6  ;;  %v5692_v30 = vld [vmem:[#allocation9 + $0x28] sm:$0xff]   ;;  %v5694_v31 = vld [vmem:[%s6710_s15 + $0x38] sm:$0xff]   ;;  %v5695_v32 = vld [vmem:[#allocation9 + $0x30] sm:$0xff]   ;;  %s6814_s0 = scalar_select %p1180_p6, 0.0, 1.0 }
 0x154   : > { %4965 = vmatpush3.bf16.msra.mxu0 %v5668_v5  ;;  %4998 = vmatprep.subr.bf16.mxu1 %v6169_v0  ;;  %v5696_v33 = vld [vmem:[#allocation9 + $0x38] sm:$0xff]   ;;  %v5698_v35 = vld [vmem:[#allocation11 + $0x100] sm:$0xff]   ;;  %v5699_v36 = vld [vmem:[#allocation11 + $0x108] sm:$0xff]   ;;  %s4291_s22 = scalar_lea.sflag [#allocation5], %s6704_s5  ;;  %p7729_p0 = scmp.ne.s32.totalorder %s7671_s2, 0 }
 0x155   : > { %4966 = vmatprep.subr.bf16.mxu0 %v5670_v7  ;;  %v5697_v34 = vld [vmem:[%s625_s13] sm:$0xff]   ;;  %v5700_v37 = vld [vmem:[#allocation11 + $0xc0] sm:$0xff]   ;;  %v5702_v39 = vld [vmem:[#allocation11 + $0xc8] sm:$0xff]   ;;  %s7723_s13 = sld [smem:[#allocation46_spill]]  ;;  %s6172_s11 = smov [#allocation15]  }
 0x156   : > { %v5701_v38 = vld [vmem:[#allocation11 + $0x110] sm:$0xff]   ;;  %v5703_v40 = vld [vmem:[#allocation11 + $0x118] sm:$0xff]   ;;  %v5705_v42 = vld [vmem:[#allocation11 + $0x120] sm:$0xff]   ;;  %s6000_s1 = sshll.u32 %s6172_s11, 4  ;;  %s6001_s1 = int_to_ptr.vmem [resolvable:$false] %s6000_s1 }
 0x157   : > { %4999 = vmatpush3.bf16.msra.mxu1 %v5671_v8  ;;  %v5704_v41 = vld [vmem:[#allocation11 + $0xd0] sm:$0xff]   ;;  %v5706_v43 = vld [vmem:[#allocation11 + $0xd8] sm:$0xff]   ;;  %v5707_v44 = vld [vmem:[#allocation11 + $0x128] sm:$0xff]   ;;  %s4677_s28 = sshll.u32 %s7727_s30, 5  ;;  %p6003_p9 = scmp.lt.s32.totalorder %s7485_s9, %s6001_s1 }
 0x158   : > { %4967 = vmatpush3.bf16.msra.mxu0 %v5670_v7  ;;  %5000 = vmatprep.subr.bf16.mxu1 %v6169_v0  ;;  %v5708_v45 = vld [vmem:[#allocation11 + $0xe0] sm:$0xff]   ;;  %v5709_v46 = vld [vmem:[#allocation11 + $0x130] sm:$0xff]   ;;  %v5710_v47 = vld [vmem:[#allocation11 + $0xe8] sm:$0xff]   ;;  %v1121_v7 = vstv %s1120_s29 }
 0x159   : > { %4968 = vmatprep.subr.bf16.mxu0 %v5672_v9  ;;  %v5711_v48 = vld [vmem:[#allocation11 + $0x138] sm:$0xff]   ;;  %v5712_v49 = vld [vmem:[#allocation11 + $0xf0] sm:$0xff]   ;;  %v6773_v50 = vld [vmem:[#allocation11 + $0x40] sm:$0xff]  }
 0x15a   : > { %v5714_v51 = vld [vmem:[#allocation11 + $0xf8] sm:$0xff]   ;;  %v6776_v52 = vld [vmem:[#allocation11] sm:$0xff]   ;;  %v6783_v54 = vld [vmem:[%s7703_s10] ss:$0 sm:$0xff]  ;;  %s7724_s10 = sld [smem:[#allocation49_spill]] }
 0x15b   : > { %5001 = vmatpush3.bf16.msra.mxu1 %v5673_v10  ;;  %v6788_v55 = vld [vmem:[%s7704_s6] ss:$0 sm:$0xff]  ;;  %s7725_s6 = sld [smem:[#allocation47_spill]] }
 0x15c   : > { %4969 = vmatpush3.bf16.msra.mxu0 %v5672_v9  ;;  %5002 = vmatprep.subr.bf16.mxu1 %v6169_v0 }
 0x15d   : > { %4970 = vmatprep.subr.bf16.mxu0 %v5674_v11 }
 0x15f   : > { %5003 = vmatpush3.bf16.msra.mxu1 %v5675_v13 }
 0x160   : > { %4971 = vmatpush3.bf16.msra.mxu0 %v5674_v11  ;;  %5004 = vmatprep.subr.bf16.mxu1 %v6169_v0 }
 0x161   : > { %4972 = vmatprep.subr.bf16.mxu0 %v5676_v14 }
 0x163   : > { %5005 = vmatpush3.bf16.msra.mxu1 %v5677_v15 }
 0x164   : > { %4973 = vmatpush3.bf16.msra.mxu0 %v5676_v14  ;;  %5006 = vmatprep.subr.bf16.mxu1 %v6169_v0 }
 0x165   : > { %4974 = vmatprep.subr.bf16.mxu0 %v5678_v16 }
 0x167   : > { %5007 = vmatpush3.bf16.msra.mxu1 %v5679_v17 }
 0x168   : > { %4975 = vmatpush3.bf16.msra.mxu0 %v5678_v16  ;;  %5032 = vmatprep.subr.bf16.mxu1 %v5698_v35 }
 0x169   : > { %5012 = vmatprep.subr.bf16.mxu0 %v6169_v0 }
 0x16a   : > { %5009 = vmatmul.mubr.bf16.vlgmr.msra.gmra.mrb[0].mxu1 %v5681_v18 }
 0x16b   : > { %4977 = vmatmul.mubr.bf16.vlgmr.msra.gmra.mrb[0].mxu0 %v5682_v19  ;;  %5033 = vmatpush3.bf16.msra.mxu1 %v5698_v35 }
 0x16c   : > { %5013 = vmatpush3.bf16.msra.mxu0 %v5683_v20  ;;  %4980 = vmatprep.mubr.bf16.mxu0 %v5685_v21 }
 0x16d   : > { %5014 = vmatprep.subr.bf16.mxu0 %v6169_v0  ;;  %5034 = vmatprep.subr.bf16.mxu1 %v5699_v36 }
 0x16f   : > { %5035 = vmatpush3.bf16.msra.mxu1 %v5699_v36 }
 0x170   : > { %5015 = vmatpush3.bf16.msra.mxu0 %v5684_v22  ;;  %5036 = vmatprep.subr.bf16.mxu1 %v5701_v38 }
 0x171   : > { %5016 = vmatprep.subr.bf16.mxu0 %v6169_v0 }
 0x173   : > { %4981 = vmatmul.mubr.bf16.gmra.mrb[4].mxu0 %v5686_v23  ;;  %5037 = vmatpush3.bf16.msra.mxu1 %v5701_v38 }
 0x174   : > { %5017 = vmatpush3.bf16.msra.mxu0 %v5687_v24  ;;  %4984 = vmatprep.mubr.bf16.mxu0 %v5689_v25 }
 0x175   : > { %5018 = vmatprep.subr.bf16.mxu0 %v6169_v0  ;;  %5038 = vmatprep.subr.bf16.mxu1 %v5703_v40 }
 0x177   : > { %5039 = vmatpush3.bf16.msra.mxu1 %v5703_v40 }
 0x178   : > { %5019 = vmatpush3.bf16.msra.mxu0 %v5688_v26  ;;  %5040 = vmatprep.subr.bf16.mxu1 %v5705_v42 }
 0x179   : > { %5020 = vmatprep.subr.bf16.mxu0 %v6169_v0 }
 0x17b   : > { %4985 = vmatmul.mubr.bf16.gmra.mrb[8].mxu0 %v5690_v27  ;;  %5041 = vmatpush3.bf16.msra.mxu1 %v5705_v42 }
 0x17c   : > { %5021 = vmatpush3.bf16.msra.mxu0 %v5691_v28  ;;  %4988 = vmatprep.mubr.bf16.mxu0 %v5693_v29 }
 0x17d   : > { %5022 = vmatprep.subr.bf16.mxu0 %v6169_v0  ;;  %5042 = vmatprep.subr.bf16.mxu1 %v5707_v44 }
 0x17f   : > { %5043 = vmatpush3.bf16.msra.mxu1 %v5707_v44 }
 0x180   : > { %5023 = vmatpush3.bf16.msra.mxu0 %v5692_v30  ;;  %5044 = vmatprep.subr.bf16.mxu1 %v5709_v46 }
 0x181   : > { %5024 = vmatprep.subr.bf16.mxu0 %v6169_v0 }
 0x183   : > { %4989 = vmatmul.mubr.bf16.gmra.mrb[12].mxu0 %v5694_v31  ;;  %5045 = vmatpush3.bf16.msra.mxu1 %v5709_v46 }
 0x184   : > { %5025 = vmatpush3.bf16.msra.mxu0 %v5695_v32  ;;  %5028 = vmatprep.mubr.msk.bf16.mxu0 %vm6170_vm0, %v6169_v0 }
 0x185   : > { %5026 = vmatprep.subr.bf16.mxu0 %v6169_v0  ;;  %5046 = vmatprep.subr.bf16.mxu1 %v5711_v48 }
 0x187   : > { %5047 = vmatpush3.bf16.msra.mxu1 %v5711_v48 }
 0x188   : > { %5027 = vmatpush3.bf16.msra.mxu0 %v5696_v33  ;;  %5064 = vmatprep.subr.bf16.mxu1 %v6773_v50 }
 0x189   : > { %5128 = vmatprep.subr.bf16.mxu0 %v5700_v37 }
 0x18b   : > { %5029 = vmatmul.mubr.bf16.vlgmr.msra.gmra.mrb[16].mxu0 %v5697_v34 }
 0x18c   : > { %5129 = vmatpush3.bf16.msra.mxu0 %v5700_v37 }
 0x18d   : > { %5130 = vmatprep.subr.bf16.mxu0 %v5702_v39 }
 0x190   : > { %5131 = vmatpush3.bf16.msra.mxu0 %v5702_v39 }
 0x191   : > { %5132 = vmatprep.subr.bf16.mxu0 %v5704_v41 }
 0x194   : > { %5133 = vmatpush3.bf16.msra.mxu0 %v5704_v41 }
 0x195   : > { %5134 = vmatprep.subr.bf16.mxu0 %v5706_v43 }
 0x198   : > { %5135 = vmatpush3.bf16.msra.mxu0 %v5706_v43 }
 0x199   : > { %5136 = vmatprep.subr.bf16.mxu0 %v5708_v45 }
 0x19c   : > { %5137 = vmatpush3.bf16.msra.mxu0 %v5708_v45 }
 0x19d   : > { %5138 = vmatprep.subr.bf16.mxu0 %v5710_v47 }
 0x1a0   : > { %5139 = vmatpush3.bf16.msra.mxu0 %v5710_v47 }
 0x1a1   : > { %5140 = vmatprep.subr.bf16.mxu0 %v5712_v49 }
 0x1a4   : > { %5141 = vmatpush3.bf16.msra.mxu0 %v5712_v49 }
 0x1a5   : > { %5142 = vmatprep.subr.bf16.mxu0 %v5714_v51 }
 0x1a8   : > { %5143 = vmatpush3.bf16.msra.mxu0 %v5714_v51 }
 0x1a9   : > { %5160 = vmatprep.subr.bf16.mxu0 %v6776_v52 }
 0x23d   : > { %v1107_v56 = vpop.f32.mrb[0].mxu1 }
 0x23e   : > { %v4978_v57 = vpop.f32.mrb[0].mxu0  ;;  %v1114_v58 = vmul.f32 %v6783_v54, %v1107_v56  ;;  %v5010_v60 = vpop.f32.mrb[1].mxu1 }
 0x23f   : > { %v946_v59 = vmul.f32 %v4978_v57, %v6783_v54  ;;  %v875_v61 = vpop.f32.mrb[1].mxu0  ;;  %v1110_v63 = vpop.f32.mrb[2].mxu1 }
 0x240   : > { %v944_v62 = vmul.f32 %v6783_v54, %v875_v61  ;;  %v4979_v0 = vpop.f32.mrb[2].mxu0  ;;  %v1116_v1 = vadd.f32 %v6788_v55, %v1114_v58  ;;  %v1115_v3 = vmul.f32 %v6783_v54, %v1110_v63  ;;  %v5011_v6 = vpop.f32.mrb[3].mxu1 }
 0x241   : > { %v968_v2 = vadd.f32 %v6788_v55, %v946_v59  ;;  %v947_v4 = vmul.f32 %v4979_v0, %v6783_v54  ;;  %v878_v5 = vpop.f32.mrb[3].mxu0 }
 0x242   : > { %v966_v8 = vadd.f32 %v6788_v55, %v944_v62  ;;  %v945_v9 = vmul.f32 %v6783_v54, %v878_v5  ;;  %v1118_v10 = vmax.f32 %v1116_v1, 0.0  ;;  %v1117_v11 = vadd.f32 %v6788_v55, %v1115_v3 }
 0x243   : > { %v969_v12 = vadd.f32 %v6788_v55, %v947_v4  ;;  %v984_v15 = vmax.f32 %v968_v2, 0.0  ;;  %v1301_v1 = vstv %s6814_s0 }
 0x244   : > { %v967_v13 = vadd.f32 %v6788_v55, %v945_v9  ;;  %v1122_v14 = vmul.f32 %v1121_v7, %v1118_v10  ;;  %v1119_v16 = vmax.f32 %v1117_v11, 0.0  ;;  %v982_v18 = vmax.f32 %v966_v8, 0.0 }
 0x245   : > { %v985_v17 = vmax.f32 %v969_v12, 0.0 }
 0x246   : > { %v983_v19 = vmax.f32 %v967_v13, 0.0  ;;  %v4982_v20 = vpop.f32.mrb[4].mxu0  ;;  %v1123_v21 = vmul.f32 %v1121_v7, %v1119_v16 }
 0x247   : > { %v1131_v22 = vpack.c.bf16 %v985_v17, %v984_v15  ;;  %v950_v23 = vmul.f32 %v4982_v20, %v6783_v54  ;;  %v891_v24 = vpop.f32.mrb[5].mxu0 }
 0x248   : > { %v1130_v25 = vpack.c.bf16 %v983_v19, %v982_v18  ;;  %v948_v26 = vmul.f32 %v6783_v54, %v891_v24  ;;  %v4983_v27 = vpop.f32.mrb[6].mxu0  ;;  %v1124_v28 = vpack.c.bf16 %v1123_v21, %v1122_v14 }
 0x249   : > { %v1148_v29 = vrot.slane %v1131_v22, 4  ;;  %v972_v30 = vadd.f32 %v6788_v55, %v950_v23  ;;  %v951_v31 = vmul.f32 %v4983_v27, %v6783_v54  ;;  %v894_v32 = vpop.f32.mrb[7].mxu0 }
 0x24a   : > { %v1147_v33 = vrot.slane %v1130_v25, 4  ;;  %v970_v34 = vadd.f32 %v6788_v55, %v948_v26  ;;  %v949_v35 = vmul.f32 %v6783_v54, %v894_v32  ;;  %v1126_v36 = vrot.slane %v1124_v28, 4 }
 0x24b   : > { %v973_v37 = vadd.f32 %v6788_v55, %v951_v31  ;;  %v988_v40 = vmax.f32 %v972_v30, 0.0  ;;  %v5715_v30 = vld [vmem:[#allocation11 + $0x48] sm:$0xff]  }
 0x24c   : > { %v1149_v38 = vsel %vm1146_vm1, %v1147_v33, %v1148_v29  ;;  %1171 = vst [vmem:[#allocation2 + $0x8] sm:$0xf0] %v1147_v33  ;;  %v971_v39 = vadd.f32 %v6788_v55, %v949_v35  ;;  %1128 = vst [vmem:[#allocation2 + $0x8] ss:$-4 sps:$4 sm:$0xff] %v1126_v36   ;;  %v986_v44 = vmax.f32 %v970_v34, 0.0 }
 0x24d   : > { %1172 = vst [vmem:[#allocation2 + $0x10] sm:$0xff] %v1149_v38  ;;  %v989_v41 = vmax.f32 %v973_v37, 0.0  ;;  %v1958_v42 = vshrl.u32 %v1149_v38, 16  ;;  %v1961_v43 = vshll.u32 %v1149_v38, 16  ;;  %v6831_v9 = vrot.slane %v1149_v38, 4 }
 0x24e   : > { %v987_v45 = vmax.f32 %v971_v39, 0.0  ;;  %v4986_v46 = vpop.f32.mrb[8].mxu0 }
 0x24f   : > { %v6816_v47 = vpack.c.bf16 %v989_v41, %v988_v40  ;;  %v954_v48 = vmul.f32 %v4986_v46, %v6783_v54  ;;  %v907_v49 = vpop.f32.mrb[9].mxu0  ;;  %v1960_v51 = vrot.slane %v1958_v42, 3  ;;  %v1963_v53 = vrot.slane %v1961_v43, 4 }
 0x250   : > { %v1132_v56 = vpack.c.bf16 %v987_v45, %v986_v44  ;;  %v952_v57 = vmul.f32 %v6783_v54, %v907_v49  ;;  %v4987_v58 = vpop.f32.mrb[10].mxu0  ;;  %v2669_v59 = vrot.slane %v1958_v42, 4  ;;  %v2670_v60 = vrot.slane %v1961_v43, 5  ;;  %v5717_v49 = vld [vmem:[#allocation11 + $0x50] sm:$0xff]  }
 0x251   : > { %v1152_v61 = vrot.slane %v6816_v47, 4  ;;  %v976_v62 = vadd.f32 %v6788_v55, %v954_v48  ;;  %v955_v63 = vmul.f32 %v4987_v58, %v6783_v54  ;;  %v910_v0 = vpop.f32.mrb[11].mxu0  ;;  %v6833_v10 = vor.u32 %v1963_v53, %v1960_v51 }
 0x252   : > { %v1150_v2 = vrot.slane %v1132_v56, 4  ;;  %v974_v3 = vadd.f32 %v6788_v55, %v952_v57  ;;  %v953_v4 = vmul.f32 %v6783_v54, %v910_v0  ;;  %v6826_v5 = vor.u32 %v2670_v60, %v2669_v59 }
 0x253   : > { %v992_v6 = vmax.f32 %v976_v62, 0.0  ;;  %v977_v7 = vadd.f32 %v6788_v55, %v955_v63  ;;  %v6829_v8 = vld [vmem:[#allocation2 + $0x8] sm:$0xf0] }
 0x254   : > { %v6836_v11 = vsel %vm1146_vm1, %v1148_v29, %v1150_v2  ;;  %v6839_v12 = vsel %vm1146_vm1, %v1150_v2, %v1152_v61  ;;  %v990_v13 = vmax.f32 %v974_v3, 0.0  ;;  %v975_v14 = vadd.f32 %v6788_v55, %v953_v4  ;;  %v1930_v15 = vld [vmem:[#allocation2 + $0x8] sm:$0xf8] }
 0x255   : > { %v993_v16 = vmax.f32 %v977_v7, 0.0  ;;  %v1365_v17 = vrot.slane %v6829_v8, 4  ;;  %v1950_v18 = vshrl.u32 %v1930_v15, 16  ;;  %v1953_v19 = vshll.u32 %v1930_v15, 16 }
 0x256   : > { %v991_v20 = vmax.f32 %v975_v14, 0.0  ;;  %v4990_v21 = vpop.f32.mrb[12].mxu0  ;;  %v6844_v22 = vrot.slane %v6836_v11, 4  ;;  %v1370_v23 = vrot.slane %v6839_v12, 4  ;;  %v1967_v24 = vshrl.u32 %v6836_v11, 16 }
 0x257   : > { %v6848_v25 = vpack.c.bf16 %v993_v16, %v992_v6  ;;  %v958_v26 = vmul.f32 %v4990_v21, %v6783_v54  ;;  %v923_v27 = vpop.f32.mrb[13].mxu0  ;;  %v1367_v28 = vsel %vm1146_vm1, %v1365_v17, %v6831_v9  ;;  %v1952_v29 = vrot.slane %v1950_v18, 3  ;;  %v5718_v18 = vld [vmem:[#allocation11 + $0x8] sm:$0xff]  }
 0x258   : > { %v1134_v31 = vpack.c.bf16 %v991_v20, %v990_v13  ;;  %v956_v32 = vmul.f32 %v6783_v54, %v923_v27  ;;  %v4991_v33 = vpop.f32.mrb[14].mxu0  ;;  %5048 = vmatprep.mubr.bf16.mxu1 %v1367_v28  ;;  %v1955_v34 = vrot.slane %v1953_v19, 4  ;;  %v6857_v35 = vsel %vm1146_vm1, %v6831_v9, %v6844_v22  ;;  %v5719_v20 = vld [vmem:[#allocation11 + $0x58] sm:$0xff]  }
 0x259   : > { %v1156_v36 = vrot.slane %v6848_v25, 4  ;;  %v980_v37 = vadd.f32 %v6788_v55, %v958_v26  ;;  %v959_v38 = vmul.f32 %v4991_v33, %v6783_v54  ;;  %v926_v39 = vpop.f32.mrb[15].mxu0  ;;  %5049 = vmatmul.mubr.bf16.vlgmr.msra.gmra.mrb[4].mxu1 %v6857_v35  ;;  %v6865_v40 = vsel %vm1146_vm1, %v6844_v22, %v1370_v23 }
 0x25a   : > { %v1154_v41 = vrot.slane %v1134_v31, 4  ;;  %v978_v42 = vadd.f32 %v6788_v55, %v956_v32  ;;  %v957_v43 = vmul.f32 %v6783_v54, %v926_v39  ;;  %v1956_v44 = vor.u32 %v1955_v34, %v1952_v29  ;;  %5065 = vmatpush3.bf16.msra.mxu1 %v6773_v50  ;;  %5052 = vmatprep.mubr.bf16.mxu1 %v6865_v40 }
 0x25b   : > { %v996_v45 = vmax.f32 %v980_v37, 0.0  ;;  %v981_v46 = vadd.f32 %v6788_v55, %v959_v38  ;;  %5066 = vmatprep.subr.bf16.mxu1 %v5715_v30  ;;  %v1969_v47 = vrot.slane %v1967_v24, 3  ;;  %v1970_v48 = vshll.u32 %v6836_v11, 16  ;;  %v5721_v38 = vld [vmem:[#allocation11 + $0x60] sm:$0xff]  }
 0x25c   : > { %v6876_v51 = vsel %vm1146_vm1, %v1152_v61, %v1154_v41  ;;  %v6881_v53 = vsel %vm1146_vm1, %v1154_v41, %v1156_v36  ;;  %v994_v50 = vmax.f32 %v978_v42, 0.0  ;;  %v979_v56 = vadd.f32 %v6788_v55, %v957_v43  ;;  %v5720_v42 = vld [vmem:[#allocation11 + $0x10] sm:$0xff]  }
 0x25d   : > { %v997_v57 = vmax.f32 %v981_v46, 0.0  ;;  %v1965_v58 = vsel %vm1948_vm2, %v1956_v44, %v6833_v10  ;;  %v1972_v59 = vrot.slane %v1970_v48, 4  ;;  %v1976_v60 = vshrl.u32 %v6839_v12, 16 }
 0x25e   : > { %v995_v62 = vmax.f32 %v979_v56, 0.0  ;;  %5144 = vmatprep.mubr.bf16.mxu0 %v1965_v58  ;;  %v1287_v61 = vpop.f32.mrb[16].mxu0  ;;  %5067 = vmatpush3.bf16.msra.mxu1 %v5715_v30  ;;  %v1979_v63 = vshll.u32 %v6839_v12, 16  ;;  %v1372_v0 = vrot.slane %v6876_v51, 4  ;;  %v1374_v2 = vrot.slane %v6881_v53, 4 }
 0x25f   : > { %v1137_v3 = vpack.c.bf16 %v997_v57, %v996_v45  ;;  %v1294_v4 = vmul.f32 %v6783_v54, %v1287_v61  ;;  %v5030_v6 = vpop.f32.mrb[17].mxu0  ;;  %v6893_v7 = vor.u32 %v1972_v59, %v1969_v47  ;;  %v1978_v13 = vrot.slane %v1976_v60, 3  ;;  %5068 = vmatprep.subr.bf16.mxu1 %v5717_v49  ;;  %v5722_v61 = vld [vmem:[#allocation11 + $0x18] sm:$0xff]  }
 0x260   : > { %v1136_v14 = vpack.c.bf16 %v995_v62, %v994_v50  ;;  %v1290_v15 = vpop.f32.mrb[18].mxu0  ;;  %v1981_v16 = vrot.slane %v1979_v63, 4  ;;  %v6900_v17 = vsel %vm1146_vm1, %v1370_v23, %v1372_v0  ;;  %v6903_v19 = vsel %vm1146_vm1, %v1372_v0, %v1374_v2  ;;  %v5723_v6 = vld [vmem:[#allocation11 + $0x68] sm:$0xff]  }
 0x261   : > { %v1160_v21 = vrot.slane %v1137_v3, 4  ;;  %v1296_v26 = vadd.f32 %v6788_v55, %v1294_v4  ;;  %v1295_v27 = vmul.f32 %v6783_v54, %v1290_v15  ;;  %v6910_v28 = vsel %vm1948_vm2, %v6833_v10, %v6893_v7  ;;  %5053 = vmatmul.mubr.bf16.gmra.mrb[8].mxu1 %v6900_v17  ;;  %v5031_v29 = vpop.f32.mrb[19].mxu0 }
 0x262   : > { %v1158_v23 = vrot.slane %v1136_v14, 4  ;;  %5145 = vmatmul.mubr.bf16.vlgmr.msra.gmra.mrb[20].mxu0 %v6910_v28  ;;  %v1982_v30 = vor.u32 %v1981_v16, %v1978_v13  ;;  %5069 = vmatpush3.bf16.msra.mxu1 %v5717_v49  ;;  %v1985_v31 = vshrl.u32 %v6876_v51, 16  ;;  %v1988_v32 = vshll.u32 %v6876_v51, 16  ;;  %v1913_v13 = vld [vmem:[#allocation2] sm:$0xf8] }
 0x263   : > { %1179 = vst [vmem:[#allocation2 + $0x48] sm:$0xf] %v1160_v21  ;;  %v1298_v54 = vmax.f32 %v1296_v26, 0.0  ;;  %v1297_v33 = vadd.f32 %v6788_v55, %v1295_v27  ;;  %5161 = vmatpush3.bf16.msra.mxu0 %v6776_v52  ;;  %5056 = vmatprep.mubr.bf16.mxu1 %v6903_v19  ;;  %v1994_v34 = vshrl.u32 %v6881_v53, 16  ;;  %v1997_v37 = vshll.u32 %v6881_v53, 16 }
 0x264   : > { %v6924_v39 = vsel %vm1146_vm1, %v1156_v36, %v1158_v23  ;;  %v6927_v41 = vsel %vm1146_vm1, %v1158_v23, %v1160_v21  ;;  %v6931_v55 = vsel %vm1948_vm2, %v6893_v7, %v1982_v30  ;;  %5162 = vmatprep.subr.bf16.mxu0 %v5718_v18  ;;  %5070 = vmatprep.subr.bf16.mxu1 %v5719_v20  ;;  %v1987_v52 = vrot.slane %v1985_v31, 3  ;;  %v6983_v29 = vld [vmem:[#allocation2] sm:$0xf0]  ;;  %v6985_v23 = vld [vmem:[#allocation2 + $0x8] sm:$0xff] }
 0x265   : > { %1178 = vst [vmem:[#allocation2 + $0x40] sm:$0xff] %v6927_v41  ;;  %v1302_v25 = vmul.f32 %v1301_v1, %v1298_v54  ;;  %v1299_v36 = vmax.f32 %v1297_v33, 0.0  ;;  %5148 = vmatprep.mubr.bf16.mxu0 %v6931_v55  ;;  %v1990_v43 = vrot.slane %v1988_v32, 4  ;;  %v1996_v44 = vrot.slane %v1994_v34, 3  ;;  %v5724_v54 = vld [vmem:[#allocation11 + $0x20] sm:$0xff]  }
 0x266   : > { %5071 = vmatpush3.bf16.msra.mxu1 %v5719_v20  ;;  %v1999_v45 = vrot.slane %v1997_v37, 4  ;;  %v6946_v46 = vrot.slane %v6924_v39, 4  ;;  %v6949_v47 = vrot.slane %v6927_v41, 4  ;;  %v2003_v49 = vshrl.u32 %v6924_v39, 16 }
 0x267   : > { %v1303_v50 = vmul.f32 %v1301_v1, %v1299_v36  ;;  %5163 = vmatpush3.bf16.msra.mxu0 %v5718_v18  ;;  %v1991_v56 = vor.u32 %v1990_v43, %v1987_v52  ;;  %5072 = vmatprep.subr.bf16.mxu1 %v5721_v38  ;;  %v2006_v57 = vshll.u32 %v6924_v39, 16  ;;  %v7620_v58 = vshrl.u32 %v6927_v41, 16  ;;  %v5725_v18 = vld [vmem:[#allocation11 + $0x70] sm:$0xff]   ;;  %v6996_v43 = vld [vmem:[#allocation2 + $0x10] sm:$0xf0] }
 0x268   : > { %5164 = vmatprep.subr.bf16.mxu0 %v5720_v42  ;;  %v2000_v59 = vor.u32 %v1999_v45, %v1996_v44  ;;  %v6958_v62 = vsel %vm1146_vm1, %v1374_v2, %v6946_v46  ;;  %v6963_v0 = vsel %vm1146_vm1, %v6946_v46, %v6949_v47  ;;  %v2005_v1 = vrot.slane %v2003_v49, 3 }
 0x269   : > { %v1304_v3 = vpack.c.bf16 %v1303_v50, %v1302_v25  ;;  %v6968_v4 = vsel %vm1948_vm2, %v1982_v30, %v1991_v56  ;;  %5057 = vmatmul.mubr.bf16.gmra.mrb[12].mxu1 %v6958_v62  ;;  %v2008_v2 = vrot.slane %v2006_v57, 4  ;;  %v2014_v15 = vrot.slane %v7620_v58, 3 }
 0x26a   : > { %5149 = vmatmul.mubr.bf16.gmra.mrb[24].mxu0 %v6968_v4  ;;  %v6975_v14 = vsel %vm1948_vm2, %v1991_v56, %v2000_v59  ;;  %5073 = vmatpush3.bf16.msra.mxu1 %v5721_v38  ;;  %v7617_v16 = vshll.u32 %v6927_v41, 16  ;;  %v1338_v20 = vld [vmem:[#allocation2 + $0x48] sm:$0xf]  ;;  %v2183_v52 = vshrl.u32 %v1913_v13, 16  ;;  %v2186_v36 = vshll.u32 %v1913_v13, 16  ;;  %v5726_v13 = vld [vmem:[#allocation11 + $0x28] sm:$0xff]  }
 0x26b   : > { %v1306_v21 = vrot.slane %v1304_v3, 4  ;;  %5152 = vmatprep.mubr.bf16.mxu0 %v6975_v14  ;;  %5165 = vmatpush3.bf16.msra.mxu0 %v5720_v42  ;;  %v6981_v26 = vor.u32 %v2008_v2, %v2005_v1  ;;  %v1380_v27 = vrot.slane %v1338_v20, 4  ;;  %v2021_v30 = vshrl.u32 %v1338_v20, 16 }
 0x26c   : > { %5166 = vmatprep.subr.bf16.mxu0 %v5722_v61  ;;  %5060 = vmatprep.mubr.bf16.mxu1 %v6963_v0  ;;  %v2017_v33 = vrot.slane %v7617_v16, 4  ;;  %v2024_v38 = vshll.u32 %v1338_v20, 16  ;;  %v6990_v25 = vld [vmem:[#allocation2 + $0x40] sm:$0xf]  ;;  %v1538_v45 = vrot.slane %v6983_v29, 4  ;;  %v1539_v50 = vrot.slane %v6985_v23, 4 }
 0x26d   : > { %1308 = vst [vmem:[#allocation2 + $0x50] ss:$-4 sps:$4 sm:$0xff] %v1306_v21   ;;  %5074 = vmatprep.subr.bf16.mxu1 %v5723_v6  ;;  %v6994_v42 = vsel %vm1948_vm2, %v2000_v59, %v6981_v26  ;;  %v7619_v56 = vshrl.u32 %v6985_v23, 16  ;;  %v1381_v1 = vsel %vm1146_vm1, %v6949_v47, %v1380_v27  ;;  %v2023_v3 = vrot.slane %v2021_v30, 3  ;;  %v5727_v21 = vld [vmem:[#allocation11 + $0x78] sm:$0xff]  }
 0x26e   : > { %5075 = vmatpush3.bf16.msra.mxu1 %v5723_v6  ;;  %v6998_v44 = vor.u32 %v2017_v33, %v2014_v15  ;;  %v7618_v59 = vshll.u32 %v6985_v23, 16  ;;  %v1542_v2 = vrot.slane %v6990_v25, 4  ;;  %v2026_v15 = vrot.slane %v2024_v38, 4 }
 0x26f   : > { %5167 = vmatpush3.bf16.msra.mxu0 %v5722_v61  ;;  %5076 = vmatprep.subr.bf16.mxu1 %v5725_v18  ;;  %v2185_v20 = vrot.slane %v2183_v52, 3  ;;  %v1727_v61 = vrot.slane %v6996_v43, 4  ;;  %v2188_v33 = vrot.slane %v2186_v36, 4  ;;  %v2193_v27 = vrot.slane %v7619_v56, 3  ;;  %v5729_v36 = vld [vmem:[#allocation11 + $0x1c0] sm:$0xff]  }
 0x270   : > { %5168 = vmatprep.subr.bf16.mxu0 %v5724_v54  ;;  %v7010_v6 = vsel %vm1948_vm2, %v6981_v26, %v6998_v44  ;;  %v2196_v30 = vrot.slane %v7618_v59, 4  ;;  %v7019_v16 = vsel %vm1146_vm1, %v6946_v46, %v1542_v2  ;;  %v1540_v52 = vsel %vm1146_vm1, %v1538_v45, %v1539_v50  ;;  %v5728_v59 = vld [vmem:[#allocation11 + $0x30] sm:$0xff]  }
 0x271   : > { %5061 = vmatmul.mubr.bf16.gmra.mrb[16].mxu1 %v1381_v1  ;;  %v7024_v38 = vsel %vm1146_vm1, %v1727_v61, %v6844_v22  ;;  %v2662_v1 = vshrl.u32 %v6829_v8, 16  ;;  %v2665_v2 = vshll.u32 %v6829_v8, 16  ;;  %v2189_v56 = vor.u32 %v2188_v33, %v2185_v20  ;;  %v5731_v33 = vld [vmem:[#allocation11 + $0x1c8] sm:$0xff]  }
 0x272   : > { %5153 = vmatmul.mubr.bf16.gmra.mrb[28].mxu0 %v6994_v42  ;;  %5077 = vmatpush3.bf16.msra.mxu1 %v5725_v18  ;;  %v2027_v18 = vor.u32 %v2026_v15, %v2023_v3  ;;  %v2197_v22 = vor.u32 %v2196_v30, %v2193_v27  ;;  %v1541_v3 = vsel %vm1146_vm1, %v1539_v50, %v6831_v9  ;;  %v5730_v15 = vld [vmem:[#allocation11 + $0x38] sm:$0xff]   ;;  %v2673_v9 = vrot.slane %v1967_v24, 4  ;;  %v5732_v24 = vld [vmem:[#allocation11 + $0x180] sm:$0xff]  }
 0x273   : > { %5156 = vmatprep.mubr.bf16.mxu0 %v7010_v6  ;;  %5169 = vmatpush3.bf16.msra.mxu0 %v5724_v54  ;;  %v2664_v8 = vrot.slane %v2662_v1, 4  ;;  %v2667_v58 = vrot.slane %v2665_v2, 5  ;;  %v2674_v50 = vrot.slane %v1970_v48, 5  ;;  %v2677_v1 = vrot.slane %v1976_v60, 4  ;;  %v5733_v2 = vld [vmem:[#allocation11 + $0x1d0] sm:$0xff]  }
 0x274   : > { %5170 = vmatprep.subr.bf16.mxu0 %v5726_v13  ;;  %5080 = vmatprep.mubr.bf16.mxu1 %v1540_v52  ;;  %v7029_v46 = vld [vmem:[#allocation2 + $0x48] sm:$0xff]  ;;  %v2681_v60 = vrot.slane %v1985_v31, 4  ;;  %v2689_v31 = vrot.slane %v2003_v49, 4  ;;  %v2690_v51 = vrot.slane %v2006_v57, 5  ;;  %v7706_v39 = vshll.u32 %v6927_v41, 16 }
 0x275   : > { %5078 = vmatprep.subr.bf16.mxu1 %v5727_v21  ;;  %v1740_v61 = vrot.slane %v7029_v46, 4  ;;  %v2438_v54 = vshrl.u32 %v7029_v46, 16  ;;  %v2441_v45 = vshll.u32 %v7029_v46, 16  ;;  %v2668_v27 = vor.u32 %v2667_v58, %v2664_v8 }
 0x276   : > { %5079 = vmatpush3.bf16.msra.mxu1 %v5727_v21  ;;  %v2028_v21 = vsel %vm1948_vm2, %v6998_v44, %v2027_v18  ;;  %v2678_v58 = vrot.slane %v1979_v63, 5  ;;  %v7070_v48 = vor.u32 %v2674_v50, %v2673_v9  ;;  %v2685_v63 = vrot.slane %v1994_v34, 4  ;;  %v5734_v18 = vld [vmem:[#allocation11 + $0x188] sm:$0xff]  }
 0x277   : > { %5171 = vmatpush3.bf16.msra.mxu0 %v5726_v13  ;;  %5096 = vmatprep.subr.bf16.mxu1 %v5729_v36  ;;  %v7039_v52 = vsel %vm1146_vm1, %v6949_v47, %v1740_v61  ;;  %v2440_v20 = vrot.slane %v2438_v54, 3  ;;  %v2443_v13 = vrot.slane %v2441_v45, 4  ;;  %v2198_v47 = vsel %vm1948_vm2, %v2189_v56, %v2197_v22 }
 0x278   : > { %5172 = vmatprep.subr.bf16.mxu0 %v5728_v59  ;;  %v7060_v56 = vsel %vm2660_vm3, %v2668_v27, %v6826_v5  ;;  %v2679_v12 = vor.u32 %v2678_v58, %v2677_v1  ;;  %v7705_v34 = vshrl.u32 %v6927_v41, 16  ;;  %v2694_v49 = vrot.slane %v7706_v39, 5  ;;  %v5736_v1 = vld [vmem:[#allocation11 + $0x190] sm:$0xff]  }
 0x279   : > { %5081 = vmatmul.mubr.bf16.vlgmr.msra.gmra.mrb[4].mxu1 %v1541_v3  ;;  %v7050_v30 = vor.u32 %v2443_v13, %v2440_v20  ;;  %v7098_v3 = vor.u32 %v2690_v51, %v2689_v31  ;;  %v2199_v57 = vsel %vm1948_vm2, %v2197_v22, %v6833_v10  ;;  %v2860_v13 = vshrl.u32 %v6983_v29, 16  ;;  %v5738_v31 = vld [vmem:[#allocation11 + $0x198] sm:$0xff]  }
 0x27a   : > { %5157 = vmatmul.mubr.bf16.gmra.mrb[32].mxu0 %v2028_v21  ;;  %5097 = vmatpush3.bf16.msra.mxu1 %v5729_v36  ;;  %v2863_v21 = vshll.u32 %v6983_v29, 16  ;;  %v7707_v10 = vshrl.u32 %v6985_v23, 16  ;;  %v7708_v50 = vshll.u32 %v6985_v23, 16  ;;  %v3048_v58 = vshrl.u32 %v6996_v43, 16 }
 0x27b   : > { %5173 = vmatpush3.bf16.msra.mxu0 %v5728_v59  ;;  %5176 = vmatprep.mubr.bf16.mxu0 %v2198_v47  ;;  %v7068_v11 = vsel %vm1948_vm2, %v6998_v44, %v7050_v30  ;;  %v2682_v59 = vrot.slane %v1988_v32, 5  ;;  %v7083_v44 = vsel %vm2660_vm3, %v6826_v5, %v7070_v48  ;;  %v7091_v32 = vsel %vm2660_vm3, %v7070_v48, %v2679_v12 }
 0x27c   : > { %5174 = vmatprep.subr.bf16.mxu0 %v5730_v15  ;;  %5084 = vmatprep.mubr.bf16.mxu1 %v6857_v35  ;;  %v2686_v35 = vrot.slane %v1997_v37, 5  ;;  %v2693_v37 = vrot.slane %v7705_v34, 4  ;;  %v2867_v22 = vrot.slane %v7707_v10, 4  ;;  %v2862_v27 = vrot.slane %v2860_v13, 4 }
 0x27d   : > { %5098 = vmatprep.subr.bf16.mxu1 %v5731_v33  ;;  %v2683_v36 = vor.u32 %v2682_v59, %v2681_v60  ;;  %v2865_v9 = vrot.slane %v2863_v21, 5  ;;  %v2868_v29 = vrot.slane %v7708_v50, 5  ;;  %v3051_v60 = vshll.u32 %v6996_v43, 16  ;;  %v3029_v59 = vld [vmem:[#allocation2 + $0x50] sm:$0x1f] }
 0x27e   : > { %5099 = vmatpush3.bf16.msra.mxu1 %v5731_v33  ;;  %v2687_v53 = vor.u32 %v2686_v35, %v2685_v63  ;;  %v7114_v41 = vor.u32 %v2694_v49, %v2693_v37  ;;  %v5737_v33 = vld [vmem:[#allocation11 + $0x1e0] sm:$0xff]   ;;  %v3050_v23 = vrot.slane %v3048_v58, 4  ;;  %v3080_v43 = vrot.slane %v2441_v45, 5  ;;  %v2357_v49 = vld [vmem:[#allocation2 + $0x10] sm:$0xf8] }
 0x27f   : > { %5175 = vmatpush3.bf16.msra.mxu0 %v5730_v15  ;;  %5100 = vmatprep.subr.bf16.mxu1 %v5733_v2  ;;  %v7096_v8 = vsel %vm2660_vm3, %v2679_v12, %v2683_v36  ;;  %v5735_v15 = vld [vmem:[#allocation11 + $0x1d8] sm:$0xff]   ;;  %v3079_v12 = vrot.slane %v2438_v54, 4  ;;  %v3084_v51 = vshrl.u32 %v3029_v59, 16  ;;  %v5739_v54 = vld [vmem:[#allocation11 + $0x1e8] sm:$0xff]   ;;  %v2201_v21 = vshrl.u32 %v6990_v25, 16  ;;  %v5745_v58 = vld [vmem:[#allocation11 + $0x140] sm:$0xff]  }
 0x280   : > { %5192 = vmatprep.subr.bf16.mxu0 %v5732_v24  ;;  %v7106_v20 = vsel %vm2660_vm3, %v2683_v36, %v2687_v53  ;;  %v7112_v47 = vsel %vm2660_vm3, %v2687_v53, %v7098_v3  ;;  %v3053_v36 = vrot.slane %v3051_v60, 5  ;;  %v3087_v53 = vshll.u32 %v3029_v59, 16  ;;  %v5746_v60 = vld [vmem:[#allocation11 + $0x1b8] sm:$0xff]  }
 0x281   : > { %5085 = vmatmul.mubr.bf16.gmra.mrb[8].mxu1 %v6865_v40  ;;  %v3081_v37 = vor.u32 %v3080_v43, %v3079_v12  ;;  %v2204_v10 = vshll.u32 %v6990_v25, 16  ;;  %v2203_v50 = vrot.slane %v2201_v21, 3  ;;  %v5755_v43 = vld [vmem:[#allocation11 + $0x88] sm:$0xff]   ;;  %v5765_v21 = vld [vmem:[#allocation11 + $0x218] sm:$0xff]  }
 0x282   : > { %5177 = vmatmul.mubr.bf16.vlgmr.msra.gmra.mrb[20].mxu0 %v2199_v57  ;;  %5101 = vmatpush3.bf16.msra.mxu1 %v5733_v2  ;;  %v7125_v2 = vsel %vm2660_vm3, %v7098_v3, %v7114_v41  ;;  %v3054_v34 = vor.u32 %v3053_v36, %v3050_v23  ;;  %v3089_v39 = vrot.slane %v3087_v53, 5  ;;  %v5740_v57 = vld [vmem:[#allocation11 + $0x1a0] sm:$0xff]   ;;  %v5747_v23 = vld [vmem:[#allocation11 + $0x148] sm:$0xff]   ;;  %v5749_v36 = vld [vmem:[#allocation11 + $0x158] sm:$0xff]  }
 0x283   : > { %5180 = vmatprep.mubr.bf16.mxu0 %v6910_v28  ;;  %5193 = vmatpush3.bf16.msra.mxu0 %v5732_v24  ;;  %v2866_v28 = vor.u32 %v2865_v9, %v2862_v27  ;;  %v2869_v24 = vor.u32 %v2868_v29, %v2867_v22  ;;  %v2376_v22 = vshrl.u32 %v2357_v49, 16  ;;  %v5742_v27 = vld [vmem:[#allocation11 + $0x1a8] sm:$0xff]   ;;  %v5743_v9 = vld [vmem:[#allocation11 + $0x1f8] sm:$0xff]   ;;  %v2206_v29 = vrot.slane %v2204_v10, 4 }
 0x284   : > { %5194 = vmatprep.subr.bf16.mxu0 %v5734_v18  ;;  %5088 = vmatprep.mubr.bf16.mxu1 %v6900_v17  ;;  %v7145_v45 = vsel %vm2660_vm3, %v3054_v34, %v7070_v48  ;;  %v5759_v53 = vld [vmem:[#allocation11 + $0xa8] sm:$0xff]  }
 0x285   : > { %5102 = vmatprep.subr.bf16.mxu1 %v5735_v15  ;;  %v7132_v63 = vsel %vm2660_vm3, %v2866_v28, %v2869_v24  ;;  %v7136_v35 = vsel %vm2660_vm3, %v2869_v24, %v6826_v5  ;;  %v5741_v5 = vld [vmem:[#allocation11 + $0x1f0] sm:$0xff]   ;;  %v2207_v24 = vor.u32 %v2206_v29, %v2203_v50  ;;  %v5769_v50 = vld [vmem:[#allocation11 + $0x238] sm:$0xff]  }
 0x286   : > { %5103 = vmatpush3.bf16.msra.mxu1 %v5735_v15  ;;  %v7150_v15 = vsel %vm2660_vm3, %v7114_v41, %v3081_v37  ;;  %v5744_v28 = vld [vmem:[#allocation11 + $0x1b0] sm:$0xff]  }
 0x287   : > { %5195 = vmatpush3.bf16.msra.mxu0 %v5734_v18  ;;  %5104 = vmatprep.subr.bf16.mxu1 %v5737_v33  ;;  %v3086_v18 = vrot.slane %v3084_v51, 4  ;;  %v2208_v59 = vsel %vm1948_vm2, %v6981_v26, %v2207_v24 }
 0x288   : > { %5196 = vmatprep.subr.bf16.mxu0 %v5736_v1 }
 0x289   : > { %5089 = vmatmul.mubr.bf16.gmra.mrb[12].mxu1 %v6903_v19  ;;  %v3090_v13 = vor.u32 %v3089_v39, %v3086_v18  ;;  %v5761_v39 = vld [vmem:[#allocation11 + $0xb8] sm:$0xff]  }
 0x28a   : > { %5181 = vmatmul.mubr.bf16.gmra.mrb[24].mxu0 %v6931_v55  ;;  %5105 = vmatpush3.bf16.msra.mxu1 %v5737_v33  ;;  %v2379_v33 = vshll.u32 %v2357_v49, 16  ;;  %v5762_v49 = vld [vmem:[#allocation11 + $0x200] sm:$0xff]  }
 0x28b   : > { %5184 = vmatprep.mubr.bf16.mxu0 %v6968_v4  ;;  %5197 = vmatpush3.bf16.msra.mxu0 %v5736_v1  ;;  %v7155_v48 = vsel %vm2660_vm3, %v3081_v37, %v3090_v13  ;;  %v2378_v1 = vrot.slane %v2376_v22, 3  ;;  %v5760_v37 = vld [vmem:[#allocation11 + $0xb0] sm:$0xff]  }
 0x28c   : > { %5198 = vmatprep.subr.bf16.mxu0 %v5738_v31  ;;  %5092 = vmatprep.mubr.bf16.mxu1 %v6958_v62  ;;  %v2381_v25 = vrot.slane %v2379_v33, 4  ;;  %v5764_v13 = vld [vmem:[#allocation11 + $0x210] sm:$0xff]  }
 0x28d   : > { %5106 = vmatprep.subr.bf16.mxu1 %v5739_v54 }
 0x28e   : > { %5107 = vmatpush3.bf16.msra.mxu1 %v5739_v54 }
 0x28f   : > { %5199 = vmatpush3.bf16.msra.mxu0 %v5738_v31  ;;  %5108 = vmatprep.subr.bf16.mxu1 %v5741_v5 }
 0x290   : > { %5200 = vmatprep.subr.bf16.mxu0 %v5740_v57 }
 0x291   : > { %5093 = vmatmul.mubr.bf16.gmra.mrb[16].mxu1 %v7019_v16  ;;  %v2382_v16 = vor.u32 %v2381_v25, %v2378_v1  ;;  %v5771_v1 = vld [vmem:[#allocation12 + $0x8] sm:$0xff]  }
 0x292   : > { %5185 = vmatmul.mubr.bf16.gmra.mrb[28].mxu0 %v6975_v14  ;;  %5109 = vmatpush3.bf16.msra.mxu1 %v5741_v5 }
 0x293   : > { %5188 = vmatprep.mubr.bf16.mxu0 %v6994_v42  ;;  %5201 = vmatpush3.bf16.msra.mxu0 %v5740_v57  ;;  %v2391_v12 = vsel %vm1948_vm2, %v2382_v16, %v6893_v7  ;;  %v5751_v7 = vld [vmem:[#allocation11 + $0x168] sm:$0xff]  }
 0x294   : > { %5202 = vmatprep.subr.bf16.mxu0 %v5742_v27  ;;  %5112 = vmatprep.mubr.bf16.mxu1 %v7024_v38  ;;  %v5748_v38 = vld [vmem:[#allocation11 + $0x150] sm:$0xff]   ;;  %v5763_v57 = vld [vmem:[#allocation11 + $0x208] sm:$0xff]  }
 0x295   : > { %5110 = vmatprep.subr.bf16.mxu1 %v5743_v9 }
 0x296   : > { %5111 = vmatpush3.bf16.msra.mxu1 %v5743_v9 }
 0x297   : > { %5203 = vmatpush3.bf16.msra.mxu0 %v5742_v27  ;;  %5224 = vmatprep.subr.bf16.mxu1 %v5745_v58  ;;  %v5768_v27 = vld [vmem:[#allocation11 + $0x230] sm:$0xff]  }
 0x298   : > { %5204 = vmatprep.subr.bf16.mxu0 %v5744_v28 }
 0x299   : > { %5113 = vmatmul.mubr.bf16.vlgmr.msra.gmra.mrb[4].mxu1 %v6865_v40  ;;  %v5750_v40 = vld [vmem:[#allocation11 + $0x160] sm:$0xff]  }
 0x29a   : > { %5189 = vmatmul.mubr.bf16.gmra.mrb[32].mxu0 %v2208_v59  ;;  %5225 = vmatpush3.bf16.msra.mxu1 %v5745_v58 }
 0x29b   : > { %5205 = vmatpush3.bf16.msra.mxu0 %v5744_v28  ;;  %5208 = vmatprep.mubr.bf16.mxu0 %v2391_v12 }
 0x29c   : > { %5206 = vmatprep.subr.bf16.mxu0 %v5746_v60  ;;  %5116 = vmatprep.mubr.bf16.mxu1 %v6900_v17  ;;  %v1700_v17 = vld [vmem:[#allocation2 + $0x50] sm:$0xf] }
 0x29d   : > { %5226 = vmatprep.subr.bf16.mxu1 %v5747_v23 }
 0x29e   : > { %5227 = vmatpush3.bf16.msra.mxu1 %v5747_v23 }
 0x29f   : > { %5207 = vmatpush3.bf16.msra.mxu0 %v5746_v60  ;;  %5228 = vmatprep.subr.bf16.mxu1 %v5748_v38 }
 0x2a1   : > { %5117 = vmatmul.mubr.bf16.gmra.mrb[8].mxu1 %v6903_v19  ;;  %v5752_v19 = vld [vmem:[#allocation11 + $0x170] sm:$0xff]  }
 0x2a2   : > { %5209 = vmatmul.mubr.bf16.vlgmr.msra.gmra.mrb[20].mxu0 %v6931_v55  ;;  %5229 = vmatpush3.bf16.msra.mxu1 %v5748_v38  ;;  %v1742_v55 = vrot.slane %v1700_v17, 4 }
 0x2a3   : > { %5212 = vmatprep.mubr.bf16.mxu0 %v6968_v4  ;;  %5120 = vmatprep.mubr.bf16.mxu1 %v6958_v62  ;;  %v2447_v4 = vshrl.u32 %v1700_v17, 16  ;;  %v2450_v62 = vshll.u32 %v1700_v17, 16 }
 0x2a4   : > { %5230 = vmatprep.subr.bf16.mxu1 %v5749_v36  ;;  %v1743_v26 = vsel %vm1146_vm1, %v1740_v61, %v1742_v55  ;;  %v5757_v61 = vld [vmem:[#allocation11 + $0x98] sm:$0xff]  }
 0x2a5   : > { %v2449_v31 = vrot.slane %v2447_v4, 3 }
 0x2a6   : > { %5231 = vmatpush3.bf16.msra.mxu1 %v5749_v36 }
 0x2a7   : > { %5232 = vmatprep.subr.bf16.mxu1 %v5750_v40 }
 0x2a9   : > { %5121 = vmatmul.mubr.bf16.gmra.mrb[12].mxu1 %v6963_v0  ;;  %v5753_v0 = vld [vmem:[#allocation11 + $0x178] sm:$0xff]  }
 0x2aa   : > { %5213 = vmatmul.mubr.bf16.gmra.mrb[24].mxu0 %v6975_v14  ;;  %5233 = vmatpush3.bf16.msra.mxu1 %v5750_v40  ;;  %v2452_v14 = vrot.slane %v2450_v62, 4 }
 0x2ab   : > { %5216 = vmatprep.mubr.bf16.mxu0 %v6994_v42  ;;  %5124 = vmatprep.mubr.bf16.mxu1 %v7039_v52  ;;  %v5754_v42 = vld [vmem:[#allocation11 + $0x80] sm:$0xff]  }
 0x2ac   : > { %5234 = vmatprep.subr.bf16.mxu1 %v5751_v7  ;;  %v2453_v52 = vor.u32 %v2452_v14, %v2449_v31 }
 0x2ae   : > { %5235 = vmatpush3.bf16.msra.mxu1 %v5751_v7  ;;  %v2454_v46 = vsel %vm1948_vm2, %v7050_v30, %v2453_v52 }
 0x2af   : > { %5236 = vmatprep.subr.bf16.mxu1 %v5752_v19 }
 0x2b1   : > { %5125 = vmatmul.mubr.bf16.gmra.mrb[16].mxu1 %v1743_v26 }
 0x2b2   : > { %5217 = vmatmul.mubr.bf16.gmra.mrb[28].mxu0 %v7010_v6  ;;  %5237 = vmatpush3.bf16.msra.mxu1 %v5752_v19  ;;  %v5756_v6 = vld [vmem:[#allocation11 + $0x90] sm:$0xff]  }
 0x2b3   : > { %5220 = vmatprep.mubr.bf16.mxu0 %v7068_v11  ;;  %5240 = vmatprep.mubr.bf16.mxu1 %v7060_v56  ;;  %v2642_v56 = vld [vmem:[#allocation2 + $0x48] sm:$0x1f]  ;;  %v5758_v11 = vld [vmem:[#allocation11 + $0xa0] sm:$0xff]  }
 0x2b4   : > { %5238 = vmatprep.subr.bf16.mxu1 %v5753_v0  ;;  %v2698_v30 = vshrl.u32 %v2642_v56, 16  ;;  %v2701_v51 = vshll.u32 %v2642_v56, 16 }
 0x2b6   : > { %5239 = vmatpush3.bf16.msra.mxu1 %v5753_v0  ;;  %v2700_v54 = vrot.slane %v2698_v30, 4  ;;  %v2703_v34 = vrot.slane %v2701_v51, 5 }
 0x2b7   : > { %5256 = vmatprep.subr.bf16.mxu1 %v5754_v42 }
 0x2b8   : > { %v2704_v18 = vor.u32 %v2703_v34, %v2700_v54 }
 0x2b9   : > { %5241 = vmatmul.mubr.bf16.vlgmr.msra.gmra.mrb[20].mxu1 %v7083_v44 }
 0x2ba   : > { %5221 = vmatmul.mubr.bf16.gmra.mrb[32].mxu0 %v2454_v46  ;;  %5257 = vmatpush3.bf16.msra.mxu1 %v5754_v42  ;;  %v2705_v5 = vsel %vm2660_vm3, %v7114_v41, %v2704_v18  ;;  %v2624_v41 = vld [vmem:[#allocation2 + $0x40] sm:$0x1f] }
 0x2bb   : > { %5244 = vmatprep.mubr.bf16.mxu1 %v7091_v32  ;;  %5258 = vmatprep.subr.bf16.mxu1 %v5755_v43  ;;  %v2873_v10 = vshrl.u32 %v2624_v41, 16  ;;  %v2876_v22 = vshll.u32 %v2624_v41, 16 }
 0x2bd   : > { %v2875_v33 = vrot.slane %v2873_v10, 4 }
 0x2be   : > { %5259 = vmatpush3.bf16.msra.mxu1 %v5755_v43 }
 0x2bf   : > { %5260 = vmatprep.subr.bf16.mxu1 %v5756_v6 }
 0x2c1   : > { %5245 = vmatmul.mubr.bf16.gmra.mrb[24].mxu1 %v7096_v8 }
 0x2c2   : > { %5261 = vmatpush3.bf16.msra.mxu1 %v5756_v6  ;;  %5248 = vmatprep.mubr.bf16.mxu1 %v7106_v20 }
 0x2c3   : > { %5262 = vmatprep.subr.bf16.mxu1 %v5757_v61 }
 0x2c6   : > { %5263 = vmatpush3.bf16.msra.mxu1 %v5757_v61 }
 0x2c7   : > { %5264 = vmatprep.subr.bf16.mxu1 %v5758_v11 }
 0x2c9   : > { %5249 = vmatmul.mubr.bf16.gmra.mrb[28].mxu1 %v7112_v47 }
 0x2ca   : > { %5265 = vmatpush3.bf16.msra.mxu1 %v5758_v11  ;;  %5252 = vmatprep.mubr.bf16.mxu1 %v7125_v2 }
 0x2cb   : > { %5266 = vmatprep.subr.bf16.mxu1 %v5759_v53 }
 0x2ce   : > { %5267 = vmatpush3.bf16.msra.mxu1 %v5759_v53 }
 0x2cf   : > { %5268 = vmatprep.subr.bf16.mxu1 %v5760_v37 }
 0x2d1   : > { %5253 = vmatmul.mubr.bf16.gmra.mrb[32].mxu1 %v2705_v5 }
 0x2d2   : > { %5269 = vmatpush3.bf16.msra.mxu1 %v5760_v37  ;;  %5272 = vmatprep.mubr.bf16.mxu1 %v7132_v63  ;;  %v5766_v63 = vld [vmem:[#allocation11 + $0x220] sm:$0xff]  }
 0x2d3   : > { %5270 = vmatprep.subr.bf16.mxu1 %v5761_v39 }
 0x2d6   : > { %5271 = vmatpush3.bf16.msra.mxu1 %v5761_v39 }
 0x2d7   : > { %5288 = vmatprep.subr.bf16.mxu1 %v5762_v49 }
 0x2d9   : > { %5273 = vmatmul.mubr.bf16.vlgmr.msra.gmra.mrb[20].mxu1 %v7136_v35  ;;  %v5767_v35 = vld [vmem:[#allocation11 + $0x228] sm:$0xff]  }
 0x2da   : > { %5289 = vmatpush3.bf16.msra.mxu1 %v5762_v49  ;;  %5276 = vmatprep.mubr.bf16.mxu1 %v7083_v44  ;;  %v2878_v44 = vrot.slane %v2876_v22, 5 }
 0x2db   : > { %5290 = vmatprep.subr.bf16.mxu1 %v5763_v57 }
 0x2dc   : > { %v2879_v9 = vor.u32 %v2878_v44, %v2875_v33 }
 0x2de   : > { %5291 = vmatpush3.bf16.msra.mxu1 %v5763_v57  ;;  %v2880_v29 = vsel %vm2660_vm3, %v7098_v3, %v2879_v9  ;;  %v5770_v3 = vld [vmem:[#allocation12] sm:$0xff]  }
 0x2df   : > { %5292 = vmatprep.subr.bf16.mxu1 %v5764_v13  ;;  %5320 = vmatprep.subr.bf16.mxu0 %v5770_v3 }
 0x2e0   : > { %5321 = vmatpush3.bf16.msra.mxu0 %v5770_v3 }
 0x2e1   : > { %5277 = vmatmul.mubr.bf16.gmra.mrb[24].mxu1 %v7091_v32  ;;  %5322 = vmatprep.subr.bf16.mxu0 %v5771_v1 }
 0x2e2   : > { %5293 = vmatpush3.bf16.msra.mxu1 %v5764_v13  ;;  %5280 = vmatprep.mubr.bf16.mxu1 %v7096_v8 }
 0x2e3   : > { %5294 = vmatprep.subr.bf16.mxu1 %v5765_v21 }
 0x2e4   : > { %5323 = vmatpush3.bf16.msra.mxu0 %v5771_v1 }
 0x2e6   : > { %5295 = vmatpush3.bf16.msra.mxu1 %v5765_v21 }
 0x2e7   : > { %5296 = vmatprep.subr.bf16.mxu1 %v5766_v63 }
 0x2e9   : > { %5281 = vmatmul.mubr.bf16.gmra.mrb[28].mxu1 %v7106_v20 }
 0x2ea   : > { %5297 = vmatpush3.bf16.msra.mxu1 %v5766_v63  ;;  %5284 = vmatprep.mubr.bf16.mxu1 %v7112_v47 }
 0x2eb   : > { %5298 = vmatprep.subr.bf16.mxu1 %v5767_v35 }
 0x2ee   : > { %5299 = vmatpush3.bf16.msra.mxu1 %v5767_v35 }
 0x2ef   : > { %5300 = vmatprep.subr.bf16.mxu1 %v5768_v27 }
 0x2f1   : > { %5285 = vmatmul.mubr.bf16.gmra.mrb[32].mxu1 %v2880_v29 }
 0x2f2   : > { %5301 = vmatpush3.bf16.msra.mxu1 %v5768_v27  ;;  %5304 = vmatprep.mubr.bf16.mxu1 %v7145_v45  ;;  %v5772_v45 = vld [vmem:[#allocation12 + $0x10] sm:$0xff]  }
 0x2f3   : > { %5302 = vmatprep.subr.bf16.mxu1 %v5769_v50  ;;  %5324 = vmatprep.subr.bf16.mxu0 %v5772_v45 }
 0x2f4   : > { %5325 = vmatpush3.bf16.msra.mxu0 %v5772_v45 }
 0x2f6   : > { %5303 = vmatpush3.bf16.msra.mxu1 %v5769_v50 }
 0x2f9   : > { %5305 = vmatmul.mubr.bf16.vlgmr.msra.gmra.mrb[20].mxu1 %v7091_v32  ;;  %v5773_v32 = vld [vmem:[#allocation12 + $0x18] sm:$0xff]  }
 0x2fa   : > { %5308 = vmatprep.mubr.bf16.mxu1 %v7096_v8  ;;  %5326 = vmatprep.subr.bf16.mxu0 %v5773_v32  ;;  %v5774_v8 = vld [vmem:[#allocation12 + $0x20] sm:$0xff]  }
 0x2fb   : > { %5327 = vmatpush3.bf16.msra.mxu0 %v5773_v32 }
 0x2fc   : > { %5328 = vmatprep.subr.bf16.mxu0 %v5774_v8 }
 0x2ff   : > { %5329 = vmatpush3.bf16.msra.mxu0 %v5774_v8 }
 0x301   : > { %5309 = vmatmul.mubr.bf16.gmra.mrb[24].mxu1 %v7106_v20  ;;  %v5775_v20 = vld [vmem:[#allocation12 + $0x28] sm:$0xff]  }
 0x302   : > { %5312 = vmatprep.mubr.bf16.mxu1 %v7112_v47  ;;  %v5776_v47 = vld [vmem:[#allocation12 + $0x30] sm:$0xff]   ;;  %5330 = vmatprep.subr.bf16.mxu0 %v5775_v20 }
 0x303   : > { %5331 = vmatpush3.bf16.msra.mxu0 %v5775_v20 }
 0x304   : > { %5332 = vmatprep.subr.bf16.mxu0 %v5776_v47 }
 0x307   : > { %5333 = vmatpush3.bf16.msra.mxu0 %v5776_v47 }
 0x309   : > { %5313 = vmatmul.mubr.bf16.gmra.mrb[28].mxu1 %v7125_v2  ;;  %v5777_v2 = vld [vmem:[#allocation12 + $0x38] sm:$0xff]  }
 0x30a   : > { %5316 = vmatprep.mubr.bf16.mxu1 %v7150_v15  ;;  %5334 = vmatprep.subr.bf16.mxu0 %v5777_v2  ;;  %v7208_v15 = vld [vmem:[#allocation14] sm:$0xff]  }
 0x30b   : > { %5335 = vmatpush3.bf16.msra.mxu0 %v5777_v2 }
 0x30c   : > { %5352 = vmatprep.subr.bf16.mxu0 %v7208_v15 }
 0x311   : > { %5317 = vmatmul.mubr.bf16.gmra.mrb[32].mxu1 %v7155_v48  ;;  %v3261_v48 = vlaneseq }
 0x313   : > { %v7211_v25 = vshrl.u32 %v3261_v48, 7 }
 0x315   : > { %v3264_v58 = vadd.s32 16, %v7211_v25  ;;  %v3282_v23 = vand.u32 15, %v7211_v25  ;;  %v3268_v12 = vadd.s32 48, %v7211_v25  ;;  %v3266_v36 = vadd.s32 32, %v7211_v25 }
 0x316   : > { %v3272_v6 = vadd.s32 80, %v7211_v25  ;;  %v3270_v56 = vadd.s32 64, %v7211_v25  ;;  %v3276_v63 = vadd.s32 112, %v7211_v25  ;;  %v3274_v22 = vadd.s32 96, %v7211_v25 }
 0x317   : > { %v3296_v59 = vand.u32 15, %v3264_v58  ;;  %vm3470_vm5 = vcmp.eq.s32.totalorder %v3282_v23, 0  ;;  %v3324_v31 = vand.u32 15, %v3268_v12  ;;  %v3310_v43 = vand.u32 15, %v3266_v36 }
 0x318   : > { %v3352_v5 = vand.u32 15, %v3272_v6  ;;  %v3338_v21 = vand.u32 15, %v3270_v56  ;;  %v3380_v45 = vand.u32 15, %v3276_v63  ;;  %v3366_v47 = vand.u32 15, %v3274_v22 }
 0x319   : > { %vm3472_vm4 = vcmp.eq.s32.totalorder %v3296_v59, 0  ;;  %vm3476_vm6 = vcmp.eq.s32.totalorder %v3324_v31, 0  ;;  %vm3474_vm7 = vcmp.eq.s32.totalorder %v3310_v43, 0  ;;  %v3265_v36 = vadd.s32 24, %v7211_v25 }
 0x31a   : > { %vm3480_vm8 = vcmp.eq.s32.totalorder %v3352_v5, 0  ;;  %vm3478_vm9 = vcmp.eq.s32.totalorder %v3338_v21, 0  ;;  %vm3484_vm10 = vcmp.eq.s32.totalorder %v3380_v45, 0  ;;  %vm3482_vm11 = vcmp.eq.s32.totalorder %v3366_v47, 0 }
 0x31b   : > { %v3267_v31 = vadd.s32 40, %v7211_v25 }
 0x36c   : > { %v5114_v28 = vpop.f32.mrb[4].mxu1 }
 0x36d   : > { %v1834_v24 = vpop.f32.mrb[5].mxu1 }
 0x36e   : > { %v5115_v16 = vpop.f32.mrb[6].mxu1 }
 0x36f   : > { %v1837_v60 = vpop.f32.mrb[7].mxu1 }
 0x374   : > { %v5118_v38 = vpop.f32.mrb[8].mxu1 }
 0x375   : > { %v5210_v40 = vpop.f32.mrb[20].mxu0  ;;  %v1850_v7 = vpop.f32.mrb[9].mxu1 }
 0x376   : > { %v3520_v17 = vsel %vm3472_vm4, 0.0, %v5210_v40  ;;  %v2545_v19 = vpop.f32.mrb[21].mxu0  ;;  %v5119_v55 = vpop.f32.mrb[10].mxu1  ;;  %v3263_v40 = vadd.s32 8, %v7211_v25 }
 0x377   : > { %v7217_v4 = vadd.f32 %v5114_v28, %v3520_v17  ;;  %v3518_v62 = vsel %vm3470_vm5, 0.0, %v2545_v19  ;;  %v5211_v26 = vpop.f32.mrb[22].mxu0  ;;  %v1853_v0 = vpop.f32.mrb[11].mxu1 }
 0x378   : > { %v7219_v14 = vadd.f32 %v3518_v62, %v1834_v24  ;;  %v7221_v42 = vadd.f32 %v5211_v26, %v5115_v16  ;;  %v2548_v52 = vpop.f32.mrb[23].mxu0  ;;  %v3289_v17 = vand.u32 15, %v3263_v40  ;;  %v3269_v62 = vadd.s32 56, %v7211_v25 }
 0x379   : > { %v7223_v46 = vadd.f32 %v2548_v52, %v1837_v60 }
 0x37a   : > { %vm3551_vm13 = vcmp.eq.s32.totalorder %v3289_v17, 15  ;;  %v3277_v17 = vadd.s32 120, %v7211_v25 }
 0x37c   : > { %v5122_v61 = vpop.f32.mrb[12].mxu1 }
 0x37d   : > { %v5214_v11 = vpop.f32.mrb[24].mxu0  ;;  %v1866_v30 = vpop.f32.mrb[13].mxu1 }
 0x37e   : > { %v3524_v51 = vsel %vm3476_vm6, 0.0, %v5214_v11  ;;  %v2561_v53 = vpop.f32.mrb[25].mxu0  ;;  %v5123_v54 = vpop.f32.mrb[14].mxu1 }
 0x37f   : > { %v7227_v34 = vadd.f32 %v5118_v38, %v3524_v51  ;;  %v3522_v37 = vsel %vm3474_vm7, 0.0, %v2561_v53  ;;  %v5215_v18 = vpop.f32.mrb[26].mxu0  ;;  %v1869_v39 = vpop.f32.mrb[15].mxu1  ;;  %v3331_v53 = vand.u32 15, %v3269_v62 }
 0x380   : > { %v7229_v49 = vadd.f32 %v3522_v37, %v1850_v7  ;;  %v7231_v57 = vadd.f32 %v5215_v18, %v5119_v55  ;;  %v2564_v13 = vpop.f32.mrb[27].mxu0  ;;  %v3303_v7 = vand.u32 15, %v3265_v36  ;;  %v7258_v55 = vld [vmem:[%s7709_s3] ss:$0 sm:$0xff]  ;;  %v3317_v37 = vand.u32 15, %v3267_v31  ;;  %s4676_s3 = sshll.u32 %s7702_s17, 4 }
 0x381   : > { %v7233_v41 = vadd.f32 %v2564_v13, %v1853_v0  ;;  %vm7279_vm14 = vcmp.eq.s32.totalorder %v3331_v53, 15  ;;  %v3387_v53 = vand.u32 15, %v3277_v17  ;;  %s4303_s17 = sadd.s32 %s4677_s28, %s4676_s3 }
 0x382   : > { %vm3553_vm12 = vcmp.eq.s32.totalorder %v3303_v7, 15  ;;  %vm7285_vm15 = vcmp.eq.s32.totalorder %v3317_v37, 15  ;;  %v5779_v7 = vld [vmem:[#allocation14 + $0x8] sm:$0xff]  }
 0x383   : > { %vm7331_vm2 = vcmp.eq.s32.totalorder %v3387_v53, 15 }
 0x384   : > { %v5126_v10 = vpop.f32.mrb[16].mxu1 }
 0x385   : > { %v5218_v35 = vpop.f32.mrb[28].mxu0  ;;  %v1882_v33 = vpop.f32.mrb[17].mxu1 }
 0x386   : > { %v3528_v44 = vsel %vm3480_vm8, 0.0, %v5218_v35  ;;  %v2577_v27 = vpop.f32.mrb[29].mxu0  ;;  %v5127_v9 = vpop.f32.mrb[18].mxu1 }
 0x387   : > { %v7237_v50 = vadd.f32 %v5122_v61, %v3528_v44  ;;  %v3526_v29 = vsel %vm3478_vm9, 0.0, %v2577_v27  ;;  %v5219_v3 = vpop.f32.mrb[30].mxu0  ;;  %v1885_v1 = vpop.f32.mrb[19].mxu1  ;;  %v7268_v61 = vld [vmem:[%s7710_s14] ss:$0 sm:$0xff]  ;;  %s4678_s14 = sshll.u32 %s4303_s17, 6 }
 0x388   : > { %v7239_v32 = vadd.f32 %v3526_v29, %v1866_v30  ;;  %v7241_v8 = vadd.f32 %v5219_v3, %v5123_v54  ;;  %v2580_v20 = vpop.f32.mrb[31].mxu0 }
 0x389   : > { %v7243_v2 = vadd.f32 %v2580_v20, %v1869_v39  ;;  %v3273_v39 = vadd.s32 88, %v7211_v25 }
 0x38b   : > { %v3359_v3 = vand.u32 15, %v3273_v39 }
 0x38d   : > { %v5222_v48 = vpop.f32.mrb[32].mxu0  ;;  %vm7305_vm0 = vcmp.eq.s32.totalorder %v3359_v3, 15 }
 0x38e   : > { %v3532_v58 = vsel %vm3484_vm10, 0.0, %v5222_v48  ;;  %v2593_v28 = vpop.f32.mrb[33].mxu0 }
 0x38f   : > { %v7245_v24 = vadd.f32 %v5126_v10, %v3532_v58  ;;  %v3530_v16 = vsel %vm3482_vm11, 0.0, %v2593_v28  ;;  %v5223_v60 = vpop.f32.mrb[34].mxu0 }
 0x390   : > { %v7247_v59 = vadd.f32 %v3530_v16, %v1882_v33  ;;  %v7249_v23 = vadd.f32 %v5223_v60, %v5127_v9  ;;  %v2596_v12 = vpop.f32.mrb[35].mxu0  ;;  %v3271_v33 = vadd.s32 72, %v7211_v25 }
 0x391   : > { %v7251_v38 = vadd.f32 %v2596_v12, %v1885_v1 }
 0x392   : > { %v3345_v12 = vand.u32 15, %v3271_v33 }
 0x394   : > { %vm7312_vm1 = vcmp.eq.s32.totalorder %v3345_v12, 15 }
 0x3cc   : > { %v5306_v19 = vpop.f32.mrb[20].mxu1 }
 0x3cd   : > { %v3616_v26 = vadd.f32 %v5306_v19, %v7217_v4  ;;  %v3182_v0 = vpop.f32.mrb[21].mxu1 }
 0x3ce   : > { %v3614_v52 = vadd.f32 %v7219_v14, %v3182_v0  ;;  %v5307_v43 = vpop.f32.mrb[22].mxu1 }
 0x3cf   : > { %v3639_v6 = vmul.f32 %v7258_v55, %v3616_v26  ;;  %v3601_v56 = vsel %vm3553_vm12, 0.0, %v5307_v43  ;;  %v3185_v11 = vpop.f32.mrb[23].mxu1  ;;  %v5785_v43 = vld [vmem:[#allocation14 + $0x38] sm:$0xff]  }
 0x3d0   : > { %v3637_v30 = vmul.f32 %v7258_v55, %v3614_v52  ;;  %v3617_v4 = vadd.f32 %v3601_v56, %v7221_v42  ;;  %v3599_v51 = vsel %vm3551_vm13, 0.0, %v3185_v11 }
 0x3d1   : > { %v3615_v54 = vadd.f32 %v3599_v51, %v7223_v46  ;;  %v3662_v14 = vadd.f32 %v7268_v61, %v3639_v6  ;;  %v3275_v6 = vadd.s32 104, %v7211_v25 }
 0x3d2   : > { %v3640_v18 = vmul.f32 %v7258_v55, %v3617_v4  ;;  %v3660_v5 = vadd.f32 %v7268_v61, %v3637_v30  ;;  %v5780_v4 = vld [vmem:[#allocation14 + $0x10] sm:$0xff]  }
 0x3d3   : > { %v3638_v13 = vmul.f32 %v7258_v55, %v3615_v54  ;;  %v3678_v44 = vmax.f32 %v3662_v14, 0.0 }
 0x3d4   : > { %v3663_v21 = vadd.f32 %v7268_v61, %v3640_v18  ;;  %v5310_v63 = vpop.f32.mrb[24].mxu1  ;;  %v3676_v1 = vmax.f32 %v3660_v5, 0.0 }
 0x3d5   : > { %v3661_v46 = vadd.f32 %v7268_v61, %v3638_v13  ;;  %v3620_v10 = vadd.f32 %v5310_v63, %v7227_v34  ;;  %v3198_v22 = vpop.f32.mrb[25].mxu1 }
 0x3d6   : > { %v3679_v27 = vmax.f32 %v3663_v21, 0.0  ;;  %v3618_v9 = vadd.f32 %v7229_v49, %v3198_v22  ;;  %v5311_v29 = vpop.f32.mrb[26].mxu1  ;;  %v3373_v21 = vand.u32 15, %v3275_v6  ;;  %v5788_v6 = vld [vmem:[%s6710_s15 + $0x10] sm:$0xff]  }
 0x3d7   : > { %v3643_v45 = vmul.f32 %v7258_v55, %v3620_v10  ;;  %v3605_v20 = vsel %vm7279_vm14, 0.0, %v5311_v29  ;;  %v3201_v34 = vpop.f32.mrb[27].mxu1  ;;  %v3677_v47 = vmax.f32 %v3661_v46, 0.0  ;;  %v5781_v46 = vld [vmem:[#allocation14 + $0x18] sm:$0xff]  }
 0x3d8   : > { %v3693_v48 = vpack.c.bf16 %v3679_v27, %v3678_v44  ;;  %v3641_v58 = vmul.f32 %v7258_v55, %v3618_v9  ;;  %v3621_v28 = vadd.f32 %v3605_v20, %v7231_v57  ;;  %v3603_v16 = vsel %vm7285_vm15, 0.0, %v3201_v34 }
 0x3d9   : > { %v3619_v49 = vadd.f32 %v3603_v16, %v7233_v41  ;;  %v3692_v60 = vpack.c.bf16 %v3677_v47, %v3676_v1  ;;  %v3666_v36 = vadd.f32 %v7268_v61, %v3643_v45  ;;  %vm7337_vm3 = vcmp.eq.s32.totalorder %v3373_v21, 15  ;;  %v5782_v45 = vld [vmem:[#allocation14 + $0x20] sm:$0xff]  }
 0x3da   : > { %v3644_v40 = vmul.f32 %v7258_v55, %v3621_v28  ;;  %v3664_v19 = vadd.f32 %v7268_v61, %v3641_v58 }
 0x3db   : > { %v3642_v62 = vmul.f32 %v7258_v55, %v3619_v49  ;;  %5336 = vmatprep.mubr.bf16.mxu0 %v3692_v60  ;;  %v3682_v56 = vmax.f32 %v3666_v36, 0.0 }
 0x3dc   : > { %v3667_v57 = vadd.f32 %v7268_v61, %v3644_v40  ;;  %v5314_v26 = vpop.f32.mrb[28].mxu1  ;;  %5337 = vmatmul.mubr.bf16.vlgmr.msra.gmra.mrb[36].mxu0 %v3693_v48  ;;  %v3680_v54 = vmax.f32 %v3664_v19, 0.0 }
 0x3dd   : > { %v3665_v0 = vadd.f32 %v7268_v61, %v3642_v62  ;;  %v3624_v31 = vadd.f32 %v5314_v26, %v7237_v50  ;;  %5353 = vmatpush3.bf16.msra.mxu0 %v7208_v15  ;;  %v3214_v52 = vpop.f32.mrb[29].mxu1 }
 0x3de   : > { %v3622_v11 = vadd.f32 %v7239_v32, %v3214_v52  ;;  %v5315_v30 = vpop.f32.mrb[30].mxu1  ;;  %5354 = vmatprep.subr.bf16.mxu0 %v5779_v7  ;;  %v3683_v51 = vmax.f32 %v3667_v57, 0.0  ;;  %v5784_v57 = vld [vmem:[#allocation14 + $0x30] sm:$0xff]   ;;  %v5786_v52 = vld [vmem:[%s6710_s15] sm:$0xff]  }
 0x3df   : > { %v3647_v50 = vmul.f32 %v7258_v55, %v3624_v31  ;;  %v3609_v15 = vsel %vm7305_vm0, 0.0, %v5315_v30  ;;  %v3217_v37 = vpop.f32.mrb[31].mxu1  ;;  %v3681_v14 = vmax.f32 %v3665_v0, 0.0  ;;  %v5791_v30 = vld [vmem:[%s6710_s15 + $0x28] sm:$0xff]  }
 0x3e0   : > { %v3645_v18 = vmul.f32 %v7258_v55, %v3622_v11  ;;  %v3625_v25 = vadd.f32 %v3609_v15, %v7241_v8  ;;  %v3607_v32 = vsel %vm7312_vm1, 0.0, %v3217_v37  ;;  %v3695_v39 = vpack.c.bf16 %v3683_v51, %v3682_v56  ;;  %v5789_v56 = vld [vmem:[%s6710_s15 + $0x18] sm:$0xff]   ;;  %v5790_v11 = vld [vmem:[%s6710_s15 + $0x20] sm:$0xff]  }
 0x3e1   : > { %v3623_v5 = vadd.f32 %v3607_v32, %v7243_v2  ;;  %5355 = vmatpush3.bf16.msra.mxu0 %v5779_v7  ;;  %v3694_v13 = vpack.c.bf16 %v3681_v14, %v3680_v54  ;;  %v3670_v63 = vadd.f32 %v7268_v61, %v3647_v50  ;;  %v5783_v7 = vld [vmem:[#allocation14 + $0x28] sm:$0xff]   ;;  %v5793_v51 = vld [vmem:[%s6710_s15 + $0x38] sm:$0xff]  }
 0x3e2   : > { %v3648_v42 = vmul.f32 %v7258_v55, %v3625_v25  ;;  %5356 = vmatprep.subr.bf16.mxu0 %v5780_v4  ;;  %v3668_v10 = vadd.f32 %v7268_v61, %v3645_v18 }
 0x3e3   : > { %v3646_v22 = vmul.f32 %v7258_v55, %v3623_v5  ;;  %5340 = vmatprep.mubr.bf16.mxu0 %v3694_v13  ;;  %v3686_v29 = vmax.f32 %v3670_v63, 0.0 }
 0x3e4   : > { %v3671_v8 = vadd.f32 %v7268_v61, %v3648_v42  ;;  %v5318_v35 = vpop.f32.mrb[32].mxu1  ;;  %5341 = vmatmul.mubr.bf16.gmra.mrb[40].mxu0 %v3695_v39  ;;  %v3684_v34 = vmax.f32 %v3668_v10, 0.0  ;;  %v7383_v10 = vld [vmem:[%s7723_s13] ss:$0 sm:$0xff]  ;;  %s7728_s13 = sld [smem:[#allocation51_spill]] }
 0x3e5   : > { %v3669_v33 = vadd.f32 %v7268_v61, %v3646_v22  ;;  %v3628_v44 = vadd.f32 %v5318_v35, %v7245_v24  ;;  %5357 = vmatpush3.bf16.msra.mxu0 %v5780_v4  ;;  %v3230_v27 = vpop.f32.mrb[33].mxu1  ;;  %v5792_v4 = vld [vmem:[%s6710_s15 + $0x30] sm:$0xff]   ;;  %v7388_v22 = vld [vmem:[%s7724_s10] ss:$0 sm:$0xff]  ;;  %s5996_s10 = scalar_lea.vmem %s7485_s9, 1024 }
 0x3e6   : > { %v3626_v3 = vadd.f32 %v7247_v59, %v3230_v27  ;;  %v5319_v1 = vpop.f32.mrb[34].mxu1  ;;  %5358 = vmatprep.subr.bf16.mxu0 %v5781_v46  ;;  %v3687_v20 = vmax.f32 %v3671_v8, 0.0  ;;  %v7394_v35 = vld [vmem:[%s7725_s6] ss:$0 sm:$0xff]  ;;  %p5997_p4 = scmp.ne.s32.totalorder %s7485_s9, %s5996_s10  ;;  %s6002_s6 = scalar_lea.vmem %s6001_s1, 2048 }
 0x3e7   : > { %v3651_v47 = vmul.f32 %v7258_v55, %v3628_v44  ;;  %v3613_v48 = vsel %vm7331_vm2, 0.0, %v5319_v1  ;;  %v3233_v24 = vpop.f32.mrb[35].mxu1  ;;  %v3685_v58 = vmax.f32 %v3669_v33, 0.0  ;;  %v7400_v44 = vld [vmem:[%s7726_s4] ss:$0 sm:$0xff]  ;;  %p6004_p8 = scmp.lt.s32.totalorder %s6002_s6, %s5996_s10 }
 0x3e8   : > { %v3649_v28 = vmul.f32 %v7258_v55, %v3626_v3  ;;  %v3629_v16 = vadd.f32 %v3613_v48, %v7249_v23  ;;  %v3611_v49 = vsel %vm7337_vm3, 0.0, %v3233_v24  ;;  %v3697_v59 = vpack.c.bf16 %v3687_v20, %v3686_v29  ;;  %p5998_p7 = pnand %p5997_p4, %p7729_p0 }
 0x3e9   : > { %v3627_v60 = vadd.f32 %v3611_v49, %v7251_v38  ;;  %5359 = vmatpush3.bf16.msra.mxu0 %v5781_v46  ;;  %v3696_v12 = vpack.c.bf16 %v3685_v58, %v3684_v34  ;;  %v3674_v36 = vadd.f32 %v7268_v61, %v3651_v47  ;;  %p6005_p5 = por %p6004_p8, %p6003_p9 }
 0x3ea   : > { %v3652_v40 = vmul.f32 %v7258_v55, %v3629_v16  ;;  %5360 = vmatprep.subr.bf16.mxu0 %v5782_v45  ;;  %v3672_v17 = vadd.f32 %v7268_v61, %v3649_v28  ;;  %s7490_s12 = scalar_lea.hbm %s7728_s13, %s4678_s14  ;;  %p5999_p3 = pneg %p5998_p7 }
 0x3eb   : > { %v3650_v19 = vmul.f32 %v7258_v55, %v3627_v60  ;;  %5344 = vmatprep.mubr.bf16.mxu0 %v3696_v12  ;;  %v3690_v38 = vmax.f32 %v3674_v36, 0.0 }
 0x3ec   : > { %v3675_v23 = vadd.f32 %v7268_v61, %v3652_v40  ;;  %5345 = vmatmul.mubr.bf16.gmra.mrb[44].mxu0 %v3697_v59  ;;  %v3688_v41 = vmax.f32 %v3672_v17, 0.0  ;;  %p6006_p1 = pnand %p6005_p5, %p5999_p3 }
 0x3ed   : > { %v3673_v62 = vadd.f32 %v7268_v61, %v3650_v19  ;;  %5361 = vmatpush3.bf16.msra.mxu0 %v5782_v45  ;;  %v5787_v61 = vld [vmem:[%s6710_s15 + $0x8] sm:$0xff]  }
 0x3ee   : > { %5362 = vmatprep.subr.bf16.mxu0 %v5783_v7  ;;  %v3691_v26 = vmax.f32 %v3675_v23, 0.0 }
 0x3ef   : > { %v3689_v0 = vmax.f32 %v3673_v62, 0.0 }
 0x3f0   : > { %v3699_v31 = vpack.c.bf16 %v3691_v26, %v3690_v38 }
 0x3f1   : > { %5363 = vmatpush3.bf16.msra.mxu0 %v5783_v7  ;;  %v3698_v55 = vpack.c.bf16 %v3689_v0, %v3688_v41 }
 0x3f2   : > { %5364 = vmatprep.subr.bf16.mxu0 %v5784_v57 }
 0x3f3   : > { %5348 = vmatprep.mubr.bf16.mxu0 %v3698_v55 }
 0x3f4   : > { %5349 = vmatmul.mubr.bf16.gmra.mrb[48].mxu0 %v3699_v31 }
 0x3f5   : > { %5365 = vmatpush3.bf16.msra.mxu0 %v5784_v57  ;;  %5368 = vmatprep.mubr.bf16.mxu0 %v5786_v52 }
 0x3f6   : > { %5366 = vmatprep.subr.bf16.mxu0 %v5785_v43 }
 0x3f9   : > { %5367 = vmatpush3.bf16.msra.mxu0 %v5785_v43 }
 0x3fc   : > { %5369 = vmatmul.mubr.bf16.vlgmr.msra.gmra.mrb[52].mxu0 %v5787_v61 }
 0x3fd   : > { %5372 = vmatprep.mubr.bf16.mxu0 %v5788_v6 }
 0x404   : > { %5373 = vmatmul.mubr.bf16.gmra.mrb[56].mxu0 %v5789_v56 }
 0x405   : > { %5376 = vmatprep.mubr.bf16.mxu0 %v5790_v11 }
 0x40c   : > { %5377 = vmatmul.mubr.bf16.gmra.mrb[60].mxu0 %v5791_v30 }
 0x40d   : > { %5380 = vmatprep.mubr.bf16.mxu0 %v5792_v4 }
 0x414   : > { %5381 = vmatmul.mubr.bf16.gmra.mrb[64].mxu0 %v5793_v51 }
 0x4af   : > { %v5338_v53 = vpop.f32.mrb[36].mxu0 }
 0x4b0   : > { %v3798_v54 = vpop.f32.mrb[37].mxu0  ;;  %v3870_v8 = vmul.f32 %v5338_v53, %v7383_v10 }
 0x4b1   : > { %v5339_v50 = vpop.f32.mrb[38].mxu0  ;;  %v3868_v2 = vmul.f32 %v7383_v10, %v3798_v54 }
 0x4b2   : > { %v3801_v15 = vpop.f32.mrb[39].mxu0  ;;  %v3871_v27 = vmul.f32 %v5339_v50, %v7383_v10  ;;  %v3893_v20 = vadd.f32 %v7394_v35, %v3870_v8 }
 0x4b3   : > { %v3869_v3 = vmul.f32 %v7383_v10, %v3801_v15  ;;  %v3891_v24 = vadd.f32 %v7394_v35, %v3868_v2 }
 0x4b4   : > { %v3894_v16 = vadd.f32 %v7394_v35, %v3871_v27 }
 0x4b5   : > { %v3892_v60 = vadd.f32 %v7394_v35, %v3869_v3 }
 0x4b7   : > { %v5342_v37 = vpop.f32.mrb[40].mxu0 }
 0x4b8   : > { %v3814_v14 = vpop.f32.mrb[41].mxu0  ;;  %v3874_v40 = vmul.f32 %v5342_v37, %v7383_v10 }
 0x4b9   : > { %v5343_v18 = vpop.f32.mrb[42].mxu0  ;;  %v3872_v17 = vmul.f32 %v7383_v10, %v3814_v14 }
 0x4ba   : > { %v3817_v25 = vpop.f32.mrb[43].mxu0  ;;  %v3875_v62 = vmul.f32 %v5343_v18, %v7383_v10  ;;  %v3897_v61 = vadd.f32 %v7394_v35, %v3874_v40 }
 0x4bb   : > { %v3873_v0 = vmul.f32 %v7383_v10, %v3817_v25  ;;  %v3895_v4 = vadd.f32 %v7394_v35, %v3872_v17 }
 0x4bc   : > { %v3898_v50 = vadd.f32 %v7394_v35, %v3875_v62 }
 0x4bd   : > { %v3896_v14 = vadd.f32 %v7394_v35, %v3873_v0 }
 0x4bf   : > { %v7364_v32 = vpop.f32.mrb[44].mxu0 }
 0x4c0   : > { %v7366_v39 = vpop.f32.mrb[45].mxu0  ;;  %v3878_v8 = vmul.f32 %v7364_v32, %v7383_v10 }
 0x4c1   : > { %v7368_v5 = vpop.f32.mrb[46].mxu0 }
 0x4c2   : > { %v7370_v13 = vpop.f32.mrb[47].mxu0 }
 0x4c7   : > { %v7372_v21 = vpop.f32.mrb[48].mxu0 }
 0x4c8   : > { %v7374_v63 = vpop.f32.mrb[49].mxu0 }
 0x4c9   : > { %v7376_v42 = vpop.f32.mrb[50].mxu0 }
 0x4ca   : > { %v7378_v46 = vpop.f32.mrb[51].mxu0 }
 0x4cf   : > { %v5370_v33 = vpop.f32.mrb[52].mxu0 }
 0x4d0   : > { %v4141_v9 = vmul.f32 %v5370_v33, %v7388_v22  ;;  %v4069_v29 = vpop.f32.mrb[53].mxu0  ;;  %v3876_v33 = vmul.f32 %v7383_v10, %v7366_v39 }
 0x4d1   : > { %v4139_v1 = vmul.f32 %v7388_v22, %v4069_v29  ;;  %v5371_v45 = vpop.f32.mrb[54].mxu0  ;;  %v3879_v29 = vmul.f32 %v7368_v5, %v7383_v10 }
 0x4d2   : > { %v4164_v34 = vadd.f32 %v7400_v44, %v4141_v9  ;;  %v4142_v47 = vmul.f32 %v5371_v45, %v7388_v22  ;;  %v4072_v48 = vpop.f32.mrb[55].mxu0 }
 0x4d3   : > { %v4162_v58 = vadd.f32 %v7400_v44, %v4139_v1  ;;  %v4140_v28 = vmul.f32 %v7388_v22, %v4072_v48 }
 0x4d4   : > { %v4180_v49 = vadd.f32 %v4164_v34, %v3893_v20  ;;  %v4165_v59 = vadd.f32 %v7400_v44, %v4142_v47  ;;  %v3877_v34 = vmul.f32 %v7383_v10, %v7370_v13 }
 0x4d5   : > { %v4178_v12 = vadd.f32 %v4162_v58, %v3891_v24  ;;  %v4163_v36 = vadd.f32 %v7400_v44, %v4140_v28  ;;  %v3901_v24 = vadd.f32 %v7394_v35, %v3878_v8 }
 0x4d6   : > { %v4181_v7 = vadd.f32 %v4165_v59, %v3894_v16  ;;  %v4196_v38 = vmax.f32 %v4180_v49, 0.0  ;;  %v3899_v49 = vadd.f32 %v7394_v35, %v3876_v33 }
 0x4d7   : > { %v4179_v19 = vadd.f32 %v4163_v36, %v3892_v60  ;;  %v5374_v23 = vpop.f32.mrb[56].mxu0  ;;  %v4194_v31 = vmax.f32 %v4178_v12, 0.0  ;;  %v3902_v12 = vadd.f32 %v7394_v35, %v3879_v29 }
 0x4d8   : > { %v4197_v57 = vmax.f32 %v4181_v7, 0.0  ;;  %v4145_v26 = vmul.f32 %v5374_v23, %v7388_v22  ;;  %v4085_v41 = vpop.f32.mrb[57].mxu0  ;;  %v3900_v7 = vadd.f32 %v7394_v35, %v3877_v34  ;;  %v3882_v23 = vmul.f32 %v7372_v21, %v7383_v10 }
 0x4d9   : > { %v4195_v55 = vmax.f32 %v4179_v19, 0.0  ;;  %v4143_v52 = vmul.f32 %v7388_v22, %v4085_v41  ;;  %v5375_v43 = vpop.f32.mrb[58].mxu0  ;;  %v3883_v41 = vmul.f32 %v7376_v42, %v7383_v10 }
 0x4da   : > { %v4711_v6 = vpack.c.bf16 %v4197_v57, %v4196_v38  ;;  %v4168_v56 = vadd.f32 %v7400_v44, %v4145_v26  ;;  %v4146_v11 = vmul.f32 %v5375_v43, %v7388_v22  ;;  %v4088_v30 = vpop.f32.mrb[59].mxu0  ;;  %v3880_v38 = vmul.f32 %v7383_v10, %v7374_v63 }
 0x4db   : > { %v4706_v51 = vpack.c.bf16 %v4195_v55, %v4194_v31  ;;  %v4166_v53 = vadd.f32 %v7400_v44, %v4143_v52  ;;  %v4144_v54 = vmul.f32 %v7388_v22, %v4088_v30  ;;  %v3881_v43 = vmul.f32 %v7383_v10, %v7378_v46 }
 0x4dc   : > { %4743 = vst [vmem:[%s7431_s20 + $0x8] sm:$0xff] %v4711_v6   ;;  %v4184_v15 = vadd.f32 %v4168_v56, %v3897_v61  ;;  %v4169_v37 = vadd.f32 %v7400_v44, %v4146_v11  ;;  %v3905_v56 = vadd.f32 %v7394_v35, %v3882_v23  ;;  %v3903_v46 = vadd.f32 %v7394_v35, %v3880_v38 }
 0x4dd   : > { %4707 = vst [vmem:[%s7431_s20] sm:$0xff] %v4706_v51   ;;  %v4182_v18 = vadd.f32 %v4166_v53, %v3895_v4  ;;  %v4167_v25 = vadd.f32 %v7400_v44, %v4144_v54  ;;  %v3906_v54 = vadd.f32 %v7394_v35, %v3883_v41 }
 0x4de   : > { %v4185_v2 = vadd.f32 %v4169_v37, %v3898_v50  ;;  %v4200_v3 = vmax.f32 %v4184_v15, 0.0  ;;  %v3904_v37 = vadd.f32 %v7394_v35, %v3881_v43 }
 0x4df   : > { %v4183_v27 = vadd.f32 %v4167_v25, %v3896_v14  ;;  %v5378_v9 = vpop.f32.mrb[60].mxu0  ;;  %v4198_v47 = vmax.f32 %v4182_v18, 0.0 }
 0x4e0   : > { %v4201_v1 = vmax.f32 %v4185_v2, 0.0  ;;  %v4149_v45 = vmul.f32 %v5378_v9, %v7388_v22  ;;  %v4101_v20 = vpop.f32.mrb[61].mxu0 }
 0x4e1   : > { %v4199_v32 = vmax.f32 %v4183_v27, 0.0  ;;  %v4147_v48 = vmul.f32 %v7388_v22, %v4101_v20  ;;  %v5379_v39 = vpop.f32.mrb[62].mxu0 }
 0x4e2   : > { %v4721_v58 = vpack.c.bf16 %v4201_v1, %v4200_v3  ;;  %v4172_v5 = vadd.f32 %v7400_v44, %v4149_v45  ;;  %v4150_v28 = vmul.f32 %v5379_v39, %v7388_v22  ;;  %v4104_v16 = vpop.f32.mrb[63].mxu0 }
 0x4e3   : > { %v4716_v59 = vpack.c.bf16 %v4199_v32, %v4198_v47  ;;  %v4170_v60 = vadd.f32 %v7400_v44, %v4147_v48  ;;  %v4148_v13 = vmul.f32 %v7388_v22, %v4104_v16 }
 0x4e4   : > { %4745 = vst [vmem:[%s7431_s20 + $0x18] sm:$0xff] %v4721_v58   ;;  %v4188_v36 = vadd.f32 %v4172_v5, %v3901_v24  ;;  %v4173_v40 = vadd.f32 %v7400_v44, %v4150_v28 }
 0x4e5   : > { %4744 = vst [vmem:[%s7431_s20 + $0x10] sm:$0xff] %v4716_v59   ;;  %v4186_v17 = vadd.f32 %v4170_v60, %v3899_v49  ;;  %v4171_v19 = vadd.f32 %v7400_v44, %v4148_v13 }
 0x4e6   : > { %v4189_v62 = vadd.f32 %v4173_v40, %v3902_v12  ;;  %v4204_v0 = vmax.f32 %v4188_v36, 0.0 }
 0x4e7   : > { %v4187_v57 = vadd.f32 %v4171_v19, %v3900_v7  ;;  %v5382_v26 = vpop.f32.mrb[64].mxu0  ;;  %v4202_v21 = vmax.f32 %v4186_v17, 0.0 }
 0x4e8   : > { %v4205_v31 = vmax.f32 %v4189_v62, 0.0  ;;  %v4153_v55 = vmul.f32 %v5382_v26, %v7388_v22  ;;  %v4117_v52 = vpop.f32.mrb[65].mxu0 }
 0x4e9   : > { %v4203_v61 = vmax.f32 %v4187_v57, 0.0  ;;  %v4151_v63 = vmul.f32 %v7388_v22, %v4117_v52  ;;  %v5383_v6 = vpop.f32.mrb[66].mxu0 }
 0x4ea   : > { %v4731_v11 = vpack.c.bf16 %v4205_v31, %v4204_v0  ;;  %v4176_v42 = vadd.f32 %v7400_v44, %v4153_v55  ;;  %v4154_v30 = vmul.f32 %v5383_v6, %v7388_v22  ;;  %v4120_v4 = vpop.f32.mrb[67].mxu0 }
 0x4eb   : > { %v4726_v10 = vpack.c.bf16 %v4203_v61, %v4202_v21  ;;  %v4174_v51 = vadd.f32 %v7400_v44, %v4151_v63  ;;  %v4152_v53 = vmul.f32 %v7388_v22, %v4120_v4 }
 0x4ec   : > { %4747 = vst [vmem:[%s7431_s20 + $0x28] sm:$0xff] %v4731_v11   ;;  %v4192_v50 = vadd.f32 %v4176_v42, %v3905_v56  ;;  %v4177_v15 = vadd.f32 %v7400_v44, %v4154_v30 }
 0x4ed   : > { %4746 = vst [vmem:[%s7431_s20 + $0x20] sm:$0xff] %v4726_v10   ;;  %v4190_v14 = vadd.f32 %v4174_v51, %v3903_v46  ;;  %v4175_v18 = vadd.f32 %v7400_v44, %v4152_v53 }
 0x4ee   : > { %v4193_v25 = vadd.f32 %v4177_v15, %v3906_v54  ;;  %v4208_v22 = vmax.f32 %v4192_v50, 0.0 }
 0x4ef   : > { %v4191_v8 = vadd.f32 %v4175_v18, %v3904_v37  ;;  %v4206_v33 = vmax.f32 %v4190_v14, 0.0 }
 0x4f0   : > { %v4209_v2 = vmax.f32 %v4193_v25, 0.0 }
 0x4f1   : > { %v4207_v27 = vmax.f32 %v4191_v8, 0.0 }
 0x4f2   : > { %v4741_v9 = vpack.c.bf16 %v4209_v2, %v4208_v22 }
 0x4f3   : > { %v4736_v35 = vpack.c.bf16 %v4207_v27, %v4206_v33 }
 0x4f4   : > { %4749 = vst [vmem:[%s7431_s20 + $0x38] sm:$0xff] %v4741_v9  }
 0x4f5   : > { %4748 = vst [vmem:[%s7431_s20 + $0x30] sm:$0xff] %v4736_v35  }
 0x4f6   : > { %6009 = shalt.err (!%p6006_p1)
}
 0x4f7   : > { %s6010_s29 = scalar_lea.hbm %s7490_s12, 1024  ;;  %s6014_s20 = scalar_lea.hbm %s7728_s13, 4096 }
 0x4f8   : > { %p6011_p11 = scmp.ne.s32.totalorder %s7490_s12, %s6010_s29  ;;  %p6015_p2 = scmp.lt.u32.totalorder %s7490_s12, %s7728_s13 }
 0x4f9   : > { %p6016_p12 = scmp.lt.u32.totalorder %s6014_s20, %s6010_s29  ;;  %p6018_p4 = scmp.lt.u32.totalorder %s6010_s29, %s7490_s12 }
 0x4fa   : > { %p6012_p10 = pnand %p6011_p11, %p7729_p0 }
 0x4fb   : > { %p6017_p6 = por %p6016_p12, %p6015_p2 }
 0x4fc   : > { %p6013_p13 = pneg %p6012_p10 }
 0x4fd   : > { %p6019_p7 = por %p6018_p4, %p6017_p6 }
 0x4ff   : > { %p6020_p3 = pnand %p6019_p7, %p6013_p13 }
 0x501   : > { %6023 = shalt.err (!%p6020_p3)
}
 0x502   : > { %s6173_s28 = smov 64   ;;  %s6174_s17 = smov 4  }
 0x503   : > { %5502 = dma.vmem_to_hbm [thread:$0]  (%p7729_p0), %s7485_s9, 1024, %s7490_s12, %s4291_s22, %s6173_s28, %s6173_s28, %s6174_s17  }
 0x504 PF: > { %p5540_p9 = scmp.ge.s32.totalorder %s6158_s16, 2  ;;  %s4321_s14 = sand.u32 1, %s6130_s24  }
 0x505   : > { %p7730_p8 = scmp.ne.s32.totalorder %s7672_s7, 0  ;;  %s4322_s15 = scalar_lea.sflag [#allocation5], %s4321_s14 }
 0x507   : > { %p5528_p5 = pnand %p5540_p9, %p7730_p8 }
 0x509   : > { %6101 = dma.done.wait (!%p5528_p5), %s4322_s15, 1024  }
 0x50a   : > { %6103 = vsyncadd (!%p5528_p5), %s4322_s15, 4294966272  ;;  %s36_s16 = sadd.s32 1, %s6158_s16   ;;  %s7732_s2 = sld [smem:[#allocation23_spill]] }
 0x50b   : > { %p7523_p1 = scmp.ge.s32.totalorder %s36_s16, 6   ;;  %s7733_s5 = sld [smem:[#allocation24_spill]] }
 0x50c   : > { %s7734_s9 = sld [smem:[#allocation25_spill]]  ;;  %s7735_s12 = smov %s6444_s21 }
 0x50d   : > { %s7736_s10 = smov %s6552_s19  ;;  %s7737_s7 = sld [smem:[#allocation28_spill]] }
 0x50e   : > { %s7738_s28 = sld [smem:[#allocation29_spill]]  ;;  %s7739_s29 = sld [smem:[#allocation31_spill]] }
 0x50f   : > { %s7740_s30 = sld [smem:[#allocation32_spill]]  ;;  %s7744_s20 = smov %s7767_s27 }
 0x510   : > { %s7742_s18 = smov %s7732_s2  ;;  %s7746_s22 = smov %s6126_s23 }
 0x511   : > { %s7743_s19 = smov %s7733_s5  ;;  %s7747_s23 = smov %s7735_s12 }
 0x512   : > { %s7745_s21 = smov %s7734_s9  ;;  %s7748_s24 = smov %s6134_s25 }
 0x513   : > { %s7749_s25 = smov %s6138_s26  ;;  %s7750_s26 = smov %s7736_s10 }
 0x514   : > { %s7751_s27 = smov %s7737_s7  ;;  %35 = sbr.rel (!%p7523_p1) target bundleno = 31 (0x1f), region = 173 }
 0x51b   :  { %4327 = vsyncpa [#allocation4], 1 }
 0x51c   :  { %4329 = vsyncpa [#allocation4 + $0x1], 1 }
 0x51d   :  { %4330 = vsyncpa [#allocation7], 1 }
 0x51e   :  { %4332 = vsyncpa [#allocation7 + $0x1], 1 }
 0x51f   :  { %4333 = vsyncpa [#allocation10], 1 }
 0x520   :  { %4334 = vsyncpa [#allocation13], 1 }
 0x521   :  { %4335 = vsyncpa [#allocation5], 1 }
 0x522   :  { %4337 = vsyncpa [#allocation5 + $0x1], 1 }

</bundles_post_ra>
